<compile_context>
chip_gen: v5e
topology: v5e:2x2
jax: 0.10.0
libtpu: 0.0.40
codegen_flags: <defaults>
</compile_context>

<pallas_src>
import functools

import jax
import jax.numpy as jnp
import numpy as np
from jax import lax
from jax.experimental import pallas as pl
from jax.experimental.pallas import tpu as pltpu


def _make_siren_kernel(num_hidden_layers, transposed, precision):
    """omega_0 is pre-folded into the weights/biases by the wrapper."""

    def kernel(x_ref, w1_ref, b1_ref, wh_ref, bh_ref, wf_ref, bf_ref, o_ref):
        dot = functools.partial(jnp.dot,
                                preferred_element_type=jnp.float32,
                                precision=precision)
        if transposed:
            # Activations are (hid, tm): hidden units on sublanes, pixels on
            # lanes -> lane-dense sin() and lane-dense output store.
            h = jnp.sin(dot(w1_ref[...], x_ref[...]) + b1_ref[...])
            if num_hidden_layers > 8:
                h = lax.fori_loop(
                    0, num_hidden_layers,
                    lambda l, hh: jnp.sin(dot(wh_ref[l], hh) + bh_ref[l]), h)
            else:
                for l in range(num_hidden_layers):
                    h = jnp.sin(dot(wh_ref[l], h) + bh_ref[l])
            o_ref[...] = (dot(wf_ref[...], h) + bf_ref[...]).astype(o_ref.dtype)
        else:
            h = jnp.sin(dot(x_ref[...], w1_ref[...]) + b1_ref[...])
            if num_hidden_layers > 8:
                h = lax.fori_loop(
                    0, num_hidden_layers,
                    lambda l, hh: jnp.sin(dot(hh, wh_ref[l]) + bh_ref[l]), h)
            else:
                for l in range(num_hidden_layers):
                    h = jnp.sin(dot(h, wh_ref[l]) + bh_ref[l])
            o_ref[...] = (dot(h, wf_ref[...]) + bf_ref[...]).astype(o_ref.dtype)

    return kernel


def _round_up(x, m):
    return ((int(x) + m - 1) // m) * m


def _pad_to(x, mult, axis):
    pad = (-x.shape[axis]) % mult
    if pad == 0:
        return x
    widths = [(0, 0)] * x.ndim
    widths[axis] = (0, pad)
    return jnp.pad(x, widths)


def siren_forward(coords, params, *, first_omega_0=30.0, hidden_omega_0=30.0,
                  tm=1024, precision=None):
    """coords: (..., in_features) f32.  params dict:
       w1 (hid,in), b1 (hid,), wh list[(hid,hid)], bh list[(hid,)],
       wf (out,hid), bf (out,).  Returns (..., out_features) f32."""
    in_f = params["w1"].shape[1]
    hid = params["w1"].shape[0]
    out_f = params["wf"].shape[0]
    L = len(params["wh"])

    # Fold omega_0 into the sine-layer weights/biases (one-time, tiny arrays):
    # sin(w*(xW^T+b)) == sin(x(wW)^T + wb).  The final Linear is unscaled.
    w1 = jnp.asarray(params["w1"], jnp.float32) * first_omega_0
    b1 = jnp.asarray(params["b1"], jnp.float32) * first_omega_0
    wh = [jnp.asarray(w, jnp.float32) * hidden_omega_0 for w in params["wh"]]
    bh = [jnp.asarray(b, jnp.float32) * hidden_omega_0 for b in params["bh"]]
    wf = jnp.asarray(params["wf"], jnp.float32)
    bf = jnp.asarray(params["bf"], jnp.float32)

    lead = coords.shape[:-1]
    x = jnp.asarray(coords, jnp.float32).reshape(-1, in_f)
    N = x.shape[0]

    # Narrow hidden widths leave most vector lanes idle in a (tm, hid) layout;
    # transpose the dataflow so the big row dimension maps to lanes.
    transposed = hid < 128

    # Tiling: big tiles amortize the ~0.35us per-step overhead; cap so the
    # grid keeps >= 2 steps whenever N allows (v7x megacore balance).
    align = 128 if transposed else 8
    tm_req = _round_up(max(int(tm), align), align)
    n_min = _round_up(max(N, 1), align)
    tm_cap = (max(align, _round_up(pl.cdiv(n_min, 2), align))
              if n_min > align else align)
    tm_eff = min(tm_req, tm_cap)

    # Zero-pad the tiny coordinate dim to a sublane multiple and the row axis
    # to a tile multiple (zero rows/cols keep the math exact).
    x = _pad_to(x, 8, axis=1)
    in_pad = x.shape[1]
    x = _pad_to(x, tm_eff, axis=0)
    n_pad = x.shape[0]
    grid = (n_pad // tm_eff,)

    Ls = max(L, 1)
    const2 = lambda i: (0, 0)
    const3 = lambda i: (0, 0, 0)

    if transposed:
        x_in = x.T                                               # (in_pad, n_pad)
        w1_in = _pad_to(w1, 8, axis=1)                           # (hid, in_pad)
        b1_in = b1.reshape(hid, 1)
        if L > 0:
            wh_in = jnp.stack(wh)                                # (L, hid, hid)
            bh_in = jnp.stack([b.reshape(hid, 1) for b in bh])   # (L, hid, 1)
        else:
            wh_in = jnp.zeros((1, hid, hid), jnp.float32)
            bh_in = jnp.zeros((1, hid, 1), jnp.float32)
        wf_in = wf                                               # (out_f, hid)
        bf_in = bf.reshape(out_f, 1)
        in_specs = [
            pl.BlockSpec((in_pad, tm_eff), lambda i: (0, i)),    # coord tile
            pl.BlockSpec((hid, in_pad), const2),                 # W1 (resident)
            pl.BlockSpec((hid, 1), const2),                      # b1
            pl.BlockSpec((Ls, hid, hid), const3),                # hidden W stack
            pl.BlockSpec((Ls, hid, 1), const3),                  # hidden biases
            pl.BlockSpec((out_f, hid), const2),                  # Wf
            pl.BlockSpec((out_f, 1), const2),                    # bf
        ]
        out_specs = pl.BlockSpec((out_f, tm_eff), lambda i: (0, i))
        out_shape = jax.ShapeDtypeStruct((out_f, n_pad), jnp.float32)
    else:
        x_in = x
        w1_in = _pad_to(w1.T, 8, axis=0)                         # (in_pad, hid)
        b1_in = b1.reshape(1, hid)
        if L > 0:
            wh_in = jnp.stack([w.T for w in wh])                 # (L, hid, hid)
            bh_in = jnp.stack([b.reshape(1, hid) for b in bh])   # (L, 1, hid)
        else:
            wh_in = jnp.zeros((1, hid, hid), jnp.float32)
            bh_in = jnp.zeros((1, 1, hid), jnp.float32)
        wf_in = wf.T                                             # (hid, out_f)
        bf_in = bf.reshape(1, out_f)
        in_specs = [
            pl.BlockSpec((tm_eff, in_pad), lambda i: (i, 0)),
            pl.BlockSpec((in_pad, hid), const2),
            pl.BlockSpec((1, hid), const2),
            pl.BlockSpec((Ls, hid, hid), const3),
            pl.BlockSpec((Ls, 1, hid), const3),
            pl.BlockSpec((hid, out_f), const2),
            pl.BlockSpec((1, out_f), const2),
        ]
        out_specs = pl.BlockSpec((tm_eff, out_f), lambda i: (i, 0))
        out_shape = jax.ShapeDtypeStruct((n_pad, out_f), jnp.float32)

    # VMEM limit: 2x (pipelined) IO tiles + 2x resident weights (default
    # double buffering) + a few activation temporaries + slack, capped by the
    # chip's physical VMEM with headroom for Mosaic internals.
    weight_elems = (in_pad * hid + Ls * hid * hid + hid * out_f
                    + Ls * hid + hid + out_f)
    io_elems = tm_eff * (in_pad + out_f)
    act_elems = 3 * tm_eff * hid
    est = 4 * (2 * io_elems + 2 * weight_elems + act_elems)
    phys_vmem = 64 * 1024 * 1024
    try:
        phys_vmem = int(pltpu.get_tpu_info().vmem_capacity_bytes)
    except Exception:
        pass
    vmem_limit = int(min(max(est + (4 << 20), 16 << 20), (phys_vmem * 3) // 4))

    cost = pl.CostEstimate(
        flops=2 * n_pad * hid * (in_pad + L * hid + out_f),
        transcendentals=n_pad * hid * (L + 1),
        bytes_accessed=4 * (n_pad * (in_pad + out_f) + weight_elems))

    out = pl.pallas_call(
        _make_siren_kernel(L, transposed, precision),
        out_shape=out_shape,
        grid=grid,
        in_specs=in_specs,
        out_specs=out_specs,
        compiler_params=pltpu.CompilerParams(
            dimension_semantics=("parallel",),
            vmem_limit_bytes=vmem_limit),
        cost_estimate=cost,
    )(x_in, w1_in, b1_in, wh_in, bh_in, wf_in, bf_in)

    if transposed:
        out = out.T
    return out[:N].reshape(*lead, out_f)


if __name__ == "__main__":
    # Small SIREN-typical shapes: 2D coords, 2 batches x 250 points,
    # hidden=32, 2 hidden layers, 3 output channels (RGB).
    in_f, hid, n_hidden, out_f = 2, 32, 2, 3
    first_omega_0, hidden_omega_0 = 30.0, 30.0

    coords = jax.random.uniform(jax.random.PRNGKey(0), (2, 250, in_f),
                                jnp.float32, -1.0, 1.0)

    keys = iter(jax.random.split(jax.random.PRNGKey(1), 4 + 2 * n_hidden))

    def unif(shape, bound):
        return jax.random.uniform(next(keys), shape, jnp.float32, -bound, bound)

    hidden_bound = float(np.sqrt(6.0 / hid) / hidden_omega_0)
    params = {
        # first SineLayer: W ~ U(-1/in, 1/in); bias uses nn.Linear default bound
        "w1": unif((hid, in_f), 1.0 / in_f),
        "b1": unif((hid,), 1.0 / np.sqrt(in_f)),
        "wh": [], "bh": [],
        # final Linear: W ~ U(-sqrt(6/hid)/omega, +)
        "wf": unif((out_f, hid), hidden_bound),
        "bf": unif((out_f,), 1.0 / np.sqrt(hid)),
    }
    for _ in range(n_hidden):
        params["wh"].append(unif((hid, hid), hidden_bound))
        params["bh"].append(unif((hid,), 1.0 / np.sqrt(hid)))

    # Fast path: default MXU precision (single bf16 pass per matmul).
    out_fast = jax.block_until_ready(
        siren_forward(coords, params, first_omega_0=first_omega_0,
                      hidden_omega_0=hidden_omega_0))
    # Exact path: HIGHEST precision, used to validate the forward semantics.
    out_exact = jax.block_until_ready(
        siren_forward(coords, params, first_omega_0=first_omega_0,
                      hidden_omega_0=hidden_omega_0,
                      precision=lax.Precision.HIGHEST))

    # float64 numpy reference of the PyTorch forward.
    x = np.asarray(coords, np.float64).reshape(-1, in_f)
    h = np.sin(first_omega_0 * (x @ np.asarray(params["w1"], np.float64).T
                                + np.asarray(params["b1"], np.float64)))
    for wl, bl in zip(params["wh"], params["bh"]):
        h = np.sin(hidden_omega_0 * (h @ np.asarray(wl, np.float64).T
                                     + np.asarray(bl, np.float64)))
    ref = (h @ np.asarray(params["wf"], np.float64).T
           + np.asarray(params["bf"], np.float64)).reshape(2, 250, out_f)

    # Semantics check (exact path) at the tight tolerance.
    np.testing.assert_allclose(np.asarray(out_exact), ref, rtol=2e-3, atol=2e-3)
    # Fast path: omega_0=30 amplifies bf16-MXU rounding before sin; this is
    # the expected accuracy envelope of default-precision TPU matmuls.
    np.testing.assert_allclose(np.asarray(out_fast), ref, rtol=0, atol=5e-2)
    print("KERNEL_OK")
</pallas_src>

<mosaic_0001>
module attributes {stable_mosaic.version = 11 : i64} {
  func.func @kernel(%arg0: i32, %arg1: memref<8x256xf32, #tpu.memory_space<vmem>>, %arg2: memref<32x8xf32, #tpu.memory_space<vmem>>, %arg3: memref<32x1xf32, #tpu.memory_space<vmem>>, %arg4: memref<2x32x32xf32, #tpu.memory_space<vmem>>, %arg5: memref<2x32x1xf32, #tpu.memory_space<vmem>>, %arg6: memref<3x32xf32, #tpu.memory_space<vmem>>, %arg7: memref<3x1xf32, #tpu.memory_space<vmem>>, %arg8: memref<3x256xf32, #tpu.memory_space<vmem>>) attributes {dimension_semantics = [#tpu.dimension_semantics<parallel>], iteration_bounds = array<i64: 2>, scalar_prefetch = 0 : i64, scratch_operands = 0 : i64, tpu.core_type = #tpu.core_type<tc>, window_params = [{transform_indices = @transform_0, window_bounds = array<i64: 8, 256>}, {pipeline_mode = #tpu.pipeline_mode<synchronous>, transform_indices = @transform_1, window_bounds = array<i64: 32, 8>}, {pipeline_mode = #tpu.pipeline_mode<synchronous>, transform_indices = @transform_2, window_bounds = array<i64: 32, 1>}, {pipeline_mode = #tpu.pipeline_mode<synchronous>, transform_indices = @transform_3, window_bounds = array<i64: 2, 32, 32>}, {pipeline_mode = #tpu.pipeline_mode<synchronous>, transform_indices = @transform_4, window_bounds = array<i64: 2, 32, 1>}, {pipeline_mode = #tpu.pipeline_mode<synchronous>, transform_indices = @transform_5, window_bounds = array<i64: 3, 32>}, {pipeline_mode = #tpu.pipeline_mode<synchronous>, transform_indices = @transform_6, window_bounds = array<i64: 3, 1>}, {transform_indices = @transform_7, window_bounds = array<i64: 3, 256>}]} {
    %c0 = arith.constant 0 : index
    %c0_0 = arith.constant 0 : index
    %0 = vector.load %arg2[%c0, %c0_0] : memref<32x8xf32, #tpu.memory_space<vmem>>, vector<32x8xf32>
    %c0_1 = arith.constant 0 : index
    %c0_2 = arith.constant 0 : index
    %1 = vector.load %arg1[%c0_1, %c0_2] : memref<8x256xf32, #tpu.memory_space<vmem>>, vector<8x256xf32>
    %cst = arith.constant dense<0.000000e+00> : vector<32x256xf32>
    %2 = tpu.matmul %0, %1, %cst {dimension_numbers = #tpu.dot_dimension_numbers<[1], [0], [0], [1], [0, 0, 1, 1], [], []>} : vector<32x8xf32>, vector<8x256xf32>, vector<32x256xf32> -> vector<32x256xf32>
    %c0_3 = arith.constant 0 : index
    %c0_4 = arith.constant 0 : index
    %3 = vector.load %arg3[%c0_3, %c0_4] : memref<32x1xf32, #tpu.memory_space<vmem>>, vector<32x1xf32>
    %4 = vector.broadcast %3 : vector<32x1xf32> to vector<32x256xf32>
    %5 = arith.addf %2, %4 : vector<32x256xf32>
    %6 = math.sin %5 : vector<32x256xf32>
    %c0_5 = arith.constant 0 : index
    %c0_6 = arith.constant 0 : index
    %c0_7 = arith.constant 0 : index
    %7 = vector.load %arg4[%c0_5, %c0_6, %c0_7] : memref<2x32x32xf32, #tpu.memory_space<vmem>>, vector<1x32x32xf32>
    %8 = vector.shape_cast %7 : vector<1x32x32xf32> to vector<32x32xf32>
    %cst_8 = arith.constant dense<0.000000e+00> : vector<32x256xf32>
    %9 = tpu.matmul %8, %6, %cst_8 {dimension_numbers = #tpu.dot_dimension_numbers<[1], [0], [0], [1], [0, 0, 1, 1], [], []>} : vector<32x32xf32>, vector<32x256xf32>, vector<32x256xf32> -> vector<32x256xf32>
    %c0_9 = arith.constant 0 : index
    %c0_10 = arith.constant 0 : index
    %c0_11 = arith.constant 0 : index
    %10 = vector.load %arg5[%c0_9, %c0_10, %c0_11] : memref<2x32x1xf32, #tpu.memory_space<vmem>>, vector<1x32x1xf32>
    %11 = vector.shape_cast %10 : vector<1x32x1xf32> to vector<32x1xf32>
    %12 = vector.broadcast %11 : vector<32x1xf32> to vector<32x256xf32>
    %13 = arith.addf %9, %12 : vector<32x256xf32>
    %14 = math.sin %13 : vector<32x256xf32>
    %c1 = arith.constant 1 : index
    %c0_12 = arith.constant 0 : index
    %c0_13 = arith.constant 0 : index
    %15 = vector.load %arg4[%c1, %c0_12, %c0_13] : memref<2x32x32xf32, #tpu.memory_space<vmem>>, vector<1x32x32xf32>
    %16 = vector.shape_cast %15 : vector<1x32x32xf32> to vector<32x32xf32>
    %cst_14 = arith.constant dense<0.000000e+00> : vector<32x256xf32>
    %17 = tpu.matmul %16, %14, %cst_14 {dimension_numbers = #tpu.dot_dimension_numbers<[1], [0], [0], [1], [0, 0, 1, 1], [], []>} : vector<32x32xf32>, vector<32x256xf32>, vector<32x256xf32> -> vector<32x256xf32>
    %c1_15 = arith.constant 1 : index
    %c0_16 = arith.constant 0 : index
    %c0_17 = arith.constant 0 : index
    %18 = vector.load %arg5[%c1_15, %c0_16, %c0_17] : memref<2x32x1xf32, #tpu.memory_space<vmem>>, vector<1x32x1xf32>
    %19 = vector.shape_cast %18 : vector<1x32x1xf32> to vector<32x1xf32>
    %20 = vector.broadcast %19 : vector<32x1xf32> to vector<32x256xf32>
    %21 = arith.addf %17, %20 : vector<32x256xf32>
    %22 = math.sin %21 : vector<32x256xf32>
    %c0_18 = arith.constant 0 : index
    %c0_19 = arith.constant 0 : index
    %23 = vector.load %arg6[%c0_18, %c0_19] : memref<3x32xf32, #tpu.memory_space<vmem>>, vector<3x32xf32>
    %cst_20 = arith.constant dense<0.000000e+00> : vector<3x256xf32>
    %24 = tpu.matmul %23, %22, %cst_20 {dimension_numbers = #tpu.dot_dimension_numbers<[1], [0], [0], [1], [0, 0, 1, 1], [], []>} : vector<3x32xf32>, vector<32x256xf32>, vector<3x256xf32> -> vector<3x256xf32>
    %c0_21 = arith.constant 0 : index
    %c0_22 = arith.constant 0 : index
    %25 = vector.load %arg7[%c0_21, %c0_22] : memref<3x1xf32, #tpu.memory_space<vmem>>, vector<3x1xf32>
    %26 = vector.broadcast %25 : vector<3x1xf32> to vector<3x256xf32>
    %27 = arith.addf %24, %26 : vector<3x256xf32>
    %c0_23 = arith.constant 0 : index
    %c0_24 = arith.constant 0 : index
    %28 = vector.load %arg8[%c0_23, %c0_24] : memref<3x256xf32, #tpu.memory_space<vmem>>, vector<3x256xf32>
    tpu.vector_store %arg8[%c0_23, %c0_24], %27 {strides = array<i32>} : memref<3x256xf32, #tpu.memory_space<vmem>>, vector<3x256xf32>,
    return
  }
  func.func @transform_0(%arg0: i32) -> (i32, i32) {
    %c0_i32 = arith.constant 0 : i32
    %c0_i32_0 = arith.constant 0 : i32
    return %c0_i32, %arg0 : i32, i32
  }
  func.func @transform_1(%arg0: i32) -> (i32, i32) {
    %c0_i32 = arith.constant 0 : i32
    %c0_i32_0 = arith.constant 0 : i32
    %c0_i32_1 = arith.constant 0 : i32
    return %c0_i32, %c0_i32_0 : i32, i32
  }
  func.func @transform_2(%arg0: i32) -> (i32, i32) {
    %c0_i32 = arith.constant 0 : i32
    %c0_i32_0 = arith.constant 0 : i32
    %c0_i32_1 = arith.constant 0 : i32
    return %c0_i32, %c0_i32_0 : i32, i32
  }
  func.func @transform_3(%arg0: i32) -> (i32, i32, i32) {
    %c0_i32 = arith.constant 0 : i32
    %c0_i32_0 = arith.constant 0 : i32
    %c0_i32_1 = arith.constant 0 : i32
    %c0_i32_2 = arith.constant 0 : i32
    return %c0_i32, %c0_i32_0, %c0_i32_1 : i32, i32, i32
  }
  func.func @transform_4(%arg0: i32) -> (i32, i32, i32) {
    %c0_i32 = arith.constant 0 : i32
    %c0_i32_0 = arith.constant 0 : i32
    %c0_i32_1 = arith.constant 0 : i32
    %c0_i32_2 = arith.constant 0 : i32
    return %c0_i32, %c0_i32_0, %c0_i32_1 : i32, i32, i32
  }
  func.func @transform_5(%arg0: i32) -> (i32, i32) {
    %c0_i32 = arith.constant 0 : i32
    %c0_i32_0 = arith.constant 0 : i32
    %c0_i32_1 = arith.constant 0 : i32
    return %c0_i32, %c0_i32_0 : i32, i32
  }
  func.func @transform_6(%arg0: i32) -> (i32, i32) {
    %c0_i32 = arith.constant 0 : i32
    %c0_i32_0 = arith.constant 0 : i32
    %c0_i32_1 = arith.constant 0 : i32
    return %c0_i32, %c0_i32_0 : i32, i32
  }
  func.func @transform_7(%arg0: i32) -> (i32, i32) {
    %c0_i32 = arith.constant 0 : i32
    %c0_i32_0 = arith.constant 0 : i32
    return %c0_i32, %arg0 : i32, i32
  }
}

</mosaic_0001>

<bundles_post_ra>
// kernel: tpu_custom_call.1
= control target key start
LH: loop header
LB: loop body
LE: loop exit
PB: predicated region body
PF: predicated region fallthrough
CT: control target
= control target key end

     0   :  { %12 = vsyncpa [#allocation3], 0  ;;  %s8279_s0 = inlined_call_operand.vmem [shape: f32[8,512], index: 0, kind: input, shape index: {}]   ;;  %s8280_s1 = inlined_call_operand.vmem [shape: f32[32,8], index: 1, kind: input, shape index: {}]   ;;  %s8281_s2 = inlined_call_operand.vmem [shape: f32[32,1], index: 2, kind: input, shape index: {}]   ;;  %s8282_s3 = inlined_call_operand.vmem [shape: f32[2,32,32], index: 3, kind: input, shape index: {}]   ;;  %s8283_s4 = inlined_call_operand.vmem [shape: f32[2,32,1], index: 4, kind: input, shape index: {}]   ;;  %s8284_s5 = inlined_call_operand.vmem [shape: f32[3,32], index: 5, kind: input, shape index: {}]   ;;  %s8285_s6 = inlined_call_operand.vmem [shape: f32[3,1], index: 6, kind: input, shape index: {}]   ;;  %s8286_s7 = inlined_call_operand.hbm [shape: f32[3,512], index: 7, kind: output, shape index: {}]  }
   0x1   :  { %14 = vsyncpa [#allocation3 + $0x1], 0  ;;  %s4714_s24 = smov 0   ;;  %s4716_s25 = smov 0  }
   0x2   :  { %s4718_s26 = smov 0   ;;  %s4720_s27 = smov 0  }
   0x3 LB: > { %s4735_s28 = sadd.s32 4294967295, %s4665_s27   ;;  %s4433_s29 = sadd.s32 4294967294, %s4665_s27   ;;  %s4665_s27 = sphi %s4720_s27, %s8734_s27   ;;  %s4661_s26 = sphi %s4718_s26, %s8733_s26   ;;  %s4657_s25 = sphi %s4716_s25, %s8732_s25   ;;  %s4653_s24 = sphi %s4714_s24, %s8731_s24  }
   0x4   : > { %s4739_s30 = sadd.s32 1, %s4665_s27   ;;  %s179_s8 = sadd.s32 1, %s4661_s26 }
   0x5   : > { %s176_s9 = ssub.s32 %s4665_s27, %s4739_s30  ;;  %p189_p0 = scmp.ne.s32.totalorder %s4661_s26, %s4657_s25 }
   0x6   : > { %p177_p1 = scmp.eq.s32.totalorder %s176_s9, 0  ;;  %p190_p2 = scmp.eq.s32.totalorder %s4735_s28, 1 }
   0x7   : > { %p195_p3 = scmp.ne.s32.totalorder %s4657_s25, %s4653_s24  ;;  %p196_p4 = scmp.eq.s32.totalorder %s4433_s29, 1 }
   0x8   : > { %s4750_s10 = scalar_select %p177_p1, %s4661_s26, %s179_s8  }
   0x9   : > { %p4752_p5 = por %p190_p2, %p189_p0  ;;  %p4756_p6 = por %p196_p4, %p195_p3 }
   0xa   : > { %p4436_p7 = scmp.ge.s32.totalorder %s4665_s27, 1  ;;  %p241_p8 = scmp.lt.s32.totalorder %s4665_s27, 3 }
   0xc   : > { %p242_p9 = pnand %p4436_p7, %p241_p8 }
   0xe   : > { %245 = sbr.rel (%p242_p9) target bundleno = 1558 (0x616), region = 48 }
  0x13   : > { %v289_v0 = vld [vmem:[%s8281_s2 + $0x18] sm:$0xff]  ;;  %v287_v1 = vld [vmem:[%s8281_s2 + $0x8] sm:$0xff]  ;;  %s4438_s17 = sshll.u32 %s4735_s28, 1  ;;  %v8296_v2 = vmov 0   ;;  %v280_v3 = vld [vmem:[%s8280_s1] sm:$0xff]  ;;  %vm310_vm0 = vcmask 64512  }
  0x14   : > { %4600 = vset.pattern.permute.xlu0 %v8296_v2  ;;  %4601 = vset.pattern.permute.xlu1 %v8296_v2  ;;  %p274_p10 = scmp.lt.s32.totalorder %s4438_s17, 3  ;;  %v283_v6 = vld [vmem:[%s8280_s1 + $0x18] sm:$0xff]  ;;  %v288_v7 = vld [vmem:[%s8281_s2 + $0x10] sm:$0xff]  ;;  %v286_v8 = vld [vmem:[%s8281_s2] sm:$0xff]  ;;  %s270_s14 = sand.u32 1, %s4657_s25  }
  0x15   : > { %307 = vperm.xlu0 %4600, %v289_v0   ;;  %297 = vperm.xlu1 %4601, %v287_v1   ;;  %v281_v9 = vld [vmem:[%s8280_s1 + $0x8] sm:$0xff]  ;;  %v1625_v11 = vld [vmem:[%s8283_s4] sm:$0xff]  ;;  %v282_v12 = vld [vmem:[%s8280_s1 + $0x10] sm:$0xff]  ;;  %s4437_s15 = sshll.u32 %s270_s14, 3  ;;  %s4551_s16 = sshll.u32 %s4735_s28, 3 }
  0x16   : > { %s8736_s17 = smov (!%p274_p10, %s4438_s17), 3  ;;  %4602 = vset.pattern.permute.xlu2 %v8296_v2  ;;  %v1626_v10 = vld [vmem:[%s8283_s4 + $0x8] sm:$0xff]  ;;  %v4510_v13 = vld [vmem:[%s8283_s4 + $0x30] sm:$0xff]  ;;  %v4301_v15 = vld [vmem:[%s8285_s6] sm:$0x7]  ;;  %s4369_s19 = scalar_lea.hbm %s8286_s7, %s4551_s16 }
  0x17   : > { %s4439_s18 = sshll.u32 %s8736_s17, 3  ;;  %v4509_v14 = vld [vmem:[%s8283_s4 + $0x28] sm:$0xff]  ;;  %s272_s20 = scalar_lea.vmem [#allocation2], %s4437_s15 }
  0x18   : > { %s277_s21 = scalar_lea.vmem %s8279_s0, %s4439_s18  ;;  %s4373_s22 = sshll.u32 %s4369_s19, 4  ;;  %s4374_s22 = int_to_ptr.hbm [resolvable:$true] %s4373_s22 }
  0x19   : > { %v284_v4 = vld [vmem:[%s277_s21] sm:$0xff]  ;;  %v285_v5 = vld [vmem:[%s277_s21 + $0x8] sm:$0xff]  ;;  %s4371_s21 = sshll.u32 %s272_s20, 4  ;;  %s4358_s28 = scalar_lea.sflag [#allocation3], %s270_s14  ;;  %s4372_s21 = int_to_ptr.vmem [resolvable:$true] %s4371_s21 }
  0x1a   : > { %338 = vmatpush.msra.mxu0 %v284_v4  ;;  %4552 = vmatpush.msra.mxu2 %v284_v4  ;;  %s4617_s23 = sshra.s32 %s4374_s22, 4  ;;  %s4623_s13 = scalar_lea.hbm %s8286_s7, 16  ;;  %s4618_s23 = int_to_ptr.hbm [resolvable:$true] %s4617_s23 }
  0x1b   : > { %367 = vmatpush.msra.mxu1 %v285_v5  ;;  %4553 = vmatpush.msra.mxu3 %v285_v5  ;;  %s4619_s29 = scalar_lea.hbm %s4618_s23, 8  ;;  %p4624_p0 = scmp.lt.s32.totalorder %s4618_s23, %s8286_s7 }
  0x1c   : > { %4440 = vmatmul.msk.f32.vlgmr.msra.gmra.mxu0 %vm310_vm0, %v280_v3  ;;  %4443 = vmatmul.msk.f32.vlgmr.msra.gmra.mxu2 %vm310_vm0, %v283_v6  ;;  %p4620_p11 = scmp.ne.s32.totalorder %s4618_s23, %s4619_s29  ;;  %p4625_p1 = scmp.lt.s32.totalorder %s4623_s13, %s4619_s29 }
  0x1d   : > { %4444 = vmatmul.msk.f32.vlgmr.msra.gmra.mxu1 %vm310_vm0, %v280_v3  ;;  %4447 = vmatmul.msk.f32.vlgmr.msra.gmra.mxu3 %vm310_vm0, %v283_v6 }
  0x1e   : > { %302 = vperm.xlu0 %4600, %v288_v7   ;;  %292 = vperm.xlu1 %4601, %v286_v8   ;;  %p4621_p12 = pnand %p4620_p11, %p4752_p5  ;;  %p4626_p2 = por %p4625_p1, %p4624_p0 }
  0x20   : > { %p4622_p13 = pneg %p4621_p12 }
  0x22   : > { %p4627_p3 = pnand %p4626_p2, %p4622_p13 }
  0x24   : > { %4441 = vmatmul.msk.f32.gmra.mxu0 %vm310_vm0, %v281_v9 }
  0x25   : > { %4445 = vmatmul.msk.f32.gmra.mxu1 %vm310_vm0, %v281_v9 }
  0x26   : > { %1636 = vperm.xlu0 %4600, %v1626_v10   ;;  %1631 = vperm.xlu1 %4601, %v1625_v11   ;;  %v8290_v11 = vmov 2102212464  }
  0x2c   : > { %4442 = vmatmul.msk.f32.gmra.mxu0 %vm310_vm0, %v282_v12 }
  0x2d   : > { %4446 = vmatmul.msk.f32.gmra.mxu1 %vm310_vm0, %v282_v12 }
  0x2e   : > { %2982 = vperm.xlu0 %4600, %v4510_v13   ;;  %2977 = vperm.xlu1 %4601, %v4509_v14   ;;  %v8301_v13 = vmov 920167782  }
  0x36   : > { %4304 = vperm.xlu0 %4600, %v4301_v15  }
  0x87   : > { %v298_v16 = vpop.permute.xlu1 %297  ;;  %v308_v23 = vpop.permute.xlu0 %307 }
  0x90   : > { %v293_v17 = vpop.permute.xlu1 %292  ;;  %v303_v58 = vpop.permute.xlu0 %302 }
  0x99   : > { %v340_v18 = vpop.f32.mrf.mxu0 }
  0x9a   : > { %v4816_v19 = vadd.f32 %v340_v18, %v293_v17  ;;  %v369_v20 = vpop.f32.mrf.mxu1 }
  0x9b   : > { %v4819_v22 = vadd.f32 %v369_v20, %v293_v17 }
  0x9c   : > { %8437 = vst [vmem:[#allocation5_spill] sm:$0xff] %v4816_v19  ;;  %v384_v21 = vand.u32 2139095040, %v4816_v19 }
  0x9d   : > { %8438 = vst [vmem:[#allocation6_spill] sm:$0xff] %v4819_v22  ;;  %v539_v28 = vand.u32 2139095040, %v4819_v22 }
  0x9e   : > { %v385_v24 = vshrl.u32 %v384_v21, 23 }
  0x9f   : > { %v349_v25 = vpop.f32.mrf.mxu2  ;;  %v540_v36 = vshrl.u32 %v539_v28, 23  ;;  %v8307_v28 = vmov 1326507024  }
  0xa0   : > { %v4821_v26 = vadd.f32 %v349_v25, %v308_v23  ;;  %v378_v27 = vpop.f32.mrf.mxu3  ;;  %v4448_v33 = vadd.s32 4294967169, %v385_v24 }
  0xa1   : > { %v4824_v29 = vadd.f32 %v378_v27, %v308_v23  ;;  %v343_v30 = vpop.f32.mrf.mxu0  ;;  %v4451_v44 = vadd.s32 4294967169, %v540_v36 }
  0xa2   : > { %v1314_v31 = vand.u32 2139095040, %v4821_v26  ;;  %v4827_v32 = vadd.f32 %v343_v30, %v298_v16  ;;  %v372_v38 = vpop.f32.mrf.mxu1  ;;  %v391_v41 = vadd.s32 1, %v4448_v33  ;;  %v8287_v9 = vand.u32 2147483647, %v4821_v26 }
  0xa3   : > { %v1469_v34 = vand.u32 2139095040, %v4824_v29  ;;  %v4831_v43 = vadd.f32 %v372_v38, %v298_v16  ;;  %v546_v49 = vadd.s32 1, %v4451_v44 }
  0xa4   : > { %8439 = vst [vmem:[#allocation7_spill] sm:$0xff] %v4827_v32  ;;  %v1315_v35 = vshrl.u32 %v1314_v31, 23  ;;  %v694_v40 = vand.u32 2139095040, %v4827_v32  ;;  %vm392_vm1 = vcmp.gt.s32.totalorder %v391_v41, 0 }
  0xa5   : > { %v1470_v37 = vshrl.u32 %v1469_v34, 23  ;;  %8440 = vst [vmem:[#allocation8_spill] sm:$0xff] %v4831_v43  ;;  %v849_v48 = vand.u32 2139095040, %v4831_v43  ;;  %v393_v51 = vsel %vm392_vm1, %v391_v41, 0  ;;  %vm547_vm4 = vcmp.gt.s32.totalorder %v546_v49, 0 }
  0xa6   : > { %v4466_v39 = vadd.s32 4294967169, %v1315_v35  ;;  %v695_v47 = vshrl.u32 %v694_v40, 23  ;;  %v4836_v57 = vand.u32 31, %v393_v51  ;;  %v548_v0 = vsel %vm547_vm4, %v546_v49, 0 }
  0xa7   : > { %v4469_v42 = vadd.s32 4294967169, %v1470_v37  ;;  %v850_v55 = vshrl.u32 %v849_v48, 23  ;;  %v4851_v7 = vshrl.u32 %v393_v51, 5  ;;  %v4857_v10 = vshrl.u32 %v548_v0, 5 }
  0xa8   : > { %v1321_v45 = vadd.s32 1, %v4466_v39  ;;  %v4454_v52 = vadd.s32 4294967169, %v695_v47  ;;  %8441 = vst [vmem:[#allocation9_spill] sm:$0xff] %v4836_v57  ;;  %v4846_v3 = vsub.s32 32, %v4836_v57  ;;  %v407_v16 = vshll.u32 %v8290_v11, %v4836_v57 }
  0xa9   : > { %v1476_v46 = vadd.s32 1, %v4469_v42  ;;  %v346_v56 = vpop.f32.mrf.mxu0  ;;  %v4457_v1 = vadd.s32 4294967169, %v850_v55  ;;  %8443 = vst [vmem:[#allocation11_spill] sm:$0xff] %v4851_v7  ;;  %v4865_v17 = vand.u32 31, %v548_v0  ;;  %v4884_v34 = vshll.u32 %v8301_v13, %v4836_v57 }
  0xaa   : > { %vm1322_vm2 = vcmp.gt.s32.totalorder %v1321_v45, 0  ;;  %v701_v60 = vadd.s32 1, %v4454_v52  ;;  %v375_v61 = vpop.f32.mrf.mxu1  ;;  %v4843_v63 = vadd.f32 %v346_v56, %v303_v58  ;;  %8442 = vst [vmem:[#allocation10_spill] sm:$0xff] %v4846_v3  ;;  %v408_v21 = vshrl.u32 %v8301_v13, %v4846_v3 }
  0xab   : > { %vm1477_vm3 = vcmp.gt.s32.totalorder %v1476_v46, 0  ;;  %v1323_v50 = vsel %vm1322_vm2, %v1321_v45, 0  ;;  %v4849_v6 = vadd.f32 %v375_v61, %v303_v58  ;;  %8444 = vst [vmem:[#allocation12_spill] sm:$0xff] %v4857_v10  ;;  %v856_v20 = vadd.s32 1, %v4457_v1 }
  0xac   : > { %v4834_v53 = vand.u32 31, %v1323_v50  ;;  %v1478_v54 = vsel %vm1477_vm3, %v1476_v46, 0  ;;  %vm702_vm5 = vcmp.gt.s32.totalorder %v701_v60, 0  ;;  %v1004_v5 = vand.u32 2139095040, %v4843_v63  ;;  %8445 = vst [vmem:[#allocation13_spill] sm:$0xff] %v4865_v17 }
  0xad   : > { %v4838_v59 = vand.u32 31, %v1478_v54  ;;  %v703_v4 = vsel %vm702_vm5, %v701_v60, 0  ;;  %v4871_v23 = vshrl.u32 %v1323_v50, 5  ;;  %v1159_v25 = vand.u32 2139095040, %v4849_v6  ;;  %8447 = vst [vmem:[#allocation15_spill] sm:$0xff] %v4884_v34 }
  0xae   : > { %v4841_v62 = vsub.s32 32, %v4834_v53  ;;  %v1337_v12 = vshll.u32 %v8290_v11, %v4834_v53  ;;  %v1005_v15 = vshrl.u32 %v1004_v5, 23  ;;  %v4867_v18 = vand.u32 31, %v703_v4 }
  0xaf   : > { %v4854_v8 = vsub.s32 32, %v4838_v59  ;;  %v1340_v27 = vshll.u32 %v8301_v13, %v4834_v53  ;;  %v1492_v31 = vshll.u32 %v8290_v11, %v4838_v59  ;;  %v1495_v36 = vshll.u32 %v8301_v13, %v4838_v59 }
  0xb0   : > { %v1338_v14 = vshrl.u32 %v8301_v13, %v4841_v62  ;;  %8446 = vst [vmem:[#allocation14_spill] sm:$0xff] %v4867_v18  ;;  %v4460_v24 = vadd.s32 4294967169, %v1005_v15  ;;  %v1341_v30 = vshrl.u32 %v8307_v28, %v4841_v62  ;;  %v4893_v38 = vsub.s32 32, %v4867_v18 }
  0xb1   : > { %v1493_v33 = vshrl.u32 %v8301_v13, %v4854_v8  ;;  %v1496_v37 = vshrl.u32 %v8307_v28, %v4854_v8  ;;  %vm857_vm6 = vcmp.gt.s32.totalorder %v856_v20, 0  ;;  %v1160_v40 = vshrl.u32 %v1159_v25, 23 }
  0xb2   : > { %v4886_v35 = vor.u32 %v1338_v14, %v1337_v12  ;;  %8448 = vst [vmem:[#allocation16_spill] sm:$0xff] %v4893_v38  ;;  %v1011_v39 = vadd.s32 1, %v4460_v24  ;;  %v4895_v41 = vor.u32 %v408_v21, %v407_v16  ;;  %v4899_v42 = vshrl.u32 %v8307_v28, %v4846_v3 }
  0xb3   : > { %v4902_v44 = vsub.s32 32, %v4865_v17  ;;  %v4906_v45 = vshll.u32 %v8290_v11, %v4865_v17  ;;  %v1342_v46 = vor.u32 %v1341_v30, %v1340_v27  ;;  %vm1346_vm7 = vcmp.lt.s32.totalorder %v4871_v23, 4 }
  0xb4   : > { %8449 = vst [vmem:[#allocation17_spill] sm:$0xff] %v4895_v41  ;;  %v4909_v47 = vshrl.u32 %v1478_v54, 5  ;;  %v4911_v48 = vor.u32 %v1493_v33, %v1492_v31  ;;  %v1352_v49 = vsel %vm1346_vm7, %v4886_v35, 920167782  ;;  %v1497_v50 = vor.u32 %v1496_v37, %v1495_v36 }
  0xb5   : > { %8450 = vst [vmem:[#allocation18_spill] sm:$0xff] %v4899_v42  ;;  %v4916_v51 = vshrl.u32 %v703_v4, 5  ;;  %v858_v52 = vsel %vm857_vm6, %v856_v20, 0  ;;  %v717_v55 = vshll.u32 %v8290_v11, %v4867_v18  ;;  %v718_v56 = vshrl.u32 %v8301_v13, %v4893_v38 }
  0xb6   : > { %8451 = vst [vmem:[#allocation19_spill] sm:$0xff] %v4902_v44  ;;  %vm1012_vm8 = vcmp.gt.s32.totalorder %v1011_v39, 0  ;;  %v4463_v58 = vadd.s32 4294967169, %v1160_v40  ;;  %v8294_v54 = vmov 683565275   ;;  %vm1501_vm9 = vcmp.lt.s32.totalorder %v4909_v47, 4 }
  0xb7   : > { %8452 = vst [vmem:[#allocation20_spill] sm:$0xff] %v4906_v45  ;;  %v1328_v60 = vshll.u32 %v8294_v54, %v4834_v53  ;;  %v8292_v61 = vmov 2475754826   ;;  %v8288_v4 = vmov 2131351028   ;;  %v4933_v14 = vand.u32 31, %v858_v52 }
  0xb8   : > { %v1329_v0 = vshrl.u32 %v8292_v61, %v4841_v62  ;;  %v1331_v1 = vshll.u32 %v8292_v61, %v4834_v53  ;;  %v1332_v5 = vshrl.u32 %v8288_v4, %v4841_v62  ;;  %v1356_v12 = vsel %vm1346_vm7, %v1342_v46, 1326507024 }
  0xb9   : > { %8453 = vst [vmem:[#allocation21_spill] sm:$0xff] %v4933_v14  ;;  %v1318_v15 = vand.u32 8388607, %v8287_v9  ;;  %v4940_v16 = vsel %vm1501_vm9, %v4911_v48, 920167782  ;;  %v4944_v20 = vshll.u32 %v8301_v13, %v4867_v18  ;;  %v4948_v21 = vshrl.u32 %v8307_v28, %v4893_v38 }
  0xba   : > { %v1013_v24 = vsel %vm1012_vm8, %v1011_v39, 0  ;;  %v4953_v25 = vsel %vm1501_vm9, %v1497_v50, 1326507024  ;;  %v4955_v27 = vor.u32 %v718_v56, %v717_v55  ;;  %vm726_vm10 = vcmp.lt.s32.totalorder %v4916_v51, 4 }
  0xbb   : > { %v1166_v30 = vadd.s32 1, %v4463_v58  ;;  %v1330_v31 = vor.u32 %v1329_v0, %v1328_v60  ;;  %v1333_v33 = vor.u32 %v1332_v5, %v1331_v1  ;;  %v1334_v36 = vshll.u32 %v8288_v4, %v4834_v53 }
  0xbc   : > { %8454 = vst [vmem:[#allocation22_spill] sm:$0xff] %v4955_v27  ;;  %v1335_v37 = vshrl.u32 %v8290_v11, %v4841_v62  ;;  %v4962_v40 = vshrl.u32 %v858_v52, 5  ;;  %v4965_v39 = vsub.s32 32, %v4933_v14  ;;  %v4967_v46 = vand.u32 31, %v1013_v24 }
  0xbd   : > { %v1319_v50 = vor.u32 8388608, %v1318_v15  ;;  %v4973_v56 = vshll.u32 %v8290_v11, %v4933_v14  ;;  %v1327_v53 = vshrl.u32 %v8294_v54, %v4841_v62  ;;  %v4980_v52 = vsel %vm726_vm10, %v4955_v27, 920167782 }
  0xbe   : > { %8455 = vst [vmem:[#allocation23_spill] sm:$0xff] %v4962_v40  ;;  %v1336_v58 = vor.u32 %v1335_v37, %v1334_v36  ;;  %v4984_v60 = vshll.u32 %v8301_v13, %v4933_v14  ;;  %vm1343_vm11 = vcmp.lt.s32.totalorder %v4871_v23, 1  ;;  %vm1345_vm12 = vcmp.lt.s32.totalorder %v4871_v23, 3 }
  0xbf   : > { %8456 = vst [vmem:[#allocation24_spill] sm:$0xff] %v4980_v52  ;;  %vm1167_vm13 = vcmp.gt.s32.totalorder %v1166_v30, 0  ;;  %vm1344_vm14 = vcmp.lt.s32.totalorder %v4871_v23, 2  ;;  %v1351_v62 = vsel %vm1343_vm11, %v1330_v31, %v1333_v33  ;;  %v4995_v1 = vshrl.u32 %v8301_v13, %v4965_v39 }
  0xc0   : > { %v1353_v0 = vsel %vm1345_vm12, %v1336_v58, %v1352_v49  ;;  %v4997_v5 = vshrl.u32 %v1013_v24, 5  ;;  %v5000_v15 = vsub.s32 32, %v4967_v46  ;;  %v5006_v37 = vshll.u32 %v8290_v11, %v4967_v46 }
  0xc1   : > { %v1354_v36 = vsel %vm1344_vm14, %v1351_v62, %v1353_v0  ;;  %v1355_v55 = vsel %vm1343_vm11, %v1333_v33, %v1336_v58  ;;  %v1357_v49 = vsel %vm1345_vm12, %v4886_v35, %v1356_v12  ;;  %v5013_v9 = vshll.u32 %v1319_v50, 8 }
  0xc2   : > { %v5015_v24 = vsel %vm1167_vm13, %v1166_v30, 0  ;;  %v1348_v4 = vsel %vm1346_vm7, %v1336_v58, 2102212464  ;;  %v1358_v62 = vsel %vm1344_vm14, %v1355_v55, %v1357_v49  ;;  %v1384_v0 = vand.u32 65535, %v1354_v36 }
  0xc3   : > { %v1360_v11 = vand.u32 65535, %v5013_v9  ;;  %v1361_v61 = vshrl.u32 %v5013_v9, 16  ;;  %v1362_v54 = vand.u32 65535, %v1358_v62  ;;  %v1363_v2 = vshrl.u32 %v1358_v62, 16 }
  0xc4   : > { %v5025_v35 = vshrl.u32 %v8301_v13, %v5000_v15  ;;  %v5029_v12 = vshll.u32 %v8301_v13, %v4967_v46  ;;  %v5033_v30 = vshrl.u32 %v8307_v28, %v5000_v15  ;;  %v1385_v50 = vshrl.u32 %v1354_v36, 16 }
  0xc5   : > { %v5036_v55 = vand.u32 31, %v5015_v24  ;;  %v1347_v58 = vsel %vm1343_vm11, %v1327_v53, %v1330_v31  ;;  %v1365_v49 = vmul.u32 %v1363_v2, %v1360_v11  ;;  %v1366_v62 = vmul.u32 %v1362_v54, %v1361_v61 }
  0xc6   : > { %v1349_v22 = vsel %vm1345_vm12, %v1333_v33, %v1348_v4  ;;  %v1387_v45 = vmul.u32 %v1385_v50, %v1360_v11  ;;  %v1388_v10 = vmul.u32 %v1384_v0, %v1361_v61  ;;  %v8318_v13 = vand.u32 2147483647, %v4824_v29 }
  0xc7   : > { %v1364_v3 = vmul.u32 %v1362_v54, %v1360_v11  ;;  %v1367_v57 = vmul.u32 %v1363_v2, %v1361_v61  ;;  %v1368_v28 = vshll.u32 %v1365_v49, 16  ;;  %v1386_v19 = vmul.u32 %v1384_v0, %v1360_v11 }
  0xc8   : > { %v1369_v36 = vshrl.u32 %v1365_v49, 16  ;;  %v1370_v41 = vshll.u32 %v1366_v62, 16  ;;  %v1389_v17 = vmul.u32 %v1385_v50, %v1361_v61  ;;  %v1390_v44 = vshll.u32 %v1387_v45, 16 }
  0xc9   : > { %v1371_v42 = vshrl.u32 %v1366_v62, 16  ;;  %vm1372_vm15 = vc.u32 %v1364_v3, %v1368_v28  ;;  %v1374_v31 = vadd.s32 %v1368_v28, %v1364_v3  ;;  %v1392_v53 = vshll.u32 %v1388_v10, 16 }
  0xca   : > { %v8457_v34 = vmov 0   ;;  %vm1394_vm0 = vc.u32 %v1386_v19, %v1390_v44  ;;  %v1396_v4 = vadd.s32 %v1390_v44, %v1386_v19  ;;  %v1473_v33 = vand.u32 8388607, %v8318_v13 }
  0xcb   : > { %v1373_v7 = vsel %vm1372_vm15, 1, %v8457_v34  ;;  %vm1376_vm1 = vc.u32 %v1374_v31, %v1370_v41  ;;  %v1391_v2 = vshrl.u32 %v1387_v45, 16  ;;  %v1395_v11 = vsel %vm1394_vm0, 1, %v8457_v34 }
  0xcc   : > { %v1375_v14 = vadd.s32 %v1373_v7, %v1367_v57  ;;  %v1377_v54 = vsel %vm1376_vm1, 1, %v8457_v34  ;;  %v1393_v61 = vshrl.u32 %v1388_v10, 16  ;;  %v1397_v0 = vadd.s32 %v1395_v11, %v1389_v17 }
  0xcd   : > { %vm1398_vm2 = vc.u32 %v1396_v4, %v1392_v53  ;;  %v1474_v28 = vor.u32 8388608, %v1473_v33  ;;  %v8458_v49 = vmov 683565275   ;;  %v8459_v62 = vmov 2475754826  }
  0xce   : > { %v1379_v50 = vadd.s32 %v1377_v54, %v1375_v14  ;;  %v1399_v3 = vsel %vm1398_vm2, 1, %v8457_v34  ;;  %v1483_v19 = vshll.u32 %v8458_v49, %v4838_v59  ;;  %v1484_v57 = vshrl.u32 %v8459_v62, %v4854_v8 }
  0xcf   : > { %v1401_v44 = vadd.s32 %v1399_v3, %v1397_v0  ;;  %v1486_v7 = vshll.u32 %v8459_v62, %v4838_v59  ;;  %v8460_v41 = vmov 2131351028   ;;  %v5057_v17 = vadd.s32 %v1396_v4, %v1392_v53 }
  0xd0   : > { %v1487_v45 = vshrl.u32 %v8460_v41, %v4854_v8  ;;  %v1380_v10 = vadd.s32 %v1379_v50, %v1369_v36  ;;  %v1489_v14 = vshll.u32 %v8460_v41, %v4838_v59  ;;  %v8461_v31 = vmov 2102212464  }
  0xd1   : > { %v1490_v33 = vshrl.u32 %v8461_v31, %v4854_v8  ;;  %v1402_v11 = vadd.s32 %v1401_v44, %v1391_v2  ;;  %v5063_v54 = vor.u32 %v1484_v57, %v1483_v19  ;;  %vm1498_vm3 = vcmp.lt.s32.totalorder %v4909_v47, 1 }
  0xd2   : > { %v5065_v0 = vor.u32 %v1487_v45, %v1486_v7  ;;  %v5068_v3 = vadd.s32 %v1380_v10, %v1371_v42  ;;  %vm1500_vm4 = vcmp.lt.s32.totalorder %v4909_v47, 3  ;;  %v5071_v36 = vshll.u32 %v1474_v28, 8 }
  0xd3   : > { %v1491_v13 = vor.u32 %v1490_v33, %v1489_v14  ;;  %v1350_v59 = vsel %vm1344_vm14, %v1347_v58, %v1349_v22  ;;  %v1403_v53 = vadd.s32 %v1402_v11, %v1393_v61  ;;  %v1512_v42 = vsel %vm1500_vm4, %v4911_v48, %v4953_v25 }
  0xd4   : > { %v1506_v4 = vsel %vm1498_vm3, %v5063_v54, %v5065_v0  ;;  %v5084_v2 = vshrl.u32 %v5015_v24, 5  ;;  %vm1406_vm5 = vc.u32 %v5068_v3, %v5057_v17  ;;  %vm1499_vm6 = vcmp.lt.s32.totalorder %v4909_v47, 2 }
  0xd5   : > { %v1508_v22 = vsel %vm1500_vm4, %v1491_v13, %v4940_v16  ;;  %v5093_v23 = vsub.s32 32, %v5036_v55  ;;  %v1407_v58 = vadd.s32 1, %v1403_v53  ;;  %v1510_v48 = vsel %vm1498_vm3, %v5065_v0, %v1491_v13 }
  0xd6   : > { %v1509_v61 = vsel %vm1499_vm6, %v1506_v4, %v1508_v22  ;;  %v1404_v25 = vmul.u32 %v5013_v9, %v1350_v59  ;;  %v1513_v24 = vsel %vm1499_vm6, %v1510_v48, %v1512_v42  ;;  %v1515_v50 = vand.u32 65535, %v5071_v36 }
  0xd7   : > { %v1516_v16 = vshrl.u32 %v5071_v36, 16  ;;  %v1408_v28 = vsel %vm1406_vm5, %v1407_v58, %v1403_v53  ;;  %v1517_v19 = vand.u32 65535, %v1513_v24  ;;  %v1518_v44 = vshrl.u32 %v1513_v24, 16 }
  0xd8   : > { %v1539_v57 = vand.u32 65535, %v1509_v61  ;;  %v5107_v7 = vor.u32 %v5025_v35, %v5006_v37  ;;  %v1032_v45 = vor.u32 %v5033_v30, %v5029_v12  ;;  %v1409_v10 = vadd.s32 %v1408_v28, %v1404_v25 }
  0xd9   : > { %v1540_v9 = vshrl.u32 %v1509_v61, 16  ;;  %v1182_v14 = vshll.u32 %v8461_v31, %v5036_v55  ;;  %v8462_v33 = vmov 920167782   ;;  %v1520_v59 = vmul.u32 %v1518_v44, %v1515_v50 }
  0xda   : > { %v5115_v11 = vshll.u32 %v8462_v33, %v5036_v55  ;;  %v1521_v53 = vmul.u32 %v1517_v19, %v1516_v16  ;;  %v1183_v4 = vshrl.u32 %v8462_v33, %v5093_v23  ;;  %v1410_v42 = vadd.s32 536870912, %v1409_v10 }
  0xdb   : > { %v1542_v37 = vmul.u32 %v1540_v9, %v1515_v50  ;;  %v1543_v35 = vmul.u32 %v1539_v57, %v1516_v16  ;;  %vm1036_vm7 = vcmp.lt.s32.totalorder %v4997_v5, 4  ;;  %v1482_v12 = vshrl.u32 %v8458_v49, %v4854_v8 }
  0xdc   : > { %v1503_v30 = vsel %vm1501_vm9, %v1491_v13, 2102212464  ;;  %v1519_v22 = vmul.u32 %v1517_v19, %v1515_v50  ;;  %v1523_v58 = vshll.u32 %v1520_v59, 16  ;;  %v1411_v61 = vshrl.u32 %v1410_v42, 30 }
  0xdd   : > { %v1522_v48 = vmul.u32 %v1518_v44, %v1516_v16  ;;  %v1541_v25 = vmul.u32 %v1539_v57, %v1515_v50  ;;  %v1545_v24 = vshll.u32 %v1542_v37, 16  ;;  %v1525_v28 = vshll.u32 %v1521_v53, 16 }
  0xde   : > { %vm1527_vm8 = vc.u32 %v1519_v22, %v1523_v58  ;;  %v1529_v33 = vadd.s32 %v1523_v58, %v1519_v22  ;;  %v1544_v43 = vmul.u32 %v1540_v9, %v1516_v16  ;;  %vm1313_vm11 = vcmp.lt.s32.totalorder %v4821_v26, 0 }
  0xdf   : > { %v1412_v52 = vshll.u32 %v1411_v61, 30  ;;  %v1528_v27 = vsel %vm1527_vm8, 1, %v8457_v34  ;;  %v1547_v38 = vshll.u32 %v1543_v35, 16  ;;  %vm1549_vm12 = vc.u32 %v1541_v25, %v1545_v24 }
  0xe0   : > { %v1530_v8 = vadd.s32 %v1528_v27, %v1522_v48  ;;  %vm1531_vm13 = vc.u32 %v1529_v33, %v1525_v28  ;;  %v1550_v13 = vsel %vm1549_vm12, 1, %v8457_v34  ;;  %v1551_v19 = vadd.s32 %v1545_v24, %v1541_v25 }
  0xe1   : > { %v1413_v42 = vsub.s32 %v1409_v10, %v1412_v52  ;;  %v1502_v50 = vsel %vm1498_vm3, %v1482_v12, %v5063_v54  ;;  %v1532_v44 = vsel %vm1531_vm13, 1, %v8457_v34  ;;  %v1552_v16 = vadd.s32 %v1550_v13, %v1544_v43 }
  0xe2   : > { %v1504_v57 = vsel %vm1500_vm4, %v5065_v0, %v1503_v30  ;;  %v1524_v9 = vshrl.u32 %v1520_v59, 16  ;;  %v1534_v22 = vadd.s32 %v1532_v44, %v1530_v8  ;;  %vm1553_vm9 = vc.u32 %v1551_v19, %v1547_v38 }
  0xe3   : > { %v8463_v27 = vand.u32 2147483647, %v4821_v26  ;;  %vm1414_vm15 = vcmp.lt.s32.totalorder %v1413_v42, 0  ;;  %v1415_v52 = vsub.s32 0, %v1413_v42  ;;  %v1526_v10 = vshrl.u32 %v1521_v53, 16 }
  0xe4   : > { %v1554_v54 = vsel %vm1553_vm9, 1, %v8457_v34  ;;  %v1435_v12 = vsub.s32 4, %v1411_v61  ;;  %v1535_v43 = vadd.s32 %v1534_v22, %v1524_v9  ;;  %v1546_v58 = vshrl.u32 %v1542_v37, 16 }
  0xe5   : > { %vm5136_vm14 = vcmp.le.f32.partialorder %v8463_v27, 0.7853982  ;;  %v1556_v48 = vadd.s32 %v1554_v54, %v1552_v16  ;;  %v1042_v0 = vsel %vm1036_vm7, %v5107_v7, 920167782  ;;  %v1046_v59 = vsel %vm1036_vm7, %v1032_v45, 1326507024 }
  0xe6   : > { %v1416_v30 = vsel %vm1414_vm15, %v1415_v52, %v1413_v42  ;;  %v8325_v25 = vand.u32 2147483647, %v4843_v63  ;;  %v1536_v28 = vadd.s32 %v1535_v43, %v1526_v10  ;;  %v1548_v8 = vshrl.u32 %v1543_v35, 16 }
  0xe7   : > { %v1417_v24 = vclz %v1416_v30  ;;  %v1557_v53 = vadd.s32 %v1556_v48, %v1546_v58  ;;  %v5147_v13 = vor.u32 %v1183_v4, %v1182_v14  ;;  %v8466_v44 = vmov 1326507024  }
  0xe8   : > { %v5151_v37 = vshrl.u32 %v8466_v44, %v5093_v23  ;;  %v1505_v16 = vsel %vm1499_vm6, %v1502_v50, %v1504_v57  ;;  %v1555_v9 = vadd.s32 %v1551_v19, %v1547_v38  ;;  %v1405_v45 = vadd.s32 %v5057_v17, %v5068_v3 }
  0xe9   : > { %v4467_v22 = vadd.s32 4294967294, %v1417_v24  ;;  %v1436_v27 = vsel %vm1313_vm11, %v1435_v12, %v1411_v61  ;;  %v1558_v52 = vadd.s32 %v1557_v53, %v1548_v8  ;;  %v1008_v14 = vand.u32 8388607, %v8325_v25 }
  0xea   : > { %vm1561_vm0 = vc.u32 %v1536_v28, %v1555_v9  ;;  %v1021_v4 = vshll.u32 %v8459_v62, %v4967_v46  ;;  %v1022_v47 = vshrl.u32 %v8460_v41, %v5000_v15  ;;  %v1559_v38 = vmul.u32 %v5071_v36, %v1505_v16 }
  0xeb   : > { %vm4468_vm1 = vcmp.lt.s32.totalorder %v4467_v22, 0  ;;  %v1562_v35 = vadd.s32 1, %v1558_v52  ;;  %v1025_v17 = vshrl.u32 %v8461_v31, %v5000_v15  ;;  %v1019_v61 = vshrl.u32 %v8459_v62, %v5000_v15 }
  0xec   : > { %v1420_v3 = vsel %vm4468_vm1, 0, %v4467_v22  ;;  %v5170_v19 = vor.u32 %v1022_v47, %v1021_v4  ;;  %v1024_v50 = vshll.u32 %v8460_v41, %v4967_v46  ;;  %v1438_v54 = vsel %vm5136_vm14, 0, %v1436_v27 }
  0xed   : > { %v1421_v57 = vsub.s32 32, %v1420_v3  ;;  %v1425_v10 = vsub.s32 4294967266, %v1420_v3  ;;  %v1563_v12 = vsel %vm1561_vm0, %v1562_v35, %v1558_v52  ;;  %v1009_v43 = vor.u32 8388608, %v1008_v14 }
  0xee   : > { %v1564_v36 = vadd.s32 %v1563_v12, %v1559_v38  ;;  %v1018_v58 = vshll.u32 %v8458_v49, %v4967_v46  ;;  %v1026_v48 = vor.u32 %v1025_v17, %v1024_v50  ;;  %v1422_v30 = vshll.u32 %v1413_v42, %v1420_v3 }
  0xef   : > { %v1423_v24 = vshrl.u32 %v1405_v45, %v1421_v57  ;;  %v1426_v8 = vadd.s32 127, %v1425_v10  ;;  %vm1033_vm2 = vcmp.lt.s32.totalorder %v4997_v5, 1  ;;  %v1455_v4 = vadd.s32 3, %v1438_v54 }
  0xf0   : > { %v1565_v16 = vadd.s32 536870912, %v1564_v36  ;;  %v1020_v22 = vor.u32 %v1019_v61, %v1018_v58  ;;  %v1045_v27 = vsel %vm1033_vm2, %v5170_v19, %v1026_v48  ;;  %vm1035_vm3 = vcmp.lt.s32.totalorder %v4997_v5, 3 }
  0xf1   : > { %v1424_v52 = vor.u32 %v1423_v24, %v1422_v30  ;;  %v1427_v14 = vshll.u32 %v1426_v8, 23  ;;  %vm1034_vm4 = vcmp.lt.s32.totalorder %v4997_v5, 2  ;;  %v1047_v42 = vsel %vm1035_vm3, %v5107_v7, %v1046_v59 }
  0xf2   : > { %v1566_v46 = vshrl.u32 %v1565_v16, 30  ;;  %v5189_v45 = vshll.u32 %v1009_v43, 8  ;;  %vm1468_vm5 = vcmp.lt.s32.totalorder %v4824_v29, 0  ;;  %v1017_v38 = vshrl.u32 %v8458_v49, %v5000_v15 }
  0xf3   : > { %v1428_v47 = vor.u32 4788187, %v1427_v14  ;;  %v1048_v35 = vsel %vm1034_vm4, %v1045_v27, %v1047_v42  ;;  %v1431_v17 = vcvt.s32.f32 %v1424_v52  ;;  %v1041_v61 = vsel %vm1033_vm2, %v1020_v22, %v5170_v19 }
  0xf4   : > { %v1567_v3 = vshll.u32 %v1566_v46, 30  ;;  %v1043_v7 = vsel %vm1035_vm3, %v1026_v48, %v1042_v0  ;;  %v1050_v50 = vand.u32 65535, %v5189_v45  ;;  %v1052_v57 = vand.u32 65535, %v1048_v35 }
  0xf5   : > { %v1429_v59 = vand.u32 2147483647, %v1428_v47  ;;  %v1053_v10 = vshrl.u32 %v1048_v35, 16  ;;  %v5202_v54 = vand.u32 3, %v1455_v4  ;;  %v1560_v15 = vadd.s32 %v1555_v9, %v1536_v28 }
  0xf6   : > { %v5204_v12 = vsub.s32 %v1564_v36, %v1567_v3  ;;  %v1051_v43 = vshrl.u32 %v5189_v45, 16  ;;  %v1037_v30 = vsel %vm1033_vm2, %v1017_v38, %v1020_v22  ;;  %v1044_v24 = vsel %vm1034_vm4, %v1041_v61, %v1043_v7 }
  0xf7   : > { %v1432_v58 = vmul.f32 %v1431_v17, %v1429_v59  ;;  %v1055_v0 = vmul.u32 %v1053_v10, %v1050_v50  ;;  %v1590_v16 = vsub.s32 4, %v1566_v46  ;;  %v1038_v9 = vsel %vm1036_vm7, %v1026_v48, 2102212464 }
  0xf8   : > { %vm1569_vm6 = vcmp.lt.s32.totalorder %v5204_v12, 0  ;;  %v1570_v8 = vsub.s32 0, %v5204_v12  ;;  %v5213_v27 = vmul.u32 %v1052_v57, %v1051_v43  ;;  %v1054_v36 = vmul.u32 %v1052_v57, %v1050_v50 }
  0xf9   : > { %v1433_v28 = vxor.u32 2147483648, %v1432_v58  ;;  %v1058_v52 = vshll.u32 %v1055_v0, 16  ;;  %v1074_v4 = vand.u32 65535, %v1044_v24  ;;  %v1075_v42 = vshrl.u32 %v1044_v24, 16 }
  0xfa   : > { %v1571_v14 = vsel %vm1569_vm6, %v1570_v8, %v5204_v12  ;;  %v1060_v22 = vshll.u32 %v5213_v27, 16  ;;  %v5228_v48 = vsel %vm1468_vm5, %v1590_v16, %v1566_v46  ;;  %v1039_v3 = vsel %vm1035_vm3, %v5170_v19, %v1038_v9 }
  0xfb   : > { %v1434_v47 = vsel %vm1313_vm11, %v1433_v28, %v1432_v58  ;;  %v1572_v38 = vclz %v1571_v14  ;;  %vm1062_vm8 = vc.u32 %v1054_v36, %v1058_v52  ;;  %v1064_v35 = vadd.s32 %v1058_v52, %v1054_v36 }
  0xfc   : > { %v5224_v17 = vsel %vm5136_vm14, %v4821_v26, %v1434_v47  ;;  %v1057_v61 = vmul.u32 %v1053_v10, %v1051_v43  ;;  %v1063_v57 = vsel %vm1062_vm8, 1, %v8457_v34  ;;  %v8467_v33 = vand.u32 2147483647, %v4824_v29 }
  0xfd   : > { %v1439_v7 = vmul.f32 %v5224_v17, %v5224_v17  ;;  %v4470_v59 = vadd.s32 4294967294, %v1572_v38  ;;  %vm1066_vm7 = vc.u32 %v1064_v35, %v1060_v22  ;;  %v1077_v8 = vmul.u32 %v1075_v42, %v1050_v50 }
  0xfe   : > { %vm5238_vm11 = vcmp.le.f32.partialorder %v8467_v33, 0.7853982  ;;  %v1065_v46 = vadd.s32 %v1063_v57, %v1057_v61  ;;  %v1067_v24 = vsel %vm1066_vm7, 1, %v8457_v34  ;;  %v1078_v16 = vmul.u32 %v1074_v4, %v1051_v43 }
  0xff   : > { %v1440_v19 = vmul.f32 -0.001358992, %v1439_v7  ;;  %v1447_v10 = vmul.f32 -0.00019511016, %v1439_v7  ;;  %vm4471_vm12 = vcmp.lt.s32.totalorder %v4470_v59, 0  ;;  %v1076_v28 = vmul.u32 %v1074_v4, %v1050_v50 }
 0x100   : > { %v1575_v9 = vsel %vm4471_vm12, 0, %v4470_v59  ;;  %v1059_v36 = vshrl.u32 %v1055_v0, 16  ;;  %v1069_v52 = vadd.s32 %v1067_v24, %v1065_v46  ;;  %v1080_v14 = vshll.u32 %v1077_v8, 16 }
 0x101   : > { %v1441_v22 = vadd.f32 0.041655596, %v1440_v19  ;;  %v1448_v47 = vadd.f32 0.008332121, %v1447_v10  ;;  %v1576_v38 = vsub.s32 32, %v1575_v9  ;;  %v1079_v35 = vmul.u32 %v1075_v42, %v1051_v43 }
 0x102   : > { %v1577_v33 = vshll.u32 %v5204_v12, %v1575_v9  ;;  %v1580_v25 = vsub.s32 4294967266, %v1575_v9  ;;  %v1082_v61 = vshll.u32 %v1078_v16, 16  ;;  %vm1084_vm13 = vc.u32 %v1076_v28, %v1080_v14 }
 0x103   : > { %v1442_v57 = vmul.f32 %v1441_v22, %v1439_v7  ;;  %v1449_v53 = vmul.f32 %v1448_v47, %v1439_v7  ;;  %v1578_v18 = vshrl.u32 %v1560_v15, %v1576_v38  ;;  %v1085_v32 = vsel %vm1084_vm13, 1, %v8457_v34 }
 0x104   : > { %v1581_v40 = vadd.s32 127, %v1580_v25  ;;  %v1070_v50 = vadd.s32 %v1069_v52, %v1059_v36  ;;  %v1086_v4 = vadd.s32 %v1080_v14, %v1076_v28  ;;  %v1087_v0 = vadd.s32 %v1085_v32, %v1079_v35 }
 0x105   : > { %v1443_v59 = vadd.f32 -0.4999988, %v1442_v57  ;;  %v1450_v46 = vadd.f32 -0.16666654, %v1449_v53  ;;  %vm1461_vm9 = vcmp.eq.s32.totalorder %v5202_v54, 2  ;;  %v1040_v43 = vsel %vm1034_vm4, %v1037_v30, %v1039_v3 }
 0x106   : > { %vm1458_vm14 = vcmp.eq.s32.totalorder %v5202_v54, 0  ;;  %v1579_v12 = vor.u32 %v1578_v18, %v1577_v33  ;;  %v1582_v42 = vshll.u32 %v1581_v40, 23  ;;  %v1061_v24 = vshrl.u32 %v5213_v27, 16 }
 0x107   : > { %vm1088_vm15 = vc.u32 %v1086_v4, %v1082_v61  ;;  %v1444_v15 = vmul.f32 %v1443_v59, %v1439_v7  ;;  %v1451_v19 = vmul.f32 %v1450_v46, %v1439_v7  ;;  %vm1457_vm0 = vcmp.lt.s32.totalorder %v5202_v54, 2 }
 0x108   : > { %v1593_v32 = vsel %vm5238_vm11, 0, %v5228_v48  ;;  %v1089_v25 = vsel %vm1088_vm15, 1, %v8457_v34  ;;  %vm1454_vm1 = vweird.f32 %v4821_v26  ;;  %v1583_v5 = vor.u32 4788187, %v1582_v42 }
 0x109   : > { %v5256_v53 = vadd.s32 %v1070_v50, %v1061_v24  ;;  %v1081_v18 = vshrl.u32 %v1077_v8, 16  ;;  %v1091_v40 = vadd.s32 %v1089_v25, %v1087_v0  ;;  %vm1191_vm2 = vcmp.lt.s32.totalorder %v5084_v2, 4 }
 0x10a   : > { %v1445_v30 = vadd.f32 1.0, %v1444_v15  ;;  %v1452_v27 = vadd.f32 1.0, %v1451_v19  ;;  %v1083_v3 = vshrl.u32 %v1078_v16, 16  ;;  %v1156_v7 = vand.u32 2147483647, %v4849_v6 }
 0x10b   : > { %v1584_v10 = vand.u32 2147483647, %v1583_v5  ;;  %v1586_v28 = vcvt.s32.f32 %v1579_v12  ;;  %v5260_v9 = vadd.s32 %v1086_v4, %v1082_v61  ;;  %v1092_v48 = vadd.s32 %v1091_v40, %v1081_v18 }
 0x10c   : > { %v1453_v36 = vmul.f32 %v1452_v27, %v5224_v17  ;;  %v1462_v52 = vxor.u32 2147483648, %v1445_v30  ;;  %v1094_v14 = vmul.u32 %v5189_v45, %v1040_v43  ;;  %v1163_v8 = vand.u32 8388607, %v1156_v7 }
 0x10d   : > { %v1587_v22 = vmul.f32 %v1586_v28, %v1584_v10  ;;  %v1093_v47 = vadd.s32 %v1092_v48, %v1083_v3  ;;  %vm1096_vm3 = vc.u32 %v5256_v53, %v5260_v9  ;;  %v1174_v16 = vshrl.u32 %v8459_v62, %v5093_v23 }
 0x10e   : > { %v1459_v38 = vxor.u32 2147483648, %v1453_v36  ;;  %v1173_v35 = vshll.u32 %v8458_v49, %v5036_v55  ;;  %v1176_v17 = vshll.u32 %v8459_v62, %v5036_v55  ;;  %v1177_v45 = vshrl.u32 %v8460_v41, %v5093_v23 }
 0x10f   : > { %v1463_v33 = vsel %vm1461_vm9, %v1462_v52, %v1453_v36  ;;  %v1588_v61 = vxor.u32 2147483648, %v1587_v22  ;;  %v1097_v57 = vadd.s32 1, %v1093_v47  ;;  %v1164_v50 = vor.u32 8388608, %v1163_v8 }
 0x110   : > { %v1460_v4 = vsel %vm1458_vm14, %v1445_v30, %v1459_v38  ;;  %v5280_v0 = vor.u32 %v1177_v45, %v1176_v17  ;;  %v1179_v59 = vshll.u32 %v8460_v41, %v5036_v55  ;;  %v1180_v46 = vshrl.u32 %v8461_v31, %v5093_v23 }
 0x111   : > { %v1464_v43 = vsel %vm1457_vm0, %v1460_v4, %v1463_v33  ;;  %v1589_v12 = vsel %vm1468_vm5, %v1588_v61, %v1587_v22  ;;  %v1098_v42 = vsel %vm1096_vm3, %v1097_v57, %v1093_v47  ;;  %v5293_v24 = vor.u32 %v1174_v16, %v1173_v35 }
 0x112   : > { %v1465_v15 = vsel %vm1454_vm1, nan, %v1464_v43  ;;  %v5300_v55 = vsel %vm5238_vm11, %v4824_v29, %v1589_v12  ;;  %v1099_v19 = vadd.s32 %v1098_v42, %v1094_v14  ;;  %v1181_v54 = vor.u32 %v1180_v46, %v1179_v59 }
 0x113   : > { %v5304_v25 = vshrl.u32 %v8466_v44, %v4965_v39  ;;  %v8470_v5 = vor.u32 %v5151_v37, %v5115_v11  ;;  %1674 = vmatpush.msrb.mxu2 %v1465_v15  ;;  %v1594_v26 = vmul.f32 %v5300_v55, %v5300_v55  ;;  %vm1188_vm4 = vcmp.lt.s32.totalorder %v5084_v2, 1 }
 0x114   : > { %v1197_v58 = vsel %vm1191_vm2, %v5147_v13, 920167782  ;;  %v1610_v40 = vadd.s32 3, %v1593_v32  ;;  %v1100_v30 = vadd.s32 536870912, %v1099_v19  ;;  %v1200_v27 = vsel %vm1188_vm4, %v5280_v0, %v1181_v54 }
 0x115   : > { %v1201_v18 = vsel %vm1191_vm2, %v8470_v5, 1326507024  ;;  %v1595_v11 = vmul.f32 -0.001358992, %v1594_v26  ;;  %v1602_v37 = vmul.f32 -0.00019511016, %v1594_v26  ;;  %v1196_v10 = vsel %vm1188_vm4, %v5293_v24, %v5280_v0 }
 0x116   : > { %vm1189_vm5 = vcmp.lt.s32.totalorder %v5084_v2, 2  ;;  %vm1190_vm6 = vcmp.lt.s32.totalorder %v5084_v2, 3  ;;  %v1101_v3 = vshrl.u32 %v1100_v30, 30  ;;  %v5329_v28 = vshll.u32 %v1164_v50, 8 }
 0x117   : > { %v1202_v32 = vsel %vm1190_vm6, %v5147_v13, %v1201_v18  ;;  %v1596_v48 = vadd.f32 0.041655596, %v1595_v11  ;;  %v1603_v36 = vadd.f32 0.008332121, %v1602_v37  ;;  %v1198_v52 = vsel %vm1190_vm6, %v1181_v54, %v1197_v58 }
 0x118   : > { %v1203_v14 = vsel %vm1189_vm5, %v1200_v27, %v1202_v32  ;;  %v8471_v8 = vor.u32 %v4948_v21, %v4944_v20  ;;  %v5344_v13 = vor.u32 %v4995_v1, %v4973_v56  ;;  %v1611_v47 = vand.u32 3, %v1610_v40 }
 0x119   : > { %v1102_v16 = vshll.u32 %v1101_v3, 30  ;;  %v877_v38 = vor.u32 %v5304_v25, %v4984_v60  ;;  %v1597_v35 = vmul.f32 %v1596_v48, %v1594_v26  ;;  %v1604_v17 = vmul.f32 %v1603_v36, %v1594_v26 }
 0x11a   : > { %v5340_v22 = vsel %vm726_vm10, %v8471_v8, 1326507024  ;;  %v1208_v45 = vshrl.u32 %v1203_v14, 16  ;;  %v5352_v20 = vsel %vm1189_vm5, %v1196_v10, %v1198_v52  ;;  %v1205_v21 = vand.u32 65535, %v5329_v28 }
 0x11b   : > { %v5348_v33 = vsub.s32 %v1099_v19, %v1102_v16  ;;  %v1207_v61 = vand.u32 65535, %v1203_v14  ;;  %v1598_v57 = vadd.f32 -0.4999988, %v1597_v35  ;;  %v1605_v56 = vadd.f32 -0.16666654, %v1604_v17 }
 0x11c   : > { %vm1003_vm8 = vcmp.lt.s32.totalorder %v4843_v63, 0  ;;  %v1125_v1 = vsub.s32 4, %v1101_v3  ;;  %vm1613_vm7 = vcmp.eq.s32.totalorder %v1611_v47, 0  ;;  %vm1616_vm11 = vcmp.eq.s32.totalorder %v1611_v47, 2 }
 0x11d   : > { %vm1104_vm12 = vcmp.lt.s32.totalorder %v5348_v33, 0  ;;  %v1105_v50 = vsub.s32 0, %v5348_v33  ;;  %v1206_v4 = vshrl.u32 %v5329_v28, 16  ;;  %v1210_v59 = vmul.u32 %v1208_v45, %v1205_v21 }
 0x11e   : > { %v1599_v46 = vmul.f32 %v1598_v57, %v1594_v26  ;;  %v1606_v43 = vmul.f32 %v1605_v56, %v1594_v26  ;;  %vm1612_vm13 = vcmp.lt.s32.totalorder %v1611_v47, 2  ;;  %v1095_v12 = vadd.s32 %v5260_v9, %v5256_v53 }
 0x11f   : > { %v1229_v42 = vand.u32 65535, %v5352_v20  ;;  %vm1609_vm9 = vweird.f32 %v4824_v29  ;;  %v1106_v15 = vsel %vm1104_vm12, %v1105_v50, %v5348_v33  ;;  %v5364_v19 = vmul.u32 %v1207_v61, %v1206_v4 }
 0x120   : > { %v1213_v5 = vshll.u32 %v1210_v59, 16  ;;  %v1230_v18 = vshrl.u32 %v5352_v20, 16  ;;  %v1600_v58 = vadd.f32 1.0, %v1599_v46  ;;  %v1607_v40 = vadd.f32 1.0, %v1606_v43 }
 0x121   : > { %v1107_v30 = vclz %v1106_v15  ;;  %v1209_v27 = vmul.u32 %v1207_v61, %v1205_v21  ;;  %v5369_v26 = vsel %vm1003_vm8, %v1125_v1, %v1101_v3  ;;  %v1172_v53 = vshrl.u32 %v8458_v49, %v5093_v23 }
 0x122   : > { %v1193_v9 = vsel %vm1191_vm2, %v1181_v54, 2102212464  ;;  %v1212_v11 = vmul.u32 %v1208_v45, %v1206_v4  ;;  %v1608_v37 = vmul.f32 %v1607_v40, %v5300_v55  ;;  %v1617_v10 = vxor.u32 2147483648, %v1600_v58 }
 0x123   : > { %v4461_v32 = vadd.s32 4294967294, %v1107_v30  ;;  %vm1217_vm14 = vc.u32 %v1209_v27, %v1213_v5  ;;  %v8472_v48 = vand.u32 2147483647, %v4843_v63  ;;  %v1215_v3 = vshll.u32 %v5364_v19, 16 }
 0x124   : > { %v1218_v52 = vsel %vm1217_vm14, 1, %v8457_v34  ;;  %v1219_v23 = vadd.s32 %v1213_v5, %v1209_v27  ;;  %v1232_v14 = vmul.u32 %v1230_v18, %v1205_v21  ;;  %v1614_v8 = vxor.u32 2147483648, %v1608_v37  ;;  %v8475_v5 = vld [vmem:[#allocation23_spill] sm:$0xff] }
 0x125   : > { %vm5378_vm15 = vcmp.le.f32.partialorder %v8472_v48, 0.7853982  ;;  %vm4462_vm0 = vcmp.lt.s32.totalorder %v4461_v32, 0  ;;  %v1220_v54 = vadd.s32 %v1218_v52, %v1212_v11  ;;  %v1231_v16 = vmul.u32 %v1229_v42, %v1205_v21  ;;  %v8476_v52 = vld [vmem:[#allocation7_spill] sm:$0xff] }
 0x126   : > { %v1110_v55 = vsel %vm4462_vm0, 0, %v4461_v32  ;;  %vm1221_vm1 = vc.u32 %v1219_v23, %v1215_v3  ;;  %v1233_v35 = vmul.u32 %v1229_v42, %v1206_v4  ;;  %v1235_v17 = vshll.u32 %v1232_v14, 16 }
 0x127   : > { %v1615_v45 = vsel %vm1613_vm7, %v1600_v58, %v1614_v8  ;;  %v1618_v20 = vsel %vm1616_vm11, %v1617_v10, %v1608_v37  ;;  %v1111_v61 = vsub.s32 32, %v1110_v55  ;;  %v1115_v57 = vsub.s32 4294967266, %v1110_v55 }
 0x128   : > { %v1619_v56 = vsel %vm1612_vm13, %v1615_v45, %v1618_v20  ;;  %v1112_v1 = vshll.u32 %v5348_v33, %v1110_v55  ;;  %v1214_v50 = vshrl.u32 %v1210_v59, 16  ;;  %v1222_v46 = vsel %vm1221_vm1, 1, %v8457_v34 }
 0x129   : > { %v1620_v21 = vsel %vm1609_vm9, nan, %v1619_v56  ;;  %v1113_v43 = vshrl.u32 %v1095_v12, %v1111_v61  ;;  %v1116_v15 = vadd.s32 127, %v1115_v57  ;;  %v1224_v42 = vadd.s32 %v1222_v46, %v1220_v54 }
 0x12a   : > { %vm881_vm2 = vcmp.lt.s32.totalorder %v8475_v5, 4  ;;  %1703 = vmatpush.msrb.mxu3 %v1620_v21  ;;  %v1234_v58 = vmul.u32 %v1230_v18, %v1206_v4  ;;  %v1237_v40 = vshll.u32 %v1233_v35, 16  ;;  %vm1239_vm3 = vc.u32 %v1231_v16, %v1235_v17 }
 0x12b   : > { %v1241_v30 = vadd.s32 %v1235_v17, %v1231_v16  ;;  %v1114_v47 = vor.u32 %v1113_v43, %v1112_v1  ;;  %v1117_v27 = vshll.u32 %v1116_v15, 23  ;;  %v1225_v11 = vadd.s32 %v1224_v42, %v1214_v50  ;;  %v8478_v16 = vld [vmem:[#allocation16_spill] sm:$0xff] }
 0x12c   : > { %v1240_v33 = vsel %vm1239_vm3, 1, %v8457_v34  ;;  %v1192_v29 = vsel %vm1188_vm4, %v1172_v53, %v5293_v24  ;;  %v1194_v59 = vsel %vm1190_vm6, %v5280_v0, %v1193_v9  ;;  %v1128_v4 = vsel %vm5378_vm15, 0, %v5369_v26  ;;  %v8477_v26 = vld [vmem:[#allocation14_spill] sm:$0xff] }
 0x12d   : > { %v1242_v12 = vadd.s32 %v1240_v33, %v1234_v58  ;;  %vm1243_vm7 = vc.u32 %v1241_v30, %v1237_v40  ;;  %v1118_v37 = vor.u32 4788187, %v1117_v27  ;;  %v1216_v18 = vshrl.u32 %v5364_v19, 16  ;;  %v8479_v27 = vld [vmem:[#allocation22_spill] sm:$0xff] }
 0x12e   : > { %v1244_v10 = vsel %vm1243_vm7, 1, %v8457_v34  ;;  %v1236_v32 = vshrl.u32 %v1232_v14, 16  ;;  %v1238_v48 = vshrl.u32 %v1233_v35, 16  ;;  %v691_v24 = vand.u32 2147483647, %v8476_v52 }
 0x12f   : > { %v1246_v3 = vadd.s32 %v1244_v10, %v1242_v12  ;;  %v1119_v53 = vand.u32 2147483647, %v1118_v37  ;;  %v1121_v23 = vcvt.s32.f32 %v1114_v47  ;;  %v5405_v8 = vadd.s32 %v1225_v11, %v1216_v18  ;;  %v8480_v12 = vld [vmem:[#allocation24_spill] sm:$0xff] }
 0x130   : > { %v5407_v0 = vadd.s32 %v1241_v30, %v1237_v40  ;;  %v698_v54 = vand.u32 8388607, %v691_v24  ;;  %v708_v19 = vshll.u32 %v8458_v49, %v8477_v26  ;;  %v709_v14 = vshrl.u32 %v8459_v62, %v8478_v16 }
 0x131   : > { %v1247_v9 = vadd.s32 %v1246_v3, %v1236_v32  ;;  %v1122_v55 = vmul.f32 %v1121_v23, %v1119_v53  ;;  %v711_v35 = vshll.u32 %v8459_v62, %v8477_v26  ;;  %v712_v17 = vshrl.u32 %v8460_v41, %v8478_v16 }
 0x132   : > { %v714_v45 = vshll.u32 %v8460_v41, %v8477_v26  ;;  %v1195_v20 = vsel %vm1189_vm5, %v1192_v29, %v1194_v59  ;;  %v699_v57 = vor.u32 8388608, %v698_v54  ;;  %v715_v56 = vshrl.u32 %v8461_v31, %v8478_v16 }
 0x133   : > { %v1248_v61 = vadd.s32 %v1247_v9, %v1238_v48  ;;  %v5428_v1 = vsel %vm881_vm2, %v5344_v13, 920167782  ;;  %v1123_v50 = vxor.u32 2147483648, %v1122_v55  ;;  %v1145_v46 = vadd.s32 3, %v1128_v4 }
 0x134   : > { %vm1251_vm4 = vc.u32 %v5405_v8, %v5407_v0  ;;  %v710_v43 = vor.u32 %v709_v14, %v708_v19  ;;  %v713_v15 = vor.u32 %v712_v17, %v711_v35  ;;  %v716_v2 = vor.u32 %v715_v56, %v714_v45 }
 0x135   : > { %v1252_v21 = vadd.s32 1, %v1248_v61  ;;  %v1124_v42 = vsel %vm1003_vm8, %v1123_v50, %v1122_v55  ;;  %v1249_v58 = vmul.u32 %v5329_v28, %v1195_v20  ;;  %v707_v40 = vshrl.u32 %v8458_v49, %v8478_v16 }
 0x136   : > { %vm725_vm5 = vcmp.lt.s32.totalorder %v4916_v51, 3  ;;  %v1127_v30 = vsel %vm5378_vm15, %v4843_v63, %v1124_v42  ;;  %v5445_v33 = vshll.u32 %v699_v57, 8  ;;  %vm723_vm6 = vcmp.lt.s32.totalorder %v4916_v51, 1 }
 0x137   : > { %v1253_v47 = vsel %vm1251_vm4, %v1252_v21, %v1248_v61  ;;  %v737_v11 = vsel %vm725_vm5, %v8479_v27, %v5340_v22  ;;  %v1129_v29 = vmul.f32 %v1127_v30, %v1127_v30  ;;  %vm724_vm8 = vcmp.lt.s32.totalorder %v4916_v51, 2 }
 0x138   : > { %v1254_v59 = vadd.s32 %v1253_v47, %v1249_v58  ;;  %v728_v28 = vsel %vm726_vm10, %v716_v2, 2102212464  ;;  %v731_v36 = vsel %vm723_vm6, %v710_v43, %v713_v15  ;;  %v733_v37 = vsel %vm725_vm5, %v716_v2, %v8480_v12 }
 0x139   : > { %v735_v22 = vsel %vm723_vm6, %v713_v15, %v716_v2  ;;  %v1130_v4 = vmul.f32 -0.001358992, %v1129_v29  ;;  %v1137_v18 = vmul.f32 -0.00019511016, %v1129_v29  ;;  %v740_v48 = vand.u32 65535, %v5445_v33 }
 0x13a   : > { %v1255_v10 = vadd.s32 536870912, %v1254_v59  ;;  %v738_v32 = vsel %vm724_vm8, %v735_v22, %v737_v11  ;;  %v741_v3 = vshrl.u32 %v5445_v33, 16  ;;  %v734_v19 = vsel %vm724_vm8, %v731_v36, %v733_v37 }
 0x13b   : > { %v742_v53 = vand.u32 65535, %v738_v32  ;;  %v743_v23 = vshrl.u32 %v738_v32, 16  ;;  %v1131_v9 = vadd.f32 0.041655596, %v1130_v4  ;;  %v1138_v54 = vadd.f32 0.008332121, %v1137_v18 }
 0x13c   : > { %v5462_v26 = vshrl.u32 %v1255_v10, 30  ;;  %v727_v16 = vsel %vm723_vm6, %v707_v40, %v710_v43  ;;  %v729_v14 = vsel %vm725_vm5, %v713_v15, %v728_v28  ;;  %v5477_v17 = vsel %vm881_vm2, %v877_v38, 1326507024 }
 0x13d   : > { %v745_v55 = vmul.u32 %v743_v23, %v740_v48  ;;  %v5470_v35 = vmul.u32 %v742_v53, %v741_v3  ;;  %v1132_v45 = vmul.f32 %v1131_v9, %v1129_v29  ;;  %v1139_v20 = vmul.f32 %v1138_v54, %v1129_v29 }
 0x13e   : > { %v1257_v61 = vshll.u32 %v5462_v26, 30  ;;  %v1146_v57 = vand.u32 3, %v1145_v46  ;;  %v744_v56 = vmul.u32 %v742_v53, %v740_v48  ;;  %v765_v21 = vshrl.u32 %v734_v19, 16 }
 0x13f   : > { %v748_v50 = vshll.u32 %v745_v55, 16  ;;  %v1133_v43 = vadd.f32 -0.4999988, %v1132_v45  ;;  %v1140_v15 = vadd.f32 -0.16666654, %v1139_v20  ;;  %v5484_v42 = vsel %vm724_vm8, %v727_v16, %v729_v14 }
 0x140   : > { %v5480_v2 = vsub.s32 %v1254_v59, %v1257_v61  ;;  %v747_v60 = vmul.u32 %v743_v23, %v741_v3  ;;  %v750_v25 = vshll.u32 %v5470_v35, 16  ;;  %vm1144_vm12 = vweird.f32 %v4843_v63 }
 0x141   : > { %vm752_vm10 = vc.u32 %v744_v56, %v748_v50  ;;  %v754_v38 = vadd.s32 %v748_v50, %v744_v56  ;;  %v1134_v58 = vmul.f32 %v1133_v43, %v1129_v29  ;;  %v1141_v40 = vmul.f32 %v1140_v15, %v1129_v29 }
 0x142   : > { %vm1259_vm11 = vcmp.lt.s32.totalorder %v5480_v2, 0  ;;  %v1260_v46 = vsub.s32 0, %v5480_v2  ;;  %v753_v47 = vsel %vm752_vm10, 1, %v8457_v34  ;;  %v764_v27 = vand.u32 65535, %v734_v19 }
 0x143   : > { %vm756_vm13 = vc.u32 %v754_v38, %v750_v25  ;;  %v767_v51 = vmul.u32 %v765_v21, %v740_v48  ;;  %v1135_v11 = vadd.f32 1.0, %v1134_v58  ;;  %v1142_v59 = vadd.f32 1.0, %v1141_v40  ;;  %v8483_v25 = vld [vmem:[#allocation8_spill] sm:$0xff] }
 0x144   : > { %v1261_v28 = vsel %vm1259_vm11, %v1260_v46, %v5480_v2  ;;  %v755_v36 = vadd.s32 %v753_v47, %v747_v60  ;;  %vm1147_vm9 = vcmp.lt.s32.totalorder %v1146_v57, 2  ;;  %vm1148_vm14 = vcmp.eq.s32.totalorder %v1146_v57, 0 }
 0x145   : > { %vm1158_vm15 = vcmp.lt.s32.totalorder %v4849_v6, 0  ;;  %v1262_v29 = vclz %v1261_v28  ;;  %v757_v12 = vsel %vm756_vm13, 1, %v8457_v34  ;;  %v1143_v37 = vmul.f32 %v1142_v59, %v1127_v30 }
 0x146   : > { %vm1151_vm0 = vcmp.eq.s32.totalorder %v1146_v57, 2  ;;  %v1152_v22 = vxor.u32 2147483648, %v1135_v11  ;;  %v759_v4 = vadd.s32 %v757_v12, %v755_v36  ;;  %v1250_v18 = vadd.s32 %v5407_v0, %v5405_v8  ;;  %v8491_v0 = vld [vmem:[#allocation17_spill] sm:$0xff] }
 0x147   : > { %v4464_v10 = vadd.s32 4294967294, %v1262_v29  ;;  %v768_v32 = vmul.u32 %v764_v27, %v741_v3  ;;  %v784_v53 = vmul.u32 %v5445_v33, %v5484_v42  ;;  %v1149_v23 = vxor.u32 2147483648, %v1143_v37  ;;  %v8490_v42 = vld [vmem:[#allocation13_spill] sm:$0xff] }
 0x148   : > { %v749_v9 = vshrl.u32 %v745_v55, 16  ;;  %v766_v54 = vmul.u32 %v764_v27, %v740_v48  ;;  %v770_v19 = vshll.u32 %v767_v51, 16  ;;  %v1153_v16 = vsel %vm1151_vm0, %v1152_v22, %v1143_v37 }
 0x149   : > { %vm4465_vm1 = vcmp.lt.s32.totalorder %v4464_v10, 0  ;;  %v1280_v14 = vsub.s32 4, %v5462_v26  ;;  %v769_v30 = vmul.u32 %v765_v21, %v741_v3  ;;  %v1150_v45 = vsel %vm1148_vm14, %v1135_v11, %v1149_v23 }
 0x14a   : > { %v1265_v20 = vsel %vm4465_vm1, 0, %v4464_v10  ;;  %v760_v61 = vadd.s32 %v759_v4, %v749_v9  ;;  %vm774_vm3 = vc.u32 %v766_v54, %v770_v19  ;;  %v1154_v8 = vsel %vm1147_vm9, %v1150_v45, %v1153_v16 }
 0x14b   : > { %vm5503_vm7 = vcmp.le.f32.partialorder %v1156_v7, 0.7853982  ;;  %v1266_v48 = vsub.s32 32, %v1265_v20  ;;  %v1270_v55 = vsub.s32 4294967266, %v1265_v20  ;;  %v772_v56 = vshll.u32 %v768_v32, 16 }
 0x14c   : > { %v1155_v50 = vsel %vm1144_vm12, nan, %v1154_v8  ;;  %v1267_v3 = vshll.u32 %v5480_v2, %v1265_v20  ;;  %v775_v21 = vsel %vm774_vm3, 1, %v8457_v34  ;;  %v776_v43 = vadd.s32 %v770_v19, %v766_v54 }
 0x14d   : > { %1675 = vmatpush.msrb.mxu2 %v1155_v50  ;;  %v1268_v57 = vshrl.u32 %v1250_v18, %v1266_v48  ;;  %v1271_v15 = vadd.s32 127, %v1270_v55  ;;  %v777_v60 = vadd.s32 %v775_v21, %v769_v30  ;;  %v846_v7 = vand.u32 2147483647, %v8483_v25  ;;  %v8485_v18 = vld [vmem:[#allocation11_spill] sm:$0xff] }
 0x14e   : > { %v1281_v38 = vsel %vm1158_vm15, %v1280_v14, %v5462_v26  ;;  %v751_v58 = vshrl.u32 %v5470_v35, 16  ;;  %v771_v40 = vshrl.u32 %v767_v51, 16  ;;  %vm778_vm4 = vc.u32 %v776_v43, %v772_v56  ;;  %v8484_v26 = vld [vmem:[#allocation21_spill] sm:$0xff]  ;;  %v8486_v50 = vld [vmem:[#allocation15_spill] sm:$0xff] }
 0x14f   : > { %v1269_v63 = vor.u32 %v1268_v57, %v1267_v3  ;;  %v1272_v46 = vshll.u32 %v1271_v15, 23  ;;  %v773_v2 = vshrl.u32 %v768_v32, 16  ;;  %v779_v47 = vsel %vm778_vm4, 1, %v8457_v34  ;;  %v8487_v3 = vld [vmem:[#allocation18_spill] sm:$0xff] }
 0x150   : > { %v5517_v27 = vadd.s32 %v760_v61, %v751_v58  ;;  %v5519_v11 = vadd.s32 %v776_v43, %v772_v56  ;;  %v781_v59 = vadd.s32 %v779_v47, %v777_v60  ;;  %v853_v28 = vand.u32 8388607, %v846_v7 }
 0x151   : > { %v1273_v36 = vor.u32 4788187, %v1272_v46  ;;  %v1276_v29 = vcvt.s32.f32 %v1269_v63  ;;  %v863_v35 = vshll.u32 %v8458_v49, %v8484_v26  ;;  %v864_v51 = vshrl.u32 %v8459_v62, %v4965_v39  ;;  %v8488_v46 = vld [vmem:[#allocation19_spill] sm:$0xff] }
 0x152   : > { %v782_v12 = vadd.s32 %v781_v59, %v771_v40  ;;  %v854_v37 = vor.u32 8388608, %v853_v28  ;;  %v866_v22 = vshll.u32 %v8459_v62, %v8484_v26  ;;  %v867_v4 = vshrl.u32 %v8460_v41, %v4965_v39 }
 0x153   : > { %vm416_vm5 = vcmp.lt.s32.totalorder %v8485_v18, 4  ;;  %v1274_v10 = vand.u32 2147483647, %v1273_v36  ;;  %v5532_v32 = vor.u32 %v864_v51, %v863_v35  ;;  %v869_v23 = vshll.u32 %v8460_v41, %v8484_v26 }
 0x154   : > { %v870_v9 = vshrl.u32 %v8461_v31, %v4965_v39  ;;  %v1283_v54 = vsel %vm5503_vm7, 0, %v1281_v38  ;;  %v783_v19 = vadd.s32 %v782_v12, %v773_v2  ;;  %vm786_vm6 = vc.u32 %v5517_v27, %v5519_v11 }
 0x155   : > { %v5542_v16 = vor.u32 %v867_v4, %v866_v22  ;;  %v1277_v14 = vmul.f32 %v1276_v29, %v1274_v10  ;;  %vm878_vm8 = vcmp.lt.s32.totalorder %v8475_v5, 1  ;;  %vm880_vm10 = vcmp.lt.s32.totalorder %v8475_v5, 3 }
 0x156   : > { %v871_v30 = vor.u32 %v870_v9, %v869_v23  ;;  %v787_v45 = vadd.s32 1, %v783_v19  ;;  %v892_v61 = vsel %vm880_vm10, %v5344_v13, %v5477_v17  ;;  %v5554_v8 = vshll.u32 %v854_v37, 8 }
 0x157   : > { %v886_v20 = vsel %vm878_vm8, %v5532_v32, %v5542_v16  ;;  %v1278_v48 = vxor.u32 2147483648, %v1277_v14  ;;  %vm879_vm11 = vcmp.lt.s32.totalorder %v8475_v5, 2  ;;  %v412_v21 = vor.u32 %v8487_v3, %v8486_v50 }
 0x158   : > { %v888_v55 = vsel %vm880_vm10, %v871_v30, %v5428_v1  ;;  %v890_v56 = vsel %vm878_vm8, %v5542_v16, %v871_v30  ;;  %v1300_v43 = vadd.s32 3, %v1283_v54  ;;  %v788_v13 = vsel %vm786_vm6, %v787_v45, %v783_v19 }
 0x159   : > { %v893_v17 = vsel %vm879_vm11, %v890_v56, %v892_v61  ;;  %v1279_v57 = vsel %vm1158_vm15, %v1278_v48, %v1277_v14  ;;  %v789_v1 = vadd.s32 %v788_v13, %v784_v53  ;;  %v5577_v15 = vsel %vm879_vm11, %v886_v20, %v888_v55 }
 0x15a   : > { %v895_v60 = vand.u32 65535, %v5554_v8  ;;  %v5583_v38 = vsel %vm5503_vm7, %v4849_v6, %v1279_v57  ;;  %v5586_v58 = vshrl.u32 %v5554_v8, 16  ;;  %v897_v40 = vand.u32 65535, %v893_v17 }
 0x15b   : > { %v898_v63 = vshrl.u32 %v893_v17, 16  ;;  %v8489_v2 = vmov 920167782   ;;  %v1284_v47 = vmul.f32 %v5583_v38, %v5583_v38  ;;  %v790_v59 = vadd.s32 536870912, %v789_v1 }
 0x15c   : > { %v5590_v33 = vshrl.u32 %v8489_v2, %v8488_v46  ;;  %v5594_v53 = vshll.u32 %v8489_v2, %v8490_v42  ;;  %v5601_v28 = vsel %vm416_vm5, %v8491_v0, 920167782  ;;  %v5604_v29 = vmul.u32 %v897_v40, %v5586_v58 }
 0x15d   : > { %v900_v36 = vmul.u32 %v898_v63, %v895_v60  ;;  %v920_v26 = vshrl.u32 %v5577_v15, 16  ;;  %v5609_v35 = vshrl.u32 %v8466_v44, %v8488_v46  ;;  %v1285_v51 = vmul.f32 -0.001358992, %v1284_v47 }
 0x15e   : > { %v1292_v12 = vmul.f32 -0.00019511016, %v1284_v47  ;;  %v5611_v37 = vshrl.u32 %v790_v59, 30  ;;  %v5615_v22 = vsel %vm416_vm5, %v412_v21, 1326507024  ;;  %v5617_v4 = vand.u32 3, %v1300_v43 }
 0x15f   : > { %v899_v10 = vmul.u32 %v897_v40, %v895_v60  ;;  %v903_v23 = vshll.u32 %v900_v36, 16  ;;  %v1286_v9 = vadd.f32 0.041655596, %v1285_v51  ;;  %v862_v14 = vshrl.u32 %v8458_v49, %v4965_v39 }
 0x160   : > { %v1293_v54 = vadd.f32 0.008332121, %v1292_v12  ;;  %v792_v19 = vshll.u32 %v5611_v37, 30  ;;  %v905_v45 = vshll.u32 %v5604_v29, 16  ;;  %v5623_v61 = vmul.u32 %v920_v26, %v895_v60 }
 0x161   : > { %vm907_vm12 = vc.u32 %v899_v10, %v903_v23  ;;  %v909_v20 = vadd.s32 %v903_v23, %v899_v10  ;;  %v1287_v48 = vmul.f32 %v1286_v9, %v1284_v47  ;;  %v919_v50 = vand.u32 65535, %v5577_v15 }
 0x162   : > { %v1294_v55 = vmul.f32 %v1293_v54, %v1284_v47  ;;  %v5625_v56 = vsub.s32 %v789_v1, %v792_v19  ;;  %v785_v3 = vadd.s32 %v5519_v11, %v5517_v27  ;;  %v902_v21 = vmul.u32 %v898_v63, %v5586_v58 }
 0x163   : > { %v908_v43 = vsel %vm907_vm12, 1, %v8457_v34  ;;  %vm911_vm13 = vc.u32 %v909_v20, %v905_v45  ;;  %v1288_v39 = vadd.f32 -0.4999988, %v1287_v48  ;;  %vm1306_vm9 = vcmp.eq.s32.totalorder %v5617_v4, 2 }
 0x164   : > { %v1295_v13 = vadd.f32 -0.16666654, %v1294_v55  ;;  %vm794_vm14 = vcmp.lt.s32.totalorder %v5625_v56, 0  ;;  %v795_v17 = vsub.s32 0, %v5625_v56  ;;  %vm1303_vm15 = vcmp.eq.s32.totalorder %v5617_v4, 0 }
 0x165   : > { %v883_v57 = vsel %vm881_vm2, %v871_v30, 2102212464  ;;  %v910_v1 = vadd.s32 %v908_v43, %v902_v21  ;;  %v912_v27 = vsel %vm911_vm13, 1, %v8457_v34  ;;  %v925_v11 = vshll.u32 %v5623_v61, 16 }
 0x166   : > { %v1289_v15 = vmul.f32 %v1288_v39, %v1284_v47  ;;  %v1296_v40 = vmul.f32 %v1295_v13, %v1284_v47  ;;  %vm1302_vm0 = vcmp.lt.s32.totalorder %v5617_v4, 2  ;;  %v796_v63 = vsel %vm794_vm14, %v795_v17, %v5625_v56 }
 0x167   : > { %v921_v59 = vmul.u32 %v919_v50, %v895_v60  ;;  %vm1299_vm1 = vweird.f32 %v4849_v6  ;;  %v797_v51 = vclz %v796_v63  ;;  %v882_v12 = vsel %vm878_vm8, %v862_v14, %v5532_v32  ;;  %v8494_v63 = vld [vmem:[#allocation5_spill] sm:$0xff] }
 0x168   : > { %v914_v30 = vadd.s32 %v912_v27, %v910_v1  ;;  %v923_v10 = vmul.u32 %v919_v50, %v5586_v58  ;;  %v1290_v23 = vadd.f32 1.0, %v1289_v15  ;;  %v1297_v9 = vadd.f32 1.0, %v1296_v40 }
 0x169   : > { %v904_v54 = vshrl.u32 %v900_v36, 16  ;;  %vm929_vm2 = vc.u32 %v921_v59, %v925_v11  ;;  %vm693_vm3 = vcmp.lt.s32.totalorder %v8476_v52, 0  ;;  %v4455_v47 = vadd.s32 4294967294, %v797_v51 }
 0x16a   : > { %v884_v60 = vsel %vm880_vm10, %v5542_v16, %v883_v57  ;;  %v906_v19 = vshrl.u32 %v5604_v29, 16  ;;  %v924_v45 = vmul.u32 %v920_v26, %v5586_v58  ;;  %v1298_v32 = vmul.f32 %v1297_v9, %v5583_v38  ;;  %v8495_v9 = vld [vmem:[#allocation9_spill] sm:$0xff] }
 0x16b   : > { %v1307_v14 = vxor.u32 2147483648, %v1290_v23  ;;  %v915_v20 = vadd.s32 %v914_v30, %v904_v54  ;;  %v930_v48 = vsel %vm929_vm2, 1, %v8457_v34  ;;  %vm4456_vm7 = vcmp.lt.s32.totalorder %v4455_v47, 0 }
 0x16c   : > { %v927_v36 = vshll.u32 %v923_v10, 16  ;;  %v931_v55 = vadd.s32 %v925_v11, %v921_v59  ;;  %v932_v50 = vadd.s32 %v930_v48, %v924_v45  ;;  %v1304_v21 = vxor.u32 2147483648, %v1298_v32 }
 0x16d   : > { %v800_v43 = vsel %vm4456_vm7, 0, %v4455_v47  ;;  %v815_v39 = vsub.s32 4, %v5611_v37  ;;  %v926_v16 = vshrl.u32 %v5623_v61, 16  ;;  %v1308_v29 = vsel %vm1306_vm9, %v1307_v14, %v1298_v32  ;;  %v8497_v32 = vld [vmem:[#allocation12_spill] sm:$0xff] }
 0x16e   : > { %v801_v58 = vsub.s32 32, %v800_v43  ;;  %v805_v26 = vsub.s32 4294967266, %v800_v43  ;;  %vm933_vm4 = vc.u32 %v931_v55, %v927_v36  ;;  %v1305_v38 = vsel %vm1303_vm15, %v1290_v23, %v1304_v21 }
 0x16f   : > { %v802_v13 = vshll.u32 %v5625_v56, %v800_v43  ;;  %v5662_v17 = vadd.s32 %v915_v20, %v906_v19  ;;  %v934_v57 = vsel %vm933_vm4, 1, %v8457_v34  ;;  %v1309_v1 = vsel %vm1302_vm0, %v1305_v38, %v1308_v29  ;;  %v8496_v19 = vld [vmem:[#allocation10_spill] sm:$0xff] }
 0x170   : > { %v803_v27 = vshrl.u32 %v785_v3, %v801_v58  ;;  %v806_v61 = vadd.s32 127, %v805_v26  ;;  %v936_v11 = vadd.s32 %v934_v57, %v932_v50  ;;  %v1310_v15 = vsel %vm1299_vm1, nan, %v1309_v1 }
 0x171   : > { %vm5671_vm6 = vcmp.le.f32.partialorder %v691_v24, 0.7853982  ;;  %v928_v56 = vshrl.u32 %v923_v10, 16  ;;  %v381_v59 = vand.u32 2147483647, %v8494_v63  ;;  %1704 = vmatpush.msrb.mxu3 %v1310_v15  ;;  %v5676_v4 = vadd.s32 %v931_v55, %v927_v36 }
 0x172   : > { %v804_v51 = vor.u32 %v803_v27, %v802_v13  ;;  %v807_v30 = vshll.u32 %v806_v61, 23  ;;  %v937_v3 = vadd.s32 %v936_v11, %v926_v16  ;;  %v816_v6 = vsel %vm693_vm3, %v815_v39, %v5611_v37 }
 0x173   : > { %v885_v23 = vsel %vm879_vm11, %v882_v12, %v884_v60  ;;  %v388_v24 = vand.u32 8388607, %v381_v59  ;;  %v398_v10 = vshll.u32 %v8458_v49, %v8495_v9  ;;  %vm941_vm8 = vc.u32 %v5662_v17, %v5676_v4 }
 0x174   : > { %v808_v54 = vor.u32 4788187, %v807_v30  ;;  %v938_v47 = vadd.s32 %v937_v3, %v928_v56  ;;  %v399_v45 = vshrl.u32 %v8459_v62, %v8496_v19  ;;  %vm571_vm10 = vcmp.lt.s32.totalorder %v8497_v32, 4 }
 0x175   : > { %v389_v37 = vor.u32 8388608, %v388_v24  ;;  %v401_v5 = vshll.u32 %v8459_v62, %v8495_v9  ;;  %v402_v12 = vshrl.u32 %v8460_v41, %v8496_v19  ;;  %v404_v60 = vshll.u32 %v8460_v41, %v8495_v9 }
 0x176   : > { %v809_v14 = vand.u32 2147483647, %v808_v54  ;;  %v811_v20 = vcvt.s32.f32 %v804_v51  ;;  %v942_v48 = vadd.s32 1, %v938_v47  ;;  %v405_v36 = vshrl.u32 %v8461_v31, %v8496_v19 }
 0x177   : > { %v818_v55 = vsel %vm5671_vm6, 0, %v816_v6  ;;  %v939_v50 = vmul.u32 %v5554_v8, %v885_v23  ;;  %v400_v21 = vor.u32 %v399_v45, %v398_v10  ;;  %v403_v43 = vor.u32 %v402_v12, %v401_v5  ;;  %v8498_v8 = vld [vmem:[#allocation20_spill] sm:$0xff] }
 0x178   : > { %v812_v39 = vmul.f32 %v811_v20, %v809_v14  ;;  %v943_v16 = vsel %vm941_vm8, %v942_v48, %v938_v47  ;;  %v406_v29 = vor.u32 %v405_v36, %v404_v60  ;;  %vm415_vm11 = vcmp.lt.s32.totalorder %v8485_v18, 3 }
 0x179   : > { %v944_v58 = vadd.s32 %v943_v16, %v939_v50  ;;  %vm413_vm12 = vcmp.lt.s32.totalorder %v8485_v18, 1  ;;  %v427_v26 = vsel %vm415_vm11, %v8491_v0, %v5615_v22  ;;  %v5712_v38 = vshll.u32 %v389_v37, 8 }
 0x17a   : > { %v5716_v13 = vor.u32 %v5590_v33, %v8498_v8  ;;  %v813_v57 = vxor.u32 2147483648, %v812_v39  ;;  %vm414_vm13 = vcmp.lt.s32.totalorder %v8485_v18, 2  ;;  %v425_v1 = vsel %vm413_vm12, %v403_v43, %v406_v29 }
 0x17b   : > { %v835_v27 = vadd.s32 3, %v818_v55  ;;  %v945_v61 = vadd.s32 536870912, %v944_v58  ;;  %v397_v11 = vshrl.u32 %v8458_v49, %v8496_v19  ;;  %v428_v0 = vsel %vm414_vm13, %v425_v1, %v427_v26 }
 0x17c   : > { %v814_v22 = vsel %vm693_vm3, %v813_v57, %v812_v39  ;;  %v421_v33 = vsel %vm413_vm12, %v400_v21, %v403_v43  ;;  %v423_v15 = vsel %vm415_vm11, %v406_v29, %v5601_v28  ;;  %v5733_v56 = vand.u32 65535, %v5712_v38 }
 0x17d   : > { %v817_v51 = vsel %vm5671_vm6, %v8476_v52, %v814_v22  ;;  %v5738_v30 = vshrl.u32 %v945_v61, 30  ;;  %v432_v3 = vand.u32 65535, %v428_v0  ;;  %v433_v6 = vshrl.u32 %v428_v0, 16 }
 0x17e   : > { %v567_v23 = vor.u32 %v5609_v35, %v5594_v53  ;;  %v5745_v24 = vsel %vm571_vm10, %v5716_v13, 920167782  ;;  %v819_v28 = vmul.f32 %v817_v51, %v817_v51  ;;  %v418_v10 = vsel %vm416_vm5, %v406_v29, 2102212464 }
 0x17f   : > { %v947_v9 = vshll.u32 %v5738_v30, 30  ;;  %v431_v40 = vshrl.u32 %v5712_v38, 16  ;;  %v435_v54 = vmul.u32 %v433_v6, %v5733_v56  ;;  %v5752_v45 = vand.u32 3, %v835_v27 }
 0x180   : > { %v820_v47 = vmul.f32 -0.001358992, %v819_v28  ;;  %v827_v19 = vmul.f32 -0.00019511016, %v819_v28  ;;  %v424_v53 = vsel %vm414_vm13, %v421_v33, %v423_v15  ;;  %v417_v37 = vsel %vm413_vm12, %v397_v11, %v400_v21 }
 0x181   : > { %v5756_v35 = vsub.s32 %v944_v58, %v947_v9  ;;  %v5760_v5 = vmul.u32 %v432_v3, %v431_v40  ;;  %v438_v12 = vshll.u32 %v435_v54, 16  ;;  %v419_v20 = vsel %vm415_vm11, %v403_v43, %v418_v10 }
 0x182   : > { %v821_v60 = vadd.f32 0.041655596, %v820_v47  ;;  %v828_v14 = vadd.f32 0.008332121, %v827_v19  ;;  %v434_v48 = vmul.u32 %v432_v3, %v5733_v56  ;;  %v437_v55 = vmul.u32 %v433_v6, %v431_v40 }
 0x183   : > { %vm949_vm5 = vcmp.lt.s32.totalorder %v5756_v35, 0  ;;  %v950_v36 = vsub.s32 0, %v5756_v35  ;;  %v454_v50 = vand.u32 65535, %v424_v53  ;;  %v440_v58 = vshll.u32 %v5760_v5, 16 }
 0x184   : > { %v822_v39 = vmul.f32 %v821_v60, %v819_v28  ;;  %v829_v16 = vmul.f32 %v828_v14, %v819_v28  ;;  %vm442_vm9 = vc.u32 %v434_v48, %v438_v12  ;;  %v444_v21 = vadd.s32 %v438_v12, %v434_v48 }
 0x185   : > { %v951_v29 = vsel %vm949_vm5, %v950_v36, %v5756_v35  ;;  %v443_v26 = vsel %vm442_vm9, 1, %v8457_v34  ;;  %v455_v8 = vshrl.u32 %v424_v53, 16  ;;  %v5772_v61 = vsel %vm571_vm10, %v567_v23, 1326507024 }
 0x186   : > { %v823_v43 = vadd.f32 -0.4999988, %v822_v39  ;;  %v830_v57 = vadd.f32 -0.16666654, %v829_v16  ;;  %v952_v1 = vclz %v951_v29  ;;  %v445_v27 = vadd.s32 %v443_v26, %v437_v55 }
 0x187   : > { %vm838_vm14 = vcmp.eq.s32.totalorder %v5752_v45, 0  ;;  %vm841_vm15 = vcmp.eq.s32.totalorder %v5752_v45, 2  ;;  %vm446_vm0 = vc.u32 %v444_v21, %v440_v58  ;;  %vm837_vm1 = vcmp.lt.s32.totalorder %v5752_v45, 2  ;;  %v8499_v21 = vld [vmem:[#allocation6_spill] sm:$0xff] }
 0x188   : > { %v824_v11 = vmul.f32 %v823_v43, %v819_v28  ;;  %v831_v0 = vmul.f32 %v830_v57, %v819_v28  ;;  %v4458_v22 = vadd.s32 4294967294, %v952_v1  ;;  %v447_v33 = vsel %vm446_vm0, 1, %v8457_v34 }
 0x189   : > { %vm834_vm2 = vweird.f32 %v8476_v52  ;;  %v940_v15 = vadd.s32 %v5676_v4, %v5662_v17  ;;  %v5783_v3 = vsel %vm414_vm13, %v417_v37, %v419_v20  ;;  %v449_v6 = vadd.s32 %v447_v33, %v445_v27 }
 0x18a   : > { %v457_v23 = vmul.u32 %v455_v8, %v5733_v56  ;;  %v825_v9 = vadd.f32 1.0, %v824_v11  ;;  %v832_v10 = vadd.f32 1.0, %v831_v0  ;;  %vm4459_vm3 = vcmp.lt.s32.totalorder %v4458_v22, 0 }
 0x18b   : > { %v458_v28 = vmul.u32 %v454_v50, %v431_v40  ;;  %v955_v47 = vsel %vm4459_vm3, 0, %v4458_v22  ;;  %v439_v19 = vshrl.u32 %v435_v54, 16  ;;  %v441_v53 = vshrl.u32 %v5760_v5, 16 }
 0x18c   : > { %v460_v12 = vshll.u32 %v457_v23, 16  ;;  %v833_v60 = vmul.f32 %v832_v10, %v817_v51  ;;  %v842_v14 = vxor.u32 2147483648, %v825_v9  ;;  %v956_v48 = vsub.s32 32, %v955_v47 }
 0x18d   : > { %v456_v17 = vmul.u32 %v454_v50, %v5733_v56  ;;  %v957_v18 = vshll.u32 %v5756_v35, %v955_v47  ;;  %v960_v4 = vsub.s32 4294967266, %v955_v47  ;;  %v450_v37 = vadd.s32 %v449_v6, %v439_v19 }
 0x18e   : > { %v459_v20 = vmul.u32 %v455_v8, %v431_v40  ;;  %v839_v36 = vxor.u32 2147483648, %v833_v60  ;;  %v958_v55 = vshrl.u32 %v940_v15, %v956_v48  ;;  %v462_v39 = vshll.u32 %v458_v28, 16 }
 0x18f   : > { %vm464_vm7 = vc.u32 %v456_v17, %v460_v12  ;;  %v843_v54 = vsel %vm841_vm15, %v842_v14, %v833_v60  ;;  %vm848_vm4 = vcmp.lt.s32.totalorder %v8483_v25, 0  ;;  %v961_v5 = vadd.s32 127, %v960_v4 }
 0x190   : > { %v465_v51 = vsel %vm464_vm7, 1, %v8457_v34  ;;  %v466_v16 = vadd.s32 %v460_v12, %v456_v17  ;;  %v840_v56 = vsel %vm838_vm14, %v825_v9, %v839_v36  ;;  %v959_v35 = vor.u32 %v958_v55, %v957_v18 }
 0x191   : > { %v467_v50 = vadd.s32 %v465_v51, %v459_v20  ;;  %v536_v40 = vand.u32 2147483647, %v8499_v21  ;;  %v844_v29 = vsel %vm837_vm1, %v840_v56, %v843_v54  ;;  %v962_v58 = vshll.u32 %v961_v5, 23 }
 0x192   : > { %v970_v26 = vsub.s32 4, %v5738_v30  ;;  %vm468_vm6 = vc.u32 %v466_v16, %v462_v39  ;;  %v845_v8 = vsel %vm834_vm2, nan, %v844_v29  ;;  %vm5803_vm8 = vcmp.le.f32.partialorder %v846_v7, 0.7853982 }
 0x193   : > { %v5807_v57 = vadd.s32 %v450_v37, %v441_v53  ;;  %v461_v1 = vshrl.u32 %v457_v23, 16  ;;  %v469_v27 = vsel %vm468_vm6, 1, %v8457_v34  ;;  %1676 = vmatpush.msrb.mxu2 %v845_v8  ;;  %v963_v45 = vor.u32 4788187, %v962_v58 }
 0x194   : > { %v463_v11 = vshrl.u32 %v458_v28, 16  ;;  %v5810_v0 = vadd.s32 %v466_v16, %v462_v39  ;;  %v471_v22 = vadd.s32 %v469_v27, %v467_v50  ;;  %v966_v33 = vcvt.s32.f32 %v959_v35 }
 0x195   : > { %v543_v52 = vand.u32 8388607, %v536_v40  ;;  %v553_v7 = vshll.u32 %v8458_v49, %v8490_v42  ;;  %v554_v15 = vshrl.u32 %v8459_v62, %v8488_v46  ;;  %v964_v6 = vand.u32 2147483647, %v963_v45 }
 0x196   : > { %v472_v23 = vadd.s32 %v471_v22, %v461_v1  ;;  %v556_v9 = vshll.u32 %v8459_v62, %v8490_v42  ;;  %v557_v10 = vshrl.u32 %v8460_v41, %v8488_v46  ;;  %v559_v19 = vshll.u32 %v8460_v41, %v8490_v42 }
 0x197   : > { %v544_v28 = vor.u32 8388608, %v543_v52  ;;  %v5822_v47 = vor.u32 %v554_v15, %v553_v7  ;;  %v560_v53 = vshrl.u32 %v8461_v31, %v8488_v46  ;;  %v967_v12 = vmul.f32 %v966_v33, %v964_v6 }
 0x198   : > { %v473_v60 = vadd.s32 %v472_v23, %v463_v11  ;;  %v474_v14 = vmul.u32 %v5712_v38, %v5783_v3  ;;  %v5830_v48 = vor.u32 %v557_v10, %v556_v9  ;;  %v971_v17 = vsel %vm848_vm4, %v970_v26, %v5738_v30 }
 0x199   : > { %vm476_vm11 = vc.u32 %v5807_v57, %v5810_v0  ;;  %v5837_v18 = vor.u32 %v560_v53, %v559_v19  ;;  %vm570_vm12 = vcmp.lt.s32.totalorder %v8497_v32, 3  ;;  %v968_v42 = vxor.u32 2147483648, %v967_v12 }
 0x19a   : > { %v477_v4 = vadd.s32 1, %v473_v60  ;;  %vm568_vm13 = vcmp.lt.s32.totalorder %v8497_v32, 1  ;;  %v582_v38 = vsel %vm570_vm12, %v5716_v13, %v5772_v61  ;;  %v5857_v20 = vshll.u32 %v544_v28, 8 }
 0x19b   : > { %v576_v30 = vsel %vm568_vm13, %v5822_v47, %v5830_v48  ;;  %v578_v3 = vsel %vm570_vm12, %v5837_v18, %v5745_v24  ;;  %v580_v37 = vsel %vm568_vm13, %v5830_v48, %v5837_v18  ;;  %v969_v13 = vsel %vm848_vm4, %v968_v42, %v967_v12 }
 0x19c   : > { %v973_v61 = vsel %vm5803_vm8, 0, %v971_v17  ;;  %v478_v36 = vsel %vm476_vm11, %v477_v4, %v473_v60  ;;  %vm569_vm5 = vcmp.lt.s32.totalorder %v8497_v32, 2  ;;  %v972_v24 = vsel %vm5803_vm8, %v8483_v25, %v969_v13 }
 0x19d   : > { %v479_v55 = vadd.s32 %v478_v36, %v474_v14  ;;  %v583_v39 = vsel %vm569_vm5, %v580_v37, %v582_v38  ;;  %v974_v54 = vmul.f32 %v972_v24, %v972_v24  ;;  %v5871_v5 = vsel %vm569_vm5, %v576_v30, %v578_v3 }
 0x19e   : > { %v587_v51 = vand.u32 65535, %v583_v39  ;;  %v990_v16 = vadd.s32 3, %v973_v61  ;;  %v585_v35 = vand.u32 65535, %v5857_v20  ;;  %v588_v50 = vshrl.u32 %v583_v39, 16 }
 0x19f   : > { %v480_v56 = vadd.s32 536870912, %v479_v55  ;;  %v975_v29 = vmul.f32 -0.001358992, %v974_v54  ;;  %v982_v58 = vmul.f32 -0.00019511016, %v974_v54  ;;  %v586_v26 = vshrl.u32 %v5857_v20, 16 }
 0x1a0   : > { %v590_v43 = vmul.u32 %v588_v50, %v585_v35  ;;  %v610_v1 = vshrl.u32 %v5871_v5, 16  ;;  %v991_v22 = vand.u32 3, %v990_v16  ;;  %v589_v52 = vmul.u32 %v587_v51, %v585_v35 }
 0x1a1   : > { %v5875_v8 = vshrl.u32 %v480_v56, 30  ;;  %v976_v27 = vadd.f32 0.041655596, %v975_v29  ;;  %v983_v45 = vadd.f32 0.008332121, %v982_v58  ;;  %v5878_v11 = vmul.u32 %v587_v51, %v586_v26 }
 0x1a2   : > { %v593_v7 = vshll.u32 %v590_v43, 16  ;;  %v592_v23 = vmul.u32 %v588_v50, %v586_v26  ;;  %v609_v9 = vand.u32 65535, %v5871_v5  ;;  %v5882_v19 = vmul.u32 %v610_v1, %v585_v35 }
 0x1a3   : > { %v482_v33 = vshll.u32 %v5875_v8, 30  ;;  %v977_v15 = vmul.f32 %v976_v27, %v974_v54  ;;  %v984_v6 = vmul.f32 %v983_v45, %v974_v54  ;;  %v595_v60 = vshll.u32 %v5878_v11, 16 }
 0x1a4   : > { %vm597_vm9 = vc.u32 %v589_v52, %v593_v7  ;;  %v599_v28 = vadd.s32 %v593_v7, %v589_v52  ;;  %vm992_vm15 = vcmp.lt.s32.totalorder %v991_v22, 2  ;;  %vm989_vm1 = vweird.f32 %v8483_v25 }
 0x1a5   : > { %v483_v10 = vsub.s32 %v479_v55, %v482_v33  ;;  %v978_v53 = vadd.f32 -0.4999988, %v977_v15  ;;  %v985_v12 = vadd.f32 -0.16666654, %v984_v6  ;;  %v598_v14 = vsel %vm597_vm9, 1, %v8457_v34 }
 0x1a6   : > { %v600_v42 = vadd.s32 %v598_v14, %v592_v23  ;;  %vm601_vm0 = vc.u32 %v599_v28, %v595_v60  ;;  %v613_v37 = vmul.u32 %v609_v9, %v586_v26  ;;  %v615_v13 = vshll.u32 %v5882_v19, 16 }
 0x1a7   : > { %vm484_vm14 = vcmp.lt.s32.totalorder %v483_v10, 0  ;;  %v485_v17 = vsub.s32 0, %v483_v10  ;;  %v979_v4 = vmul.f32 %v978_v53, %v974_v54  ;;  %v986_v38 = vmul.f32 %v985_v12, %v974_v54 }
 0x1a8   : > { %v602_v3 = vsel %vm601_vm0, 1, %v8457_v34  ;;  %vm993_vm2 = vcmp.eq.s32.totalorder %v991_v22, 0  ;;  %vm996_vm3 = vcmp.eq.s32.totalorder %v991_v22, 2  ;;  %v475_v39 = vadd.s32 %v5810_v0, %v5807_v57 }
 0x1a9   : > { %v486_v30 = vsel %vm484_vm14, %v485_v17, %v483_v10  ;;  %v980_v61 = vadd.f32 1.0, %v979_v4  ;;  %v987_v36 = vadd.f32 1.0, %v986_v38  ;;  %v604_v5 = vadd.s32 %v602_v3, %v600_v42 }
 0x1aa   : > { %v487_v55 = vclz %v486_v30  ;;  %v611_v54 = vmul.u32 %v609_v9, %v585_v35  ;;  %v552_v50 = vshrl.u32 %v8458_v49, %v8488_v46  ;;  %v594_v29 = vshrl.u32 %v590_v43, 16 }
 0x1ab   : > { %v988_v51 = vmul.f32 %v987_v36, %v972_v24  ;;  %v997_v16 = vxor.u32 2147483648, %v980_v61  ;;  %v617_v58 = vshll.u32 %v613_v37, 16  ;;  %v573_v33 = vsel %vm571_vm10, %v5837_v18, 2102212464 }
 0x1ac   : > { %v4449_v56 = vadd.s32 4294967294, %v487_v55  ;;  %vm619_vm7 = vc.u32 %v611_v54, %v615_v13  ;;  %v621_v27 = vadd.s32 %v615_v13, %v611_v54  ;;  %v614_v52 = vmul.u32 %v610_v1, %v586_v26 }
 0x1ad   : > { %v994_v45 = vxor.u32 2147483648, %v988_v51  ;;  %v605_v0 = vadd.s32 %v604_v5, %v594_v29  ;;  %v620_v24 = vsel %vm619_vm7, 1, %v8457_v34  ;;  %v998_v46 = vsel %vm996_vm3, %v997_v16, %v988_v51 }
 0x1ae   : > { %vm4450_vm4 = vcmp.lt.s32.totalorder %v4449_v56, 0  ;;  %vm623_vm6 = vc.u32 %v621_v27, %v617_v58  ;;  %v596_v6 = vshrl.u32 %v5878_v11, 16  ;;  %v622_v23 = vadd.s32 %v620_v24, %v614_v52 }
 0x1af   : > { %v490_v57 = vsel %vm4450_vm4, 0, %v4449_v56  ;;  %v995_v35 = vsel %vm993_vm2, %v980_v61, %v994_v45  ;;  %v624_v9 = vsel %vm623_vm6, 1, %v8457_v34  ;;  %v572_v53 = vsel %vm568_vm13, %v552_v50, %v5822_v47 }
 0x1b0   : > { %v491_v43 = vsub.s32 32, %v490_v57  ;;  %v495_v7 = vsub.s32 4294967266, %v490_v57  ;;  %v999_v15 = vsel %vm992_vm15, %v995_v35, %v998_v46  ;;  %v492_v26 = vshll.u32 %v483_v10, %v490_v57 }
 0x1b1   : > { %v1000_v18 = vsel %vm989_vm1, nan, %v999_v15  ;;  %v616_v12 = vshrl.u32 %v5882_v19, 16  ;;  %v626_v22 = vadd.s32 %v624_v9, %v622_v23  ;;  %v574_v11 = vsel %vm570_vm12, %v5830_v48, %v573_v33 }
 0x1b2   : > { %v493_v1 = vshrl.u32 %v475_v39, %v491_v43  ;;  %v496_v28 = vadd.s32 127, %v495_v7  ;;  %1705 = vmatpush.msrb.mxu3 %v1000_v18  ;;  %v606_v17 = vadd.s32 %v605_v0, %v596_v6  ;;  %v618_v25 = vshrl.u32 %v613_v37, 16 }
 0x1b3   : > { %v627_v42 = vadd.s32 %v626_v22, %v616_v12  ;;  %v625_v4 = vadd.s32 %v621_v27, %v617_v58  ;;  %v575_v38 = vsel %vm569_vm5, %v572_v53, %v574_v11  ;;  %vm383_vm8 = vcmp.lt.s32.totalorder %v8494_v63, 0 }
 0x1b4   : > { %v494_v60 = vor.u32 %v493_v1, %v492_v26  ;;  %v497_v14 = vshll.u32 %v496_v28, 23  ;;  %v629_v61 = vmul.u32 %v5857_v20, %v575_v38  ;;  %vm5917_vm11 = vcmp.le.f32.partialorder %v381_v59, 0.7853982 }
 0x1b5   : > { %v628_v30 = vadd.s32 %v627_v42, %v618_v25  ;;  %vm631_vm10 = vc.u32 %v606_v17, %v625_v4  ;;  %v505_v37 = vsub.s32 4, %v5875_v8  ;;  %v630_v28 = vadd.s32 %v625_v4, %v606_v17  ;;  %v1621_v17 = vld [vmem:[%s8282_s3] sm:$0xff] }
 0x1b6   : > { %v498_v10 = vor.u32 4788187, %v497_v14  ;;  %v501_v47 = vcvt.s32.f32 %v494_v60  ;;  %vm524_vm15 = vweird.f32 %v8494_v63  ;;  %vm8414_vm0 = vcmask 261120  }
 0x1b7   : > { %v632_v19 = vadd.s32 1, %v628_v30  ;;  %v506_v16 = vsel %vm383_vm8, %v505_v37, %v5875_v8  ;;  %vm538_vm1 = vcmp.lt.s32.totalorder %v8499_v21, 0  ;;  %vm5942_vm2 = vcmp.le.f32.partialorder %v536_v40, 0.7853982  ;;  %v1623_v40 = vld [vmem:[%s8282_s3 + $0x10] sm:$0xff] }
 0x1b8   : > { %v499_v3 = vand.u32 2147483647, %v498_v10  ;;  %v508_v45 = vsel %vm5917_vm11, 0, %v506_v16  ;;  %vm679_vm6 = vweird.f32 %v8499_v21 }
 0x1b9   : > { %v633_v36 = vsel %vm631_vm10, %v632_v19, %v628_v30  ;;  %v525_v35 = vadd.s32 3, %v508_v45 }
 0x1ba   : > { %v502_v13 = vmul.f32 %v501_v47, %v499_v3  ;;  %v634_v39 = vadd.s32 %v633_v36, %v629_v61 }
 0x1bb   : > { %v526_v9 = vand.u32 3, %v525_v35 }
 0x1bc   : > { %v503_v55 = vxor.u32 2147483648, %v502_v13  ;;  %v635_v5 = vadd.s32 536870912, %v634_v39 }
 0x1bd   : > { %vm528_vm5 = vcmp.eq.s32.totalorder %v526_v9, 0  ;;  %vm531_vm9 = vcmp.eq.s32.totalorder %v526_v9, 2  ;;  %vm527_vm14 = vcmp.lt.s32.totalorder %v526_v9, 2  ;;  %v4511_v9 = vld [vmem:[%s8283_s4 + $0x38] sm:$0xff] }
 0x1be   : > { %v504_v32 = vsel %vm383_vm8, %v503_v55, %v502_v13  ;;  %v5925_v51 = vshrl.u32 %v635_v5, 30 }
 0x1bf   : > { %v507_v54 = vsel %vm5917_vm11, %v8494_v63, %v504_v32  ;;  %v1622_v63 = vld [vmem:[%s8282_s3 + $0x8] sm:$0xff] }
 0x1c0   : > { %v509_v20 = vmul.f32 %v507_v54, %v507_v54  ;;  %v637_v59 = vshll.u32 %v5925_v51, 30 }
 0x1c2   : > { %v510_v56 = vmul.f32 -0.001358992, %v509_v20  ;;  %v517_v50 = vmul.f32 -0.00019511016, %v509_v20  ;;  %v638_v27 = vsub.s32 %v634_v39, %v637_v59  ;;  %v660_v39 = vsub.s32 4, %v5925_v51 }
 0x1c4   : > { %v511_v29 = vadd.f32 0.041655596, %v510_v56  ;;  %v518_v58 = vadd.f32 0.008332121, %v517_v50  ;;  %vm639_vm12 = vcmp.lt.s32.totalorder %v638_v27, 0  ;;  %v640_v57 = vsub.s32 0, %v638_v27 }
 0x1c6   : > { %v512_v33 = vmul.f32 %v511_v29, %v509_v20  ;;  %v519_v52 = vmul.f32 %v518_v58, %v509_v20  ;;  %v641_v46 = vsel %vm639_vm12, %v640_v57, %v638_v27  ;;  %v1624_v57 = vld [vmem:[%s8282_s3 + $0x18] sm:$0xff] }
 0x1c7   : > { %v642_v43 = vclz %v641_v46  ;;  %v1628_v46 = vld [vmem:[%s8283_s4 + $0x18] sm:$0xff] }
 0x1c8   : > { %v513_v0 = vadd.f32 -0.4999988, %v512_v33  ;;  %v520_v24 = vadd.f32 -0.16666654, %v519_v52  ;;  %1646 = vperm.xlu2 %4602, %v1628_v46  }
 0x1c9   : > { %v4452_v15 = vadd.s32 4294967294, %v642_v43 }
 0x1ca   : > { %v514_v8 = vmul.f32 %v513_v0, %v509_v20  ;;  %v521_v7 = vmul.f32 %v520_v24, %v509_v20 }
 0x1cb   : > { %vm4453_vm13 = vcmp.lt.s32.totalorder %v4452_v15, 0 }
 0x1cc   : > { %v515_v6 = vadd.f32 1.0, %v514_v8  ;;  %v522_v23 = vadd.f32 1.0, %v521_v7  ;;  %v645_v1 = vsel %vm4453_vm13, 0, %v4452_v15 }
 0x1cd   : > { %v646_v53 = vsub.s32 32, %v645_v1  ;;  %v650_v12 = vsub.s32 4294967266, %v645_v1  ;;  %v647_v60 = vshll.u32 %v638_v27, %v645_v1 }
 0x1ce   : > { %v523_v18 = vmul.f32 %v522_v23, %v507_v54  ;;  %v532_v26 = vxor.u32 2147483648, %v515_v6  ;;  %v661_v54 = vsel %vm538_vm1, %v660_v39, %v5925_v51  ;;  %v1627_v23 = vld [vmem:[%s8283_s4 + $0x10] sm:$0xff] }
 0x1cf   : > { %v648_v14 = vshrl.u32 %v630_v28, %v646_v53  ;;  %v651_v11 = vadd.s32 127, %v650_v12  ;;  %v663_v56 = vsel %vm5942_vm2, 0, %v661_v54  ;;  %v1637_v12 = vpop.permute.xlu0 %1636 }
 0x1d0   : > { %v529_v22 = vxor.u32 2147483648, %v523_v18  ;;  %v533_v42 = vsel %vm531_vm9, %v532_v26, %v523_v18  ;;  %v680_v27 = vadd.s32 3, %v663_v56  ;;  %1641 = vperm.xlu2 %4602, %v1627_v23   ;;  %v1632_v26 = vpop.permute.xlu1 %1631 }
 0x1d1   : > { %v649_v38 = vor.u32 %v648_v14, %v647_v60  ;;  %v652_v30 = vshll.u32 %v651_v11, 23 }
 0x1d2   : > { %v530_v25 = vsel %vm528_vm5, %v515_v6, %v529_v22  ;;  %v681_v0 = vand.u32 3, %v680_v27 }
 0x1d3   : > { %v534_v10 = vsel %vm527_vm14, %v530_v25, %v533_v42  ;;  %v653_v4 = vor.u32 4788187, %v652_v30  ;;  %v656_v19 = vcvt.s32.f32 %v649_v38 }
 0x1d4   : > { %v535_v3 = vsel %vm524_vm15, nan, %v534_v10  ;;  %vm683_vm3 = vcmp.eq.s32.totalorder %v681_v0, 0  ;;  %vm686_vm7 = vcmp.eq.s32.totalorder %v681_v0, 2  ;;  %vm682_vm4 = vcmp.lt.s32.totalorder %v681_v0, 2 }
 0x1d5   : > { %1677 = vmatpush.msrb.mxu2 %v535_v3  ;;  %v654_v47 = vand.u32 2147483647, %v653_v4 }
 0x1d6   : > { %4472 = vmatmul.msk.f32.vlgmr.msrb.gmra.mxu2 %vm8414_vm0, %v1621_v17 }
 0x1d7   : > { %v657_v13 = vmul.f32 %v656_v19, %v654_v47 }
 0x1d8   : > { %2987 = vperm.xlu2 %4602, %v4511_v9  }
 0x1d9   : > { %v658_v61 = vxor.u32 2147483648, %v657_v13 }
 0x1db   : > { %v659_v55 = vsel %vm538_vm1, %v658_v61, %v657_v13 }
 0x1dc   : > { %v662_v48 = vsel %vm5942_vm2, %v8499_v21, %v659_v55  ;;  %v4508_v21 = vld [vmem:[%s8283_s4 + $0x20] sm:$0xff] }
 0x1dd   : > { %v664_v32 = vmul.f32 %v662_v48, %v662_v48 }
 0x1de   : > { %4473 = vmatmul.msk.f32.gmra.mxu2 %vm8414_vm0, %v1622_v63 }
 0x1df   : > { %v665_v37 = vmul.f32 -0.001358992, %v664_v32  ;;  %v672_v5 = vmul.f32 -0.00019511016, %v664_v32 }
 0x1e0   : > { %2972 = vperm.xlu2 %4602, %v4508_v21  }
 0x1e1   : > { %v666_v20 = vadd.f32 0.041655596, %v665_v37  ;;  %v673_v16 = vadd.f32 0.008332121, %v672_v5 }
 0x1e3   : > { %v667_v50 = vmul.f32 %v666_v20, %v664_v32  ;;  %v674_v59 = vmul.f32 %v673_v16, %v664_v32 }
 0x1e5   : > { %v668_v29 = vadd.f32 -0.4999988, %v667_v50  ;;  %v675_v58 = vadd.f32 -0.16666654, %v674_v59 }
 0x1e6   : > { %4474 = vmatmul.msk.f32.gmra.mxu2 %vm8414_vm0, %v1623_v40 }
 0x1e7   : > { %v669_v45 = vmul.f32 %v668_v29, %v664_v32  ;;  %v676_v33 = vmul.f32 %v675_v58, %v664_v32 }
 0x1e9   : > { %v670_v52 = vadd.f32 1.0, %v669_v45  ;;  %v677_v51 = vadd.f32 1.0, %v676_v33 }
 0x1eb   : > { %v678_v24 = vmul.f32 %v677_v51, %v662_v48  ;;  %v687_v35 = vxor.u32 2147483648, %v670_v52 }
 0x1ed   : > { %v684_v43 = vxor.u32 2147483648, %v678_v24  ;;  %v688_v7 = vsel %vm686_vm7, %v687_v35, %v678_v24 }
 0x1ee   : > { %4475 = vmatmul.msk.f32.gmra.mxu2 %vm8414_vm0, %v1624_v57 }
 0x1ef   : > { %v685_v8 = vsel %vm683_vm3, %v670_v52, %v684_v43 }
 0x1f0   : > { %v689_v15 = vsel %vm682_vm4, %v685_v8, %v688_v7 }
 0x1f1   : > { %v690_v6 = vsel %vm679_vm6, nan, %v689_v15 }
 0x1f2   : > { %1706 = vmatpush.msrb.mxu3 %v690_v6 }
 0x1f3   : > { %4476 = vmatmul.msk.f32.vlgmr.msrb.gmra.mxu3 %vm8414_vm0, %v1621_v17 }
 0x1fb   : > { %4477 = vmatmul.msk.f32.gmra.mxu3 %vm8414_vm0, %v1622_v63 }
 0x203   : > { %4478 = vmatmul.msk.f32.gmra.mxu3 %vm8414_vm0, %v1623_v40 }
 0x20b   : > { %4479 = vmatmul.msk.f32.gmra.mxu3 %vm8414_vm0, %v1624_v57 }
 0x222   : > { %v5982_v53 = vpop.permute.xlu2 %1646 }
 0x22a   : > { %v1642_v30 = vpop.permute.xlu2 %1641 }
 0x259   : > { %v1679_v18 = vpop.f32.mrf.mxu2 }
 0x25a   : > { %v5979_v1 = vadd.f32 %v1679_v18, %v1632_v26 }
 0x25c   : > { %8506 = vst [vmem:[#allocation23_spill] sm:$0xff] %v5979_v1  ;;  %v1723_v28 = vand.u32 2139095040, %v5979_v1 }
 0x25e   : > { %v1724_v60 = vshrl.u32 %v1723_v28, 23 }
 0x260   : > { %v4480_v25 = vadd.s32 4294967169, %v1724_v60 }
 0x261   : > { %v1682_v22 = vpop.f32.mrf.mxu2 }
 0x262   : > { %v5984_v14 = vadd.f32 %v1682_v22, %v1637_v12  ;;  %v1730_v38 = vadd.s32 1, %v4480_v25 }
 0x264   : > { %v2033_v11 = vand.u32 2139095040, %v5984_v14  ;;  %vm1731_vm10 = vcmp.gt.s32.totalorder %v1730_v38, 0 }
 0x265   : > { %v1732_v63 = vsel %vm1731_vm10, %v1730_v38, 0 }
 0x266   : > { %v2034_v42 = vshrl.u32 %v2033_v11, 23  ;;  %v5996_v37 = vand.u32 31, %v1732_v63  ;;  %v6010_v52 = vshrl.u32 %v1732_v63, 5 }
 0x268   : > { %v4486_v10 = vadd.s32 4294967169, %v2034_v42  ;;  %8508 = vst [vmem:[#allocation14_spill] sm:$0xff] %v5996_v37  ;;  %v6004_v50 = vsub.s32 32, %v5996_v37  ;;  %v1746_v35 = vshll.u32 %v8461_v31, %v5996_v37  ;;  %v1749_v7 = vshll.u32 %v8489_v2, %v5996_v37 }
 0x269   : > { %v1685_v3 = vpop.f32.mrf.mxu2  ;;  %8513 = vst [vmem:[#allocation21_spill] sm:$0xff] %v6010_v52  ;;  %vm1755_vm13 = vcmp.lt.s32.totalorder %v6010_v52, 4 }
 0x26a   : > { %v2040_v17 = vadd.s32 1, %v4486_v10  ;;  %v5987_v4 = vadd.f32 %v1685_v3, %v1642_v30  ;;  %8511 = vst [vmem:[#allocation24_spill] sm:$0xff] %v6004_v50  ;;  %v1747_v51 = vshrl.u32 %v8489_v2, %v6004_v50  ;;  %v1750_v46 = vshrl.u32 %v8466_v44, %v6004_v50 }
 0x26c   : > { %v2343_v19 = vand.u32 2139095040, %v5987_v4  ;;  %vm2041_vm8 = vcmp.gt.s32.totalorder %v2040_v17, 0  ;;  %v1751_v22 = vor.u32 %v1750_v46, %v1749_v7 }
 0x26d   : > { %v2042_v55 = vsel %vm2041_vm8, %v2040_v17, 0 }
 0x26e   : > { %v2344_v61 = vshrl.u32 %v2343_v19, 23  ;;  %v5998_v20 = vand.u32 31, %v2042_v55  ;;  %v6033_v28 = vshrl.u32 %v2042_v55, 5 }
 0x270   : > { %v4492_v36 = vadd.s32 4294967169, %v2344_v61  ;;  %8509 = vst [vmem:[#allocation16_spill] sm:$0xff] %v5998_v20  ;;  %v6008_v58 = vsub.s32 32, %v5998_v20  ;;  %v2056_v15 = vshll.u32 %v8461_v31, %v5998_v20  ;;  %v2059_v11 = vshll.u32 %v8489_v2, %v5998_v20 }
 0x271   : > { %v1688_v39 = vpop.f32.mrf.mxu2  ;;  %8515 = vst [vmem:[#allocation15_spill] sm:$0xff] %v6033_v28  ;;  %vm2065_vm9 = vcmp.lt.s32.totalorder %v6033_v28, 4 }
 0x272   : > { %v5994_v32 = vadd.f32 %v1688_v39, %v5982_v53  ;;  %v2350_v54 = vadd.s32 1, %v4492_v36  ;;  %8512 = vst [vmem:[#allocation8_spill] sm:$0xff] %v6008_v58  ;;  %v2057_v43 = vshrl.u32 %v8489_v2, %v6008_v58  ;;  %v2060_v9 = vshrl.u32 %v8466_v44, %v6008_v58 }
 0x274   : > { %v2653_v40 = vand.u32 2139095040, %v5994_v32  ;;  %vm2351_vm11 = vcmp.gt.s32.totalorder %v2350_v54, 0  ;;  %v6035_v60 = vor.u32 %v2057_v43, %v2056_v15  ;;  %v2061_v38 = vor.u32 %v2060_v9, %v2059_v11 }
 0x275   : > { %v2352_v33 = vsel %vm2351_vm11, %v2350_v54, 0 }
 0x276   : > { %v1708_v47 = vpop.f32.mrf.mxu3  ;;  %v2654_v29 = vshrl.u32 %v2653_v40, 23  ;;  %v6026_v6 = vand.u32 31, %v2352_v33  ;;  %8516 = vst [vmem:[#allocation18_spill] sm:$0xff] %v6035_v60  ;;  %v6056_v19 = vsel %vm2065_vm9, %v6035_v60, 920167782 }
 0x277   : > { %v5990_v13 = vadd.f32 %v1708_v47, %v1632_v26  ;;  %v6031_v26 = vor.u32 %v1747_v51, %v1746_v35  ;;  %v6051_v47 = vsel %vm1755_vm13, %v1751_v22, 1326507024  ;;  %8519 = vst [vmem:[#allocation17_spill] sm:$0xff] %v6056_v19 }
 0x278   : > { %v4498_v27 = vadd.s32 4294967169, %v2654_v29  ;;  %v6040_v42 = vsub.s32 32, %v6026_v6  ;;  %8518 = vst [vmem:[#allocation13_spill] sm:$0xff] %v6051_v47  ;;  %v2366_v55 = vshll.u32 %v8461_v31, %v6026_v6  ;;  %v2369_v54 = vshll.u32 %v8489_v2, %v6026_v6 }
 0x279   : > { %8507 = vst [vmem:[#allocation7_spill] sm:$0xff] %v5990_v13  ;;  %v1878_v48 = vand.u32 2139095040, %v5990_v13 }
 0x27a   : > { %v2660_v24 = vadd.s32 1, %v4498_v27  ;;  %8514 = vst [vmem:[#allocation11_spill] sm:$0xff] %v6031_v26  ;;  %v2367_v39 = vshrl.u32 %v8489_v2, %v6040_v42  ;;  %v2370_v40 = vshrl.u32 %v8466_v44, %v6040_v42 }
 0x27b   : > { %v1879_v56 = vshrl.u32 %v1878_v48, 23 }
 0x27c   : > { %vm2661_vm12 = vcmp.gt.s32.totalorder %v2660_v24, 0  ;;  %v2371_v43 = vor.u32 %v2370_v40, %v2369_v54 }
 0x27d   : > { %v4483_v45 = vadd.s32 4294967169, %v1879_v56  ;;  %v2662_v18 = vsel %vm2661_vm12, %v2660_v24, 0  ;;  %v6088_v24 = vor.u32 %v2367_v39, %v2366_v55 }
 0x27e   : > { %v1711_v5 = vpop.f32.mrf.mxu3  ;;  %v2664_v10 = vand.u32 31, %v2662_v18  ;;  %v6091_v7 = vshrl.u32 %v2662_v18, 5 }
 0x27f   : > { %v6000_v16 = vadd.f32 %v1711_v5, %v1637_v12  ;;  %v1885_v23 = vadd.s32 1, %v4483_v45  ;;  %v6069_v5 = vsel %vm2065_vm9, %v2061_v38, 1326507024 }
 0x280   : > { %v6058_v63 = vsub.s32 32, %v2664_v10  ;;  %8520 = vst [vmem:[#allocation5_spill] sm:$0xff] %v6069_v5  ;;  %v2676_v51 = vshll.u32 %v8461_v31, %v2664_v10  ;;  %v2679_v35 = vshll.u32 %v8489_v2, %v2664_v10  ;;  %v2670_v11 = vshll.u32 %v8459_v62, %v2664_v10 }
 0x281   : > { %8510 = vst [vmem:[#allocation22_spill] sm:$0xff] %v6000_v16  ;;  %v2188_v59 = vand.u32 2139095040, %v6000_v16  ;;  %vm1886_vm5 = vcmp.gt.s32.totalorder %v1885_v23, 0  ;;  %vm2685_vm2 = vcmp.lt.s32.totalorder %v6091_v7, 4  ;;  %vm2682_vm7 = vcmp.lt.s32.totalorder %v6091_v7, 1 }
 0x282   : > { %v1887_v36 = vsel %vm1886_vm5, %v1885_v23, 0  ;;  %v2677_v56 = vshrl.u32 %v8489_v2, %v6058_v63  ;;  %vm2684_vm4 = vcmp.lt.s32.totalorder %v6091_v7, 3  ;;  %vm2683_vm6 = vcmp.lt.s32.totalorder %v6091_v7, 2 }
 0x283   : > { %v2189_v57 = vshrl.u32 %v2188_v59, 23  ;;  %v6077_v59 = vshrl.u32 %v2352_v33, 5  ;;  %v6082_v27 = vshrl.u32 %v1887_v36, 5 }
 0x284   : > { %v2678_v15 = vor.u32 %v2677_v56, %v2676_v51 }
 0x285   : > { %v4489_v12 = vadd.s32 4294967169, %v2189_v57  ;;  %8521 = vst [vmem:[#allocation9_spill] sm:$0xff] %v6082_v27  ;;  %v8331_v57 = vand.u32 2147483647, %v5994_v32  ;;  %vm2375_vm1 = vcmp.lt.s32.totalorder %v6077_v59, 4 }
 0x286   : > { %v1714_v0 = vpop.f32.mrf.mxu3  ;;  %v2691_v55 = vsel %vm2685_vm2, %v2678_v15, 920167782 }
 0x287   : > { %v6020_v8 = vadd.f32 %v1714_v0, %v1642_v30  ;;  %v6046_v30 = vsel %vm1755_vm13, %v6031_v26, 920167782  ;;  %v2195_v3 = vadd.s32 1, %v4489_v12  ;;  %v6086_v0 = vand.u32 31, %v1887_v36 }
 0x288   : > { %8517 = vst [vmem:[#allocation19_spill] sm:$0xff] %v6046_v30  ;;  %v2668_v12 = vshrl.u32 %v8459_v62, %v6058_v63  ;;  %v2657_v22 = vand.u32 8388607, %v8331_v57 }
 0x289   : > { %v2498_v21 = vand.u32 2139095040, %v6020_v8  ;;  %vm2196_vm14 = vcmp.gt.s32.totalorder %v2195_v3, 0  ;;  %8522 = vst [vmem:[#allocation10_spill] sm:$0xff] %v6086_v0 }
 0x28a   : > { %v2197_v46 = vsel %vm2196_vm14, %v2195_v3, 0  ;;  %v2673_v3 = vshll.u32 %v8460_v41, %v2664_v10  ;;  %v2658_v56 = vor.u32 8388608, %v2657_v22 }
 0x28b   : > { %v2499_v25 = vshrl.u32 %v2498_v21, 23  ;;  %v2667_v21 = vshll.u32 %v8458_v49, %v2664_v10  ;;  %v6113_v10 = vsub.s32 32, %v6086_v0 }
 0x28d   : > { %v4495_v61 = vadd.s32 4294967169, %v2499_v25  ;;  %v2671_v25 = vshrl.u32 %v8460_v41, %v6058_v63  ;;  %v2669_v18 = vor.u32 %v2668_v12, %v2667_v21  ;;  %8524 = vst [vmem:[#allocation20_spill] sm:$0xff] %v6113_v10 }
 0x28e   : > { %v1717_v17 = vpop.f32.mrf.mxu3 }
 0x28f   : > { %v6065_v48 = vadd.f32 %v1717_v17, %v5982_v53  ;;  %v2680_v53 = vshrl.u32 %v8466_v44, %v6058_v63  ;;  %v2505_v45 = vadd.s32 1, %v4495_v61  ;;  %v2674_v17 = vshrl.u32 %v8461_v31, %v6058_v63 }
 0x290   : > { %v6104_v61 = vand.u32 31, %v2197_v46  ;;  %v2672_v36 = vor.u32 %v2671_v25, %v2670_v11 }
 0x291   : > { %v2808_v29 = vand.u32 2139095040, %v6065_v48  ;;  %v2681_v23 = vor.u32 %v2680_v53, %v2679_v35  ;;  %vm2506_vm15 = vcmp.gt.s32.totalorder %v2505_v45, 0  ;;  %v2675_v54 = vor.u32 %v2674_v17, %v2673_v3 }
 0x292   : > { %8523 = vst [vmem:[#allocation12_spill] sm:$0xff] %v6104_v61  ;;  %v2507_v40 = vsel %vm2506_vm15, %v2505_v45, 0  ;;  %v6120_v53 = vsel %vm2375_vm1, %v6088_v24, 920167782  ;;  %v2690_v51 = vsel %vm2682_vm7, %v2669_v18, %v2672_v36  ;;  %v6145_v12 = vshll.u32 %v8461_v31, %v6104_v61 }
 0x293   : > { %v2809_v33 = vshrl.u32 %v2808_v29, 23  ;;  %v2695_v39 = vsel %vm2685_vm2, %v2681_v23, 1326507024  ;;  %v6124_v29 = vsel %vm2375_vm1, %v2371_v43, 1326507024  ;;  %v2692_v45 = vsel %vm2684_vm4, %v2675_v54, %v2691_v55 }
 0x294   : > { %v2696_v23 = vsel %vm2684_vm4, %v2678_v15, %v2695_v39  ;;  %v6138_v43 = vsub.s32 32, %v6104_v61  ;;  %v6140_v21 = vand.u32 31, %v2507_v40  ;;  %8526 = vst [vmem:[#allocation25_spill] sm:$0xff] %v6145_v12  ;;  %v2693_v22 = vsel %vm2683_vm6, %v2690_v51, %v2692_v45 }
 0x295   : > { %v4501_v9 = vadd.s32 4294967169, %v2809_v33  ;;  %v2694_v33 = vsel %vm2682_vm7, %v2672_v36, %v2675_v54  ;;  %v6151_v15 = vshll.u32 %v2658_v56, 8  ;;  %v2687_v17 = vsel %vm2685_vm2, %v2675_v54, 2102212464 }
 0x296   : > { %v2697_v11 = vsel %vm2683_vm6, %v2694_v33, %v2696_v23  ;;  %v2724_v51 = vshrl.u32 %v2693_v22, 16  ;;  %v6163_v45 = vshrl.u32 %v2507_v40, 5  ;;  %v6166_v56 = vsub.s32 32, %v6140_v21 }
 0x297   : > { %v2815_v38 = vadd.s32 1, %v4501_v9  ;;  %v6135_v9 = vshrl.u32 %v2197_v46, 5  ;;  %v6155_v46 = vshll.u32 %v8489_v2, %v6104_v61  ;;  %v2702_v3 = vshrl.u32 %v2697_v11, 16 }
 0x298   : > { %v2699_v55 = vand.u32 65535, %v6151_v15  ;;  %v2700_v39 = vshrl.u32 %v6151_v15, 16  ;;  %v2666_v33 = vshrl.u32 %v8458_v49, %v6058_v63  ;;  %v2723_v23 = vand.u32 65535, %v2693_v22 }
 0x299   : > { %vm2816_vm3 = vcmp.gt.s32.totalorder %v2815_v38, 0  ;;  %8525 = vst [vmem:[#allocation6_spill] sm:$0xff] %v6135_v9  ;;  %v6176_v54 = vshll.u32 %v8489_v2, %v6140_v21  ;;  %v2688_v30 = vsel %vm2684_vm4, %v2672_v36, %v2687_v17  ;;  %v8352_v17 = vand.u32 2147483647, %v6065_v48 }
 0x29a   : > { %v2817_v35 = vsel %vm2816_vm3, %v2815_v38, 0  ;;  %8527 = vst [vmem:[#allocation26_spill] sm:$0xff] %v6155_v46  ;;  %v2701_v38 = vand.u32 65535, %v2697_v11  ;;  %v6172_v11 = vshll.u32 %v8461_v31, %v6140_v21  ;;  %v2704_v57 = vmul.u32 %v2702_v3, %v2699_v55 }
 0x29b   : > { %v6157_v25 = vand.u32 31, %v2817_v35  ;;  %v6178_v27 = vshrl.u32 %v2817_v35, 5  ;;  %v2686_v40 = vsel %vm2682_vm7, %v2666_v33, %v2669_v18  ;;  %v2726_v63 = vmul.u32 %v2724_v51, %v2699_v55 }
 0x29c   : > { %v2705_v13 = vmul.u32 %v2701_v38, %v2700_v39  ;;  %v2703_v47 = vmul.u32 %v2701_v38, %v2699_v55  ;;  %v2707_v52 = vshll.u32 %v2704_v57, 16  ;;  %v2706_v37 = vmul.u32 %v2702_v3, %v2700_v39 }
 0x29d   : > { %v6185_v22 = vsub.s32 32, %v6157_v25  ;;  %v2831_v26 = vshll.u32 %v8461_v31, %v6157_v25  ;;  %v2725_v50 = vmul.u32 %v2723_v23, %v2699_v55  ;;  %v2727_v1 = vmul.u32 %v2723_v23, %v2700_v39 }
 0x29e   : > { %v2729_v35 = vshll.u32 %v2726_v63, 16  ;;  %v2709_v0 = vshll.u32 %v2705_v13, 16  ;;  %vm2711_vm10 = vc.u32 %v2703_v47, %v2707_v52  ;;  %v2713_v10 = vadd.s32 %v2707_v52, %v2703_v47 }
 0x29f   : > { %v2728_v18 = vmul.u32 %v2724_v51, %v2700_v39  ;;  %v2712_v33 = vsel %vm2711_vm10, 1, %v8457_v34  ;;  %v2731_v36 = vshll.u32 %v2727_v1, 16  ;;  %v2832_v3 = vshrl.u32 %v8489_v2, %v6185_v22 }
 0x2a0   : > { %vm2733_vm8 = vc.u32 %v2725_v50, %v2729_v35  ;;  %v2714_v61 = vadd.s32 %v2712_v33, %v2706_v37  ;;  %vm2715_vm11 = vc.u32 %v2713_v10, %v2709_v0  ;;  %v2735_v38 = vadd.s32 %v2729_v35, %v2725_v50 }
 0x2a1   : > { %v2734_v16 = vsel %vm2733_vm8, 1, %v8457_v34  ;;  %v2834_v55 = vshll.u32 %v8489_v2, %v6157_v25  ;;  %v2716_v52 = vsel %vm2715_vm11, 1, %v8457_v34  ;;  %v2835_v39 = vshrl.u32 %v8466_v44, %v6185_v22 }
 0x2a2   : > { %v2736_v47 = vadd.s32 %v2734_v16, %v2728_v18  ;;  %v2708_v51 = vshrl.u32 %v2704_v57, 16  ;;  %v2718_v23 = vadd.s32 %v2716_v52, %v2714_v61  ;;  %vm2737_vm12 = vc.u32 %v2735_v38, %v2731_v36 }
 0x2a3   : > { %v2689_v37 = vsel %vm2683_vm6, %v2686_v40, %v2688_v30  ;;  %v2738_v50 = vsel %vm2737_vm12, 1, %v8457_v34  ;;  %v2812_v0 = vand.u32 8388607, %v8352_v17  ;;  %v8353_v10 = vand.u32 2147483647, %v5987_v4 }
 0x2a4   : > { %v2710_v35 = vshrl.u32 %v2705_v13, 16  ;;  %v2719_v33 = vadd.s32 %v2718_v23, %v2708_v51  ;;  %v2730_v60 = vshrl.u32 %v2726_v63, 16  ;;  %v2740_v16 = vadd.s32 %v2738_v50, %v2736_v47 }
 0x2a5   : > { %v6207_v18 = vshrl.u32 %v8489_v2, %v6166_v56  ;;  %v6211_v57 = vshrl.u32 %v8466_v44, %v6166_v56  ;;  %v2833_v30 = vor.u32 %v2832_v3, %v2831_v26  ;;  %vm2840_vm5 = vcmp.lt.s32.totalorder %v6178_v27, 4 }
 0x2a6   : > { %v2836_v7 = vor.u32 %v2835_v39, %v2834_v55  ;;  %v2720_v61 = vadd.s32 %v2719_v33, %v2710_v35  ;;  %v2732_v40 = vshrl.u32 %v2727_v1, 16  ;;  %v2741_v52 = vadd.s32 %v2740_v16, %v2730_v60 }
 0x2a7   : > { %v2739_v17 = vadd.s32 %v2735_v38, %v2731_v36  ;;  %v2743_v13 = vmul.u32 %v6151_v15, %v2689_v37  ;;  %v2813_v63 = vor.u32 8388608, %v2812_v0  ;;  %v6217_v47 = vand.u32 8388607, %v8353_v10 }
 0x2a8   : > { %v2742_v51 = vadd.s32 %v2741_v52, %v2732_v40  ;;  %v2822_v23 = vshll.u32 %v8458_v49, %v6157_v25  ;;  %v2825_v26 = vshll.u32 %v8459_v62, %v6157_v25  ;;  %v2828_v3 = vshll.u32 %v8460_v41, %v6157_v25 }
 0x2a9   : > { %vm2745_vm14 = vc.u32 %v2720_v61, %v2739_v17  ;;  %v2823_v1 = vshrl.u32 %v8459_v62, %v6185_v22  ;;  %v2826_v60 = vshrl.u32 %v8460_v41, %v6185_v22  ;;  %v2829_v15 = vshrl.u32 %v8461_v31, %v6185_v22 }
 0x2aa   : > { %v2846_v36 = vsel %vm2840_vm5, %v2833_v30, 920167782  ;;  %v2850_v38 = vsel %vm2840_vm5, %v2836_v7, 1326507024  ;;  %v2746_v55 = vadd.s32 1, %v2742_v51  ;;  %v2357_v25 = vshll.u32 %v8458_v49, %v6026_v6 }
 0x2ab   : > { %v2824_v39 = vor.u32 %v2823_v1, %v2822_v23  ;;  %v2827_v37 = vor.u32 %v2826_v60, %v2825_v26  ;;  %v2830_v50 = vor.u32 %v2829_v15, %v2828_v3  ;;  %v6237_v0 = vshll.u32 %v2813_v63, 8 }
 0x2ac   : > { %v2747_v35 = vsel %vm2745_vm14, %v2746_v55, %v2742_v51  ;;  %vm2837_vm15 = vcmp.lt.s32.totalorder %v6178_v27, 1  ;;  %v2358_v33 = vshrl.u32 %v8459_v62, %v6040_v42  ;;  %v2360_v16 = vshll.u32 %v8459_v62, %v6026_v6 }
 0x2ad   : > { %v2748_v40 = vadd.s32 %v2747_v35, %v2743_v13  ;;  %vm2839_vm2 = vcmp.lt.s32.totalorder %v6178_v27, 3  ;;  %v2845_v7 = vsel %vm2837_vm15, %v2824_v39, %v2827_v37  ;;  %vm2838_vm3 = vcmp.lt.s32.totalorder %v6178_v27, 2 }
 0x2ae   : > { %v2847_v63 = vsel %vm2839_vm2, %v2830_v50, %v2846_v36  ;;  %v2849_v51 = vsel %vm2837_vm15, %v2827_v37, %v2830_v50  ;;  %v2851_v23 = vsel %vm2839_vm2, %v2833_v30, %v2850_v38  ;;  %v2854_v1 = vand.u32 65535, %v6237_v0 }
 0x2af   : > { %v2749_v26 = vadd.s32 536870912, %v2748_v40  ;;  %v2848_v13 = vsel %vm2838_vm3, %v2845_v7, %v2847_v63  ;;  %v2852_v3 = vsel %vm2838_vm3, %v2849_v51, %v2851_v23  ;;  %v2855_v60 = vshrl.u32 %v6237_v0, 16 }
 0x2b0   : > { %v2856_v15 = vand.u32 65535, %v2852_v3  ;;  %v2857_v55 = vshrl.u32 %v2852_v3, 16  ;;  %v2879_v36 = vshrl.u32 %v2848_v13, 16  ;;  %v6261_v35 = vadd.s32 %v2739_v17, %v2720_v61 }
 0x2b1   : > { %v6263_v10 = vshrl.u32 %v2749_v26, 30  ;;  %v2821_v30 = vshrl.u32 %v8458_v49, %v6185_v22  ;;  %v2878_v38 = vand.u32 65535, %v2848_v13  ;;  %v2842_v7 = vsel %vm2840_vm5, %v2830_v50, 2102212464 }
 0x2b2   : > { %v2859_v63 = vmul.u32 %v2857_v55, %v2854_v1  ;;  %v2860_v51 = vmul.u32 %v2856_v15, %v2855_v60  ;;  %v6269_v23 = vor.u32 %v2358_v33, %v2357_v25  ;;  %v2881_v5 = vmul.u32 %v2879_v36, %v2854_v1 }
 0x2b3   : > { %v2751_v52 = vshll.u32 %v6263_v10, 30  ;;  %v2361_v17 = vshrl.u32 %v8460_v41, %v6040_v42  ;;  %v2363_v61 = vshll.u32 %v8460_v41, %v6026_v6  ;;  %v2841_v22 = vsel %vm2837_vm15, %v2821_v30, %v2824_v39 }
 0x2b4   : > { %v2858_v26 = vmul.u32 %v2856_v15, %v2854_v1  ;;  %v2862_v13 = vshll.u32 %v2859_v63, 16  ;;  %v2364_v50 = vshrl.u32 %v8461_v31, %v6040_v42  ;;  %v2843_v25 = vsel %vm2839_vm2, %v2827_v37, %v2842_v7 }
 0x2b5   : > { %v6280_v3 = vsub.s32 %v2748_v40, %v2751_v52  ;;  %v2861_v33 = vmul.u32 %v2857_v55, %v2855_v60  ;;  %v2882_v19 = vmul.u32 %v2878_v38, %v2855_v60  ;;  %v2864_v28 = vshll.u32 %v2860_v51, 16 }
 0x2b6   : > { %vm2866_vm7 = vc.u32 %v2858_v26, %v2862_v13  ;;  %v2868_v46 = vadd.s32 %v2862_v13, %v2858_v26  ;;  %v2884_v12 = vshll.u32 %v2881_v5, 16  ;;  %v2880_v15 = vmul.u32 %v2878_v38, %v2854_v1 }
 0x2b7   : > { %vm2753_vm4 = vcmp.lt.s32.totalorder %v6280_v3, 0  ;;  %v2754_v6 = vsub.s32 0, %v6280_v3  ;;  %v2867_v39 = vsel %vm2866_vm7, 1, %v8457_v34  ;;  %vm2652_vm6 = vcmp.lt.s32.totalorder %v5994_v32, 0 }
 0x2b8   : > { %v2869_v40 = vadd.s32 %v2867_v39, %v2861_v33  ;;  %vm2870_vm10 = vc.u32 %v2868_v46, %v2864_v28  ;;  %v2883_v52 = vmul.u32 %v2879_v36, %v2855_v60  ;;  %v2886_v30 = vshll.u32 %v2882_v19, 16 }
 0x2b9   : > { %v2755_v37 = vsel %vm2753_vm4, %v2754_v6, %v6280_v3  ;;  %v2871_v55 = vsel %vm2870_vm10, 1, %v8457_v34  ;;  %vm2888_vm8 = vc.u32 %v2880_v15, %v2884_v12  ;;  %v2890_v7 = vadd.s32 %v2884_v12, %v2880_v15 }
 0x2ba   : > { %v2756_v26 = vclz %v2755_v37  ;;  %v2863_v13 = vshrl.u32 %v2859_v63, 16  ;;  %v2873_v9 = vadd.s32 %v2871_v55, %v2869_v40  ;;  %v2889_v20 = vsel %vm2888_vm8, 1, %v8457_v34 }
 0x2bb   : > { %v2891_v58 = vadd.s32 %v2889_v20, %v2883_v52  ;;  %vm2892_vm11 = vc.u32 %v2890_v7, %v2886_v30  ;;  %v6291_v1 = vor.u32 %v2361_v17, %v2360_v16  ;;  %v2365_v38 = vor.u32 %v2364_v50, %v2363_v61 }
 0x2bc   : > { %v4499_v33 = vadd.s32 4294967294, %v2756_v26  ;;  %v2865_v28 = vshrl.u32 %v2860_v51, 16  ;;  %v2874_v46 = vadd.s32 %v2873_v9, %v2863_v13  ;;  %v2893_v60 = vsel %vm2892_vm11, 1, %v8457_v34 }
 0x2bd   : > { %v2774_v36 = vsub.s32 4, %v6263_v10  ;;  %v2844_v12 = vsel %vm2838_vm3, %v2841_v22, %v2843_v25  ;;  %v2885_v6 = vshrl.u32 %v2881_v5, 16  ;;  %v2895_v63 = vadd.s32 %v2893_v60, %v2891_v58 }
 0x2be   : > { %v8528_v39 = vand.u32 2147483647, %v5994_v32  ;;  %vm4500_vm5 = vcmp.lt.s32.totalorder %v4499_v33, 0  ;;  %v6303_v16 = vadd.s32 %v2874_v46, %v2865_v28  ;;  %v2887_v51 = vshrl.u32 %v2882_v19, 16 }
 0x2bf   : > { %vm2372_vm14 = vcmp.lt.s32.totalorder %v6077_v59, 1  ;;  %v2759_v9 = vsel %vm4500_vm5, 0, %v4499_v33  ;;  %v6306_v17 = vadd.s32 %v2890_v7, %v2886_v30  ;;  %v2896_v61 = vadd.s32 %v2895_v63, %v2885_v6 }
 0x2c0   : > { %vm6299_vm12 = vcmp.le.f32.partialorder %v8528_v39, 0.7853982  ;;  %vm2374_vm15 = vcmp.lt.s32.totalorder %v6077_v59, 3  ;;  %v2760_v5 = vsub.s32 32, %v2759_v9  ;;  %v2764_v58 = vsub.s32 4294967266, %v2759_v9 }
 0x2c1   : > { %v2380_v27 = vsel %vm2372_vm14, %v6269_v23, %v6291_v1  ;;  %v2382_v22 = vsel %vm2374_vm15, %v2365_v38, %v6120_v53  ;;  %v2775_v19 = vsel %vm2652_vm6, %v2774_v36, %v6263_v10  ;;  %v2897_v50 = vadd.s32 %v2896_v61, %v2887_v51 }
 0x2c2   : > { %v2898_v25 = vmul.u32 %v6237_v0, %v2844_v12  ;;  %vm2373_vm2 = vcmp.lt.s32.totalorder %v6077_v59, 2  ;;  %v2761_v15 = vshll.u32 %v6280_v3, %v2759_v9  ;;  %v2762_v40 = vshrl.u32 %v6261_v35, %v2760_v5 }
 0x2c3   : > { %v2765_v52 = vadd.s32 127, %v2764_v58  ;;  %vm2900_vm3 = vc.u32 %v6303_v16, %v6306_v17  ;;  %v2901_v30 = vadd.s32 1, %v2897_v50  ;;  %v6327_v53 = vsel %vm2373_vm2, %v2380_v27, %v2382_v22 }
 0x2c4   : > { %v2384_v10 = vsel %vm2372_vm14, %v6291_v1, %v2365_v38  ;;  %v2386_v0 = vsel %vm2374_vm15, %v6088_v24, %v6124_v29  ;;  %v2763_v3 = vor.u32 %v2762_v40, %v2761_v15  ;;  %v8531_v55 = vor.u32 8388608, %v6217_v47 }
 0x2c5   : > { %v2766_v35 = vshll.u32 %v2765_v52, 23  ;;  %v2387_v37 = vsel %vm2373_vm2, %v2384_v10, %v2386_v0  ;;  %v6344_v26 = vor.u32 %v6207_v18, %v6172_v11  ;;  %v2902_v13 = vsel %vm2900_vm3, %v2901_v30, %v2897_v50 }
 0x2c6   : > { %v6340_v7 = vshll.u32 %v8531_v55, 8  ;;  %v2391_v33 = vand.u32 65535, %v2387_v37  ;;  %v2392_v28 = vshrl.u32 %v2387_v37, 16  ;;  %v2903_v60 = vadd.s32 %v2902_v13, %v2898_v25 }
 0x2c7   : > { %v2767_v46 = vor.u32 4788187, %v2766_v35  ;;  %v2356_v24 = vshrl.u32 %v8458_v49, %v6040_v42  ;;  %v2777_v36 = vsel %vm6299_vm12, 0, %v2775_v19  ;;  %v2377_v47 = vsel %vm2375_vm1, %v2365_v38, 2102212464 }
 0x2c8   : > { %v2389_v29 = vand.u32 65535, %v6340_v7  ;;  %v2390_v12 = vshrl.u32 %v6340_v7, 16  ;;  %v2414_v11 = vshrl.u32 %v6327_v53, 16  ;;  %v2770_v6 = vcvt.s32.f32 %v2763_v3 }
 0x2c9   : > { %v2768_v18 = vand.u32 2147483647, %v2767_v46  ;;  %v2904_v63 = vadd.s32 536870912, %v2903_v60  ;;  %v2526_v51 = vor.u32 %v6211_v57, %v6176_v54  ;;  %v2413_v9 = vand.u32 65535, %v6327_v53 }
 0x2ca   : > { %v2394_v39 = vmul.u32 %v2392_v28, %v2389_v29  ;;  %v6357_v42 = vmul.u32 %v2391_v33, %v2390_v12  ;;  %v6360_v61 = vmul.u32 %v2414_v11, %v2389_v29  ;;  %v2393_v38 = vmul.u32 %v2391_v33, %v2389_v29 }
 0x2cb   : > { %v2771_v5 = vmul.f32 %v2770_v6, %v2768_v18  ;;  %v2905_v58 = vshrl.u32 %v2904_v63, 30  ;;  %v2794_v22 = vadd.s32 3, %v2777_v36  ;;  %vm2807_vm1 = vcmp.lt.s32.totalorder %v6065_v48, 0 }
 0x2cc   : > { %v2397_v27 = vshll.u32 %v2394_v39, 16  ;;  %v2376_v19 = vsel %vm2372_vm14, %v2356_v24, %v6269_v23  ;;  %v2378_v50 = vsel %vm2374_vm15, %v6291_v1, %v2377_v47  ;;  %v2396_v25 = vmul.u32 %v2392_v28, %v2390_v12 }
 0x2cd   : > { %v2772_v15 = vxor.u32 2147483648, %v2771_v5  ;;  %v2906_v40 = vshll.u32 %v2905_v58, 30  ;;  %v2399_v52 = vshll.u32 %v6357_v42, 16  ;;  %v2417_v10 = vmul.u32 %v2413_v9, %v2390_v12 }
 0x2ce   : > { %vm2401_vm7 = vc.u32 %v2393_v38, %v2397_v27  ;;  %v2403_v53 = vadd.s32 %v2397_v27, %v2393_v38  ;;  %v2419_v0 = vshll.u32 %v6360_v61, 16  ;;  %v8532_v23 = vand.u32 2147483647, %v6065_v48 }
 0x2cf   : > { %v2402_v30 = vsel %vm2401_vm7, 1, %v8457_v34  ;;  %v2773_v3 = vsel %vm2652_vm6, %v2772_v15, %v2771_v5  ;;  %v6380_v1 = vsub.s32 %v2903_v60, %v2906_v40  ;;  %v6384_v37 = vsel %vm2373_vm2, %v2376_v19, %v2378_v50 }
 0x2d0   : > { %vm6376_vm4 = vcmp.le.f32.partialorder %v8532_v23, 0.7853982  ;;  %v2415_v55 = vmul.u32 %v2413_v9, %v2389_v29  ;;  %v6389_v13 = vsel %vm6299_vm12, %v5994_v32, %v2773_v3  ;;  %v2398_v33 = vshrl.u32 %v2394_v39, 16 }
 0x2d1   : > { %v2404_v28 = vadd.s32 %v2402_v30, %v2396_v25  ;;  %vm2405_vm6 = vc.u32 %v2403_v53, %v2399_v52  ;;  %v2778_v46 = vmul.f32 %v6389_v13, %v6389_v13  ;;  %vm2908_vm10 = vcmp.lt.s32.totalorder %v6380_v1, 0 }
 0x2d2   : > { %v2909_v60 = vsub.s32 0, %v6380_v1  ;;  %v2929_v24 = vsub.s32 4, %v2905_v58  ;;  %v2406_v59 = vsel %vm2405_vm6, 1, %v8457_v34  ;;  %v2421_v36 = vshll.u32 %v2417_v10, 16 }
 0x2d3   : > { %vm2423_vm8 = vc.u32 %v2415_v55, %v2419_v0  ;;  %v2425_v29 = vadd.s32 %v2419_v0, %v2415_v55  ;;  %v2779_v47 = vmul.f32 -0.001358992, %v2778_v46  ;;  %v2786_v20 = vmul.f32 -0.00019511016, %v2778_v46 }
 0x2d4   : > { %v2910_v18 = vsel %vm2908_vm10, %v2909_v60, %v6380_v1  ;;  %v2418_v6 = vmul.u32 %v2414_v11, %v2390_v12  ;;  %v2408_v39 = vadd.s32 %v2406_v59, %v2404_v28  ;;  %v2424_v9 = vsel %vm2423_vm8, 1, %v8457_v34 }
 0x2d5   : > { %v2911_v63 = vclz %v2910_v18  ;;  %vm2427_vm11 = vc.u32 %v2425_v29, %v2421_v36  ;;  %v2780_v5 = vadd.f32 0.041655596, %v2779_v47  ;;  %v2787_v38 = vadd.f32 0.008332121, %v2786_v20 }
 0x2d6   : > { %v6398_v27 = vand.u32 3, %v2794_v22  ;;  %v2930_v19 = vsel %vm2807_vm1, %v2929_v24, %v2905_v58  ;;  %v2899_v50 = vadd.s32 %v6306_v17, %v6303_v16  ;;  %v2409_v15 = vadd.s32 %v2408_v39, %v2398_v33 }
 0x2d7   : > { %v4502_v25 = vadd.s32 4294967294, %v2911_v63  ;;  %v2426_v40 = vadd.s32 %v2424_v9, %v2418_v6  ;;  %v2781_v52 = vmul.f32 %v2780_v5, %v2778_v46  ;;  %v2788_v12 = vmul.f32 %v2787_v38, %v2778_v46 }
 0x2d8   : > { %v2400_v11 = vshrl.u32 %v6357_v42, 16  ;;  %v2428_v30 = vsel %vm2427_vm11, 1, %v8457_v34  ;;  %v2932_v22 = vsel %vm6376_vm4, 0, %v2930_v19  ;;  %v2420_v53 = vshrl.u32 %v6360_v61, 16 }
 0x2d9   : > { %vm4503_vm12 = vcmp.lt.s32.totalorder %v4502_v25, 0  ;;  %v2430_v0 = vadd.s32 %v2428_v30, %v2426_v40  ;;  %v2782_v58 = vadd.f32 -0.4999988, %v2781_v52  ;;  %v2789_v3 = vadd.f32 -0.16666654, %v2788_v12 }
 0x2da   : > { %v2914_v23 = vsel %vm4503_vm12, 0, %v4502_v25  ;;  %v6409_v16 = vadd.s32 %v2409_v15, %v2400_v11  ;;  %v2422_v33 = vshrl.u32 %v2417_v10, 16  ;;  %vm2796_vm5 = vcmp.lt.s32.totalorder %v6398_v27, 2 }
 0x2db   : > { %v2915_v17 = vsub.s32 32, %v2914_v23  ;;  %v2919_v55 = vsub.s32 4294967266, %v2914_v23  ;;  %v2431_v28 = vadd.s32 %v2430_v0, %v2420_v53  ;;  %v2783_v60 = vmul.f32 %v2782_v58, %v2778_v46 }
 0x2dc   : > { %v2790_v42 = vmul.f32 %v2789_v3, %v2778_v46  ;;  %v6412_v24 = vadd.s32 %v2425_v29, %v2421_v36  ;;  %v2495_v59 = vand.u32 2147483647, %v6020_v8  ;;  %vm2530_vm14 = vcmp.lt.s32.totalorder %v6163_v45, 4 }
 0x2dd   : > { %vm2793_vm15 = vweird.f32 %v5994_v32  ;;  %v2916_v61 = vshll.u32 %v6380_v1, %v2914_v23  ;;  %v2917_v47 = vshrl.u32 %v2899_v50, %v2915_v17  ;;  %v2920_v20 = vadd.s32 127, %v2919_v55 }
 0x2de   : > { %v2432_v18 = vadd.s32 %v2431_v28, %v2422_v33  ;;  %v2784_v6 = vadd.f32 1.0, %v2783_v60  ;;  %v2791_v10 = vadd.f32 1.0, %v2790_v42  ;;  %vm2797_vm2 = vcmp.eq.s32.totalorder %v6398_v27, 0 }
 0x2df   : > { %vm2435_vm3 = vc.u32 %v6409_v16, %v6412_v24  ;;  %vm2800_vm7 = vcmp.eq.s32.totalorder %v6398_v27, 2  ;;  %v2918_v46 = vor.u32 %v2917_v47, %v2916_v61  ;;  %v2921_v36 = vshll.u32 %v2920_v20, 23 }
 0x2e0   : > { %v2436_v29 = vadd.s32 1, %v2432_v18  ;;  %v2792_v63 = vmul.f32 %v2791_v10, %v6389_v13  ;;  %v2801_v39 = vxor.u32 2147483648, %v2784_v6  ;;  %v2949_v9 = vadd.s32 3, %v2932_v22 }
 0x2e1   : > { %v2433_v1 = vmul.u32 %v6340_v7, %v6384_v37  ;;  %v2922_v5 = vor.u32 4788187, %v2921_v36  ;;  %v2502_v19 = vand.u32 8388607, %v2495_v59  ;;  %v2513_v50 = vshrl.u32 %v8459_v62, %v6166_v56 }
 0x2e2   : > { %v2437_v38 = vsel %vm2435_vm3, %v2436_v29, %v2432_v18  ;;  %v2798_v25 = vxor.u32 2147483648, %v2792_v63  ;;  %v2925_v15 = vcvt.s32.f32 %v2918_v46  ;;  %v2515_v52 = vshll.u32 %v8459_v62, %v6140_v21 }
 0x2e3   : > { %v2438_v40 = vadd.s32 %v2437_v38, %v2433_v1  ;;  %v2923_v13 = vand.u32 2147483647, %v2922_v5  ;;  %v2516_v12 = vshrl.u32 %v8460_v41, %v6166_v56  ;;  %v2518_v7 = vshll.u32 %v8460_v41, %v6140_v21 }
 0x2e4   : > { %v2519_v37 = vshrl.u32 %v8461_v31, %v6166_v56  ;;  %v2799_v11 = vsel %vm2797_vm2, %v2784_v6, %v2798_v25  ;;  %v2802_v30 = vsel %vm2800_vm7, %v2801_v39, %v2792_v63  ;;  %v2512_v53 = vshll.u32 %v8458_v49, %v6140_v21 }
 0x2e5   : > { %v2439_v22 = vadd.s32 536870912, %v2438_v40  ;;  %v2803_v0 = vsel %vm2796_vm5, %v2799_v11, %v2802_v30  ;;  %v2926_v58 = vmul.f32 %v2925_v15, %v2923_v13  ;;  %v2517_v3 = vor.u32 %v2516_v12, %v2515_v52 }
 0x2e6   : > { %v2520_v23 = vor.u32 %v2519_v37, %v2518_v7  ;;  %v2536_v17 = vsel %vm2530_vm14, %v6344_v26, 920167782  ;;  %v2540_v55 = vsel %vm2530_vm14, %v2526_v51, 1326507024  ;;  %v2804_v33 = vsel %vm2793_vm15, nan, %v2803_v0 }
 0x2e7   : > { %v2440_v21 = vshrl.u32 %v2439_v22, 30  ;;  %3014 = vmatpush.msrb.mxu0 %v2804_v33  ;;  %v2927_v27 = vxor.u32 2147483648, %v2926_v58  ;;  %vm2342_vm6 = vcmp.lt.s32.totalorder %v5987_v4, 0  ;;  %v2503_v28 = vor.u32 8388608, %v2502_v19 }
 0x2e8   : > { %v2514_v60 = vor.u32 %v2513_v50, %v2512_v53  ;;  %v6456_v42 = vand.u32 3, %v2949_v9  ;;  %vm2527_vm10 = vcmp.lt.s32.totalorder %v6163_v45, 1  ;;  %vm2529_vm8 = vcmp.lt.s32.totalorder %v6163_v45, 3 }
 0x2e9   : > { %v2441_v61 = vshll.u32 %v2440_v21, 30  ;;  %v2928_v54 = vsel %vm2807_vm1, %v2927_v27, %v2926_v58  ;;  %vm2528_vm11 = vcmp.lt.s32.totalorder %v6163_v45, 2  ;;  %v2539_v32 = vsel %vm2527_vm10, %v2517_v3, %v2520_v23 }
 0x2ea   : > { %v2541_v57 = vsel %vm2529_vm8, %v6344_v26, %v2540_v55  ;;  %v6471_v51 = vsel %vm6376_vm4, %v6065_v48, %v2928_v54  ;;  %v2532_v20 = vsel %vm2530_vm14, %v2520_v23, 2102212464  ;;  %v2535_v10 = vsel %vm2527_vm10, %v2514_v60, %v2517_v3 }
 0x2eb   : > { %v6473_v47 = vsub.s32 %v2438_v40, %v2441_v61  ;;  %v2542_v18 = vsel %vm2528_vm11, %v2539_v32, %v2541_v57  ;;  %v2933_v6 = vmul.f32 %v6471_v51, %v6471_v51  ;;  %v2537_v26 = vsel %vm2529_vm8, %v2520_v23, %v2536_v17 }
 0x2ec   : > { %v6485_v35 = vshll.u32 %v2503_v28, 8  ;;  %v2464_v36 = vsub.s32 4, %v2440_v21  ;;  %v2547_v29 = vshrl.u32 %v2542_v18, 16  ;;  %v2434_v9 = vadd.s32 %v6412_v24, %v6409_v16 }
 0x2ed   : > { %vm2443_vm1 = vcmp.lt.s32.totalorder %v6473_v47, 0  ;;  %v2444_v46 = vsub.s32 0, %v6473_v47  ;;  %v2934_v63 = vmul.f32 -0.001358992, %v2933_v6  ;;  %v2941_v39 = vmul.f32 -0.00019511016, %v2933_v6 }
 0x2ee   : > { %v2546_v1 = vand.u32 65535, %v2542_v18  ;;  %v2511_v38 = vshrl.u32 %v8458_v49, %v6166_v56  ;;  %v2538_v19 = vsel %vm2528_vm11, %v2535_v10, %v2537_v26  ;;  %v2544_v50 = vand.u32 65535, %v6485_v35 }
 0x2ef   : > { %v2445_v5 = vsel %vm2443_vm1, %v2444_v46, %v6473_v47  ;;  %v2935_v25 = vadd.f32 0.041655596, %v2934_v63  ;;  %v2942_v15 = vadd.f32 0.008332121, %v2941_v39  ;;  %v2545_v52 = vshrl.u32 %v6485_v35, 16 }
 0x2f0   : > { %v2446_v40 = vclz %v2445_v5  ;;  %v6500_v13 = vsel %vm2342_vm6, %v2464_v36, %v2440_v21  ;;  %v6504_v16 = vsel %vm2527_vm10, %v2511_v38, %v2514_v60  ;;  %v6508_v56 = vsel %vm2529_vm8, %v2517_v3, %v2532_v20 }
 0x2f1   : > { %v2549_v24 = vmul.u32 %v2547_v29, %v2544_v50  ;;  %v2936_v12 = vmul.f32 %v2935_v25, %v2933_v6  ;;  %v2943_v7 = vmul.f32 %v2942_v15, %v2933_v6  ;;  %v8535_v37 = vand.u32 2147483647, %v5987_v4 }
 0x2f2   : > { %v4493_v30 = vadd.s32 4294967294, %v2446_v40  ;;  %v2550_v22 = vmul.u32 %v2546_v1, %v2545_v52  ;;  %v2548_v53 = vmul.u32 %v2546_v1, %v2544_v50  ;;  %v2568_v58 = vand.u32 65535, %v2538_v19 }
 0x2f3   : > { %vm6512_vm4 = vcmp.le.f32.partialorder %v8535_v37, 0.7853982  ;;  %v2552_v0 = vshll.u32 %v2549_v24, 16  ;;  %v2569_v23 = vshrl.u32 %v2538_v19, 16  ;;  %v2937_v17 = vadd.f32 -0.4999988, %v2936_v12 }
 0x2f4   : > { %v2944_v55 = vadd.f32 -0.16666654, %v2943_v7  ;;  %vm4494_vm12 = vcmp.lt.s32.totalorder %v4493_v30, 0  ;;  %v2551_v3 = vmul.u32 %v2547_v29, %v2545_v52  ;;  %vm2952_vm5 = vcmp.eq.s32.totalorder %v6456_v42, 0 }
 0x2f5   : > { %vm2955_vm14 = vcmp.eq.s32.totalorder %v6456_v42, 2  ;;  %v2449_v33 = vsel %vm4494_vm12, 0, %v4493_v30  ;;  %v2554_v21 = vshll.u32 %v2550_v22, 16  ;;  %vm2556_vm15 = vc.u32 %v2548_v53, %v2552_v0 }
 0x2f6   : > { %v2558_v27 = vadd.s32 %v2552_v0, %v2548_v53  ;;  %v2938_v28 = vmul.f32 %v2937_v17, %v2933_v6  ;;  %v2945_v60 = vmul.f32 %v2944_v55, %v2933_v6  ;;  %vm2951_vm2 = vcmp.lt.s32.totalorder %v6456_v42, 2 }
 0x2f7   : > { %v2450_v61 = vsub.s32 32, %v2449_v33  ;;  %v2451_v54 = vshll.u32 %v6473_v47, %v2449_v33  ;;  %vm2948_vm3 = vweird.f32 %v6065_v48  ;;  %v2454_v32 = vsub.s32 4294967266, %v2449_v33 }
 0x2f8   : > { %v2557_v57 = vsel %vm2556_vm15, 1, %v8457_v34  ;;  %vm2560_vm7 = vc.u32 %v2558_v27, %v2554_v21  ;;  %v2571_v20 = vmul.u32 %v2569_v23, %v2544_v50  ;;  %v2939_v18 = vadd.f32 1.0, %v2938_v28 }
 0x2f9   : > { %v2946_v10 = vadd.f32 1.0, %v2945_v60  ;;  %v2452_v26 = vshrl.u32 %v2434_v9, %v2450_v61  ;;  %v2559_v46 = vadd.s32 %v2557_v57, %v2551_v3  ;;  %v2455_v36 = vadd.s32 127, %v2454_v32 }
 0x2fa   : > { %v2553_v29 = vshrl.u32 %v2549_v24, 16  ;;  %v2561_v6 = vsel %vm2560_vm7, 1, %v8457_v34  ;;  %v2572_v63 = vmul.u32 %v2568_v58, %v2545_v52  ;;  %v2956_v1 = vxor.u32 2147483648, %v2939_v18 }
 0x2fb   : > { %v2947_v39 = vmul.f32 %v2946_v10, %v6471_v51  ;;  %v2453_v47 = vor.u32 %v2452_v26, %v2451_v54  ;;  %v2563_v5 = vadd.s32 %v2561_v6, %v2559_v46  ;;  %v2456_v38 = vshll.u32 %v2455_v36, 23  ;;  %v8539_v10 = vld [vmem:[#allocation16_spill] sm:$0xff] }
 0x2fc   : > { %v2467_v19 = vsel %vm6512_vm4, 0, %v6500_v13  ;;  %v2570_v25 = vmul.u32 %v2568_v58, %v2544_v50  ;;  %v2574_v15 = vshll.u32 %v2571_v20, 16  ;;  %v2555_v9 = vshrl.u32 %v2550_v22, 16 }
 0x2fd   : > { %v2953_v40 = vxor.u32 2147483648, %v2947_v39  ;;  %v2564_v12 = vadd.s32 %v2563_v5, %v2553_v29  ;;  %v2573_v7 = vmul.u32 %v2569_v23, %v2545_v52  ;;  %v2457_v24 = vor.u32 4788187, %v2456_v38 }
 0x2fe   : > { %v2576_v37 = vshll.u32 %v2572_v63, 16  ;;  %vm2578_vm10 = vc.u32 %v2570_v25, %v2574_v15  ;;  %v2580_v30 = vadd.s32 %v2574_v15, %v2570_v25  ;;  %v2957_v53 = vsel %vm2955_vm14, %v2956_v1, %v2947_v39  ;;  %v8540_v1 = vld [vmem:[#allocation6_spill] sm:$0xff] }
 0x2ff   : > { %v2954_v51 = vsel %vm2952_vm5, %v2939_v18, %v2953_v40  ;;  %v2460_v0 = vcvt.s32.f32 %v2453_v47  ;;  %v2579_v17 = vsel %vm2578_vm10, 1, %v8457_v34  ;;  %v2458_v13 = vand.u32 2147483647, %v2457_v24  ;;  %v8542_v15 = vld [vmem:[#allocation26_spill] sm:$0xff] }
 0x300   : > { %v2958_v50 = vsel %vm2951_vm2, %v2954_v51, %v2957_v53  ;;  %v2581_v22 = vadd.s32 %v2579_v17, %v2573_v7  ;;  %vm2582_vm8 = vc.u32 %v2580_v30, %v2576_v37  ;;  %v2212_v52 = vshrl.u32 %v8489_v2, %v6138_v43 }
 0x301   : > { %v2959_v58 = vsel %vm2948_vm3, nan, %v2958_v50  ;;  %v6538_v23 = vadd.s32 %v2564_v12, %v2555_v9  ;;  %v2583_v55 = vsel %vm2582_vm8, 1, %v8457_v34  ;;  %v2461_v3 = vmul.f32 %v2460_v0, %v2458_v13 }
 0x302   : > { %3043 = vmatpush.msrb.mxu1 %v2959_v58  ;;  %v2575_v33 = vshrl.u32 %v2571_v20, 16  ;;  %v2585_v21 = vadd.s32 %v2583_v55, %v2581_v22  ;;  %v2030_v42 = vand.u32 2147483647, %v5984_v14  ;;  %v2215_v27 = vshrl.u32 %v8466_v44, %v6138_v43  ;;  %v8538_v20 = vld [vmem:[#allocation8_spill] sm:$0xff]  ;;  %v8544_v22 = vld [vmem:[#allocation17_spill] sm:$0xff]  ;;  %v8546_v55 = vld [vmem:[#allocation18_spill] sm:$0xff] }
 0x303   : > { %v2484_v28 = vadd.s32 3, %v2467_v19  ;;  %v2534_v48 = vsel %vm2528_vm11, %v6504_v16, %v6508_v56  ;;  %v2584_v60 = vadd.s32 %v2580_v30, %v2576_v37  ;;  %v2462_v61 = vxor.u32 2147483648, %v2461_v3  ;;  %v8541_v19 = vld [vmem:[#allocation25_spill] sm:$0xff]  ;;  %v8543_v37 = vld [vmem:[#allocation15_spill] sm:$0xff] }
 0x304   : > { %v2577_v54 = vshrl.u32 %v2572_v63, 16  ;;  %v2586_v32 = vadd.s32 %v2585_v21, %v2575_v33  ;;  %v2037_v57 = vand.u32 8388607, %v2030_v42  ;;  %v2048_v18 = vshrl.u32 %v8459_v62, %v8538_v20  ;;  %v8545_v58 = vld [vmem:[#allocation5_spill] sm:$0xff] }
 0x305   : > { %vm2590_vm1 = vc.u32 %v6538_v23, %v2584_v60  ;;  %v2050_v26 = vshll.u32 %v8459_v62, %v8539_v10  ;;  %v2051_v46 = vshrl.u32 %v8460_v41, %v8538_v20  ;;  %v2463_v45 = vsel %vm2342_vm6, %v2462_v61, %v2461_v3 }
 0x306   : > { %v2587_v16 = vadd.s32 %v2586_v32, %v2577_v54  ;;  %v2053_v56 = vshll.u32 %v8460_v41, %v8539_v10  ;;  %v2054_v36 = vshrl.u32 %v8461_v31, %v8538_v20  ;;  %v6566_v29 = vsel %vm6512_vm4, %v5987_v4, %v2463_v45 }
 0x307   : > { %v2038_v6 = vor.u32 8388608, %v2037_v57  ;;  %v2047_v63 = vshll.u32 %v8458_v49, %v8539_v10  ;;  %v6570_v39 = vor.u32 %v2051_v46, %v2050_v26  ;;  %vm2220_vm6 = vcmp.lt.s32.totalorder %v8540_v1, 4 }
 0x308   : > { %v2468_v47 = vmul.f32 %v6566_v29, %v6566_v29  ;;  %v2591_v5 = vadd.s32 1, %v2587_v16  ;;  %v2055_v38 = vor.u32 %v2054_v36, %v2053_v56  ;;  %v6576_v25 = vor.u32 %v2212_v52, %v8541_v19 }
 0x309   : > { %v2216_v11 = vor.u32 %v2215_v27, %v8542_v15  ;;  %v2588_v40 = vmul.u32 %v6485_v35, %v2534_v48  ;;  %v6580_v9 = vor.u32 %v2048_v18, %v2047_v63  ;;  %vm2062_vm11 = vcmp.lt.s32.totalorder %v8543_v37, 1 }
 0x30a   : > { %v2469_v12 = vmul.f32 -0.001358992, %v2468_v47  ;;  %v2476_v7 = vmul.f32 -0.00019511016, %v2468_v47  ;;  %v2592_v24 = vsel %vm2590_vm1, %v2591_v5, %v2587_v16  ;;  %v6585_v30 = vand.u32 3, %v2484_v28 }
 0x30b   : > { %v2593_v51 = vadd.s32 %v2592_v24, %v2588_v40  ;;  %v2074_v53 = vsel %vm2062_vm11, %v6570_v39, %v2055_v38  ;;  %v6590_v0 = vshll.u32 %v2038_v6, 8  ;;  %vm2063_vm4 = vcmp.lt.s32.totalorder %v8543_v37, 2 }
 0x30c   : > { %v2470_v17 = vadd.f32 0.041655596, %v2469_v12  ;;  %v2477_v35 = vadd.f32 0.008332121, %v2476_v7  ;;  %vm2064_vm12 = vcmp.lt.s32.totalorder %v8543_v37, 3  ;;  %v2070_v13 = vsel %vm2062_vm11, %v6580_v9, %v6570_v39 }
 0x30d   : > { %v2594_v50 = vadd.s32 536870912, %v2593_v51  ;;  %v2072_v52 = vsel %vm2064_vm12, %v2055_v38, %v8544_v22  ;;  %v2076_v3 = vsel %vm2064_vm12, %v8546_v55, %v8545_v58  ;;  %v6608_v33 = vsel %vm2220_vm6, %v6576_v25, 920167782 }
 0x30e   : > { %v2471_v21 = vmul.f32 %v2470_v17, %v2468_v47  ;;  %v2478_v27 = vmul.f32 %v2477_v35, %v2468_v47  ;;  %v2077_v28 = vsel %vm2063_vm4, %v2074_v53, %v2076_v3  ;;  %v2079_v61 = vand.u32 65535, %v6590_v0 }
 0x30f   : > { %v6612_v48 = vshrl.u32 %v2594_v50, 30  ;;  %v2081_v54 = vand.u32 65535, %v2077_v28  ;;  %v2082_v32 = vshrl.u32 %v2077_v28, 16  ;;  %v6617_v57 = vsel %vm2220_vm6, %v2216_v11, 1326507024 }
 0x310   : > { %v2472_v18 = vadd.f32 -0.4999988, %v2471_v21  ;;  %v2479_v10 = vadd.f32 -0.16666654, %v2478_v27  ;;  %v2073_v26 = vsel %vm2063_vm4, %v2070_v13, %v2072_v52  ;;  %vm2487_vm5 = vcmp.eq.s32.totalorder %v6585_v30, 0 }
 0x311   : > { %vm2490_vm14 = vcmp.eq.s32.totalorder %v6585_v30, 2  ;;  %v2596_v46 = vshll.u32 %v6612_v48, 30  ;;  %v2080_v45 = vshrl.u32 %v6590_v0, 16  ;;  %v2084_v16 = vmul.u32 %v2082_v32, %v2079_v61 }
 0x312   : > { %v2473_v56 = vmul.f32 %v2472_v18, %v2468_v47  ;;  %v2480_v36 = vmul.f32 %v2479_v10, %v2468_v47  ;;  %vm2486_vm15 = vcmp.lt.s32.totalorder %v6585_v30, 2  ;;  %v2589_v6 = vadd.s32 %v2584_v60, %v6538_v23 }
 0x313   : > { %v2046_v63 = vshrl.u32 %v8458_v49, %v8538_v20  ;;  %vm2483_vm2 = vweird.f32 %v5987_v4  ;;  %v6630_v5 = vsub.s32 %v2593_v51, %v2596_v46  ;;  %v2085_v19 = vmul.u32 %v2081_v54, %v2080_v45 }
 0x314   : > { %v2087_v15 = vshll.u32 %v2084_v16, 16  ;;  %v2104_v11 = vshrl.u32 %v2073_v26, 16  ;;  %v2474_v40 = vadd.f32 1.0, %v2473_v56  ;;  %v2481_v12 = vadd.f32 1.0, %v2480_v36 }
 0x315   : > { %v2083_v7 = vmul.u32 %v2081_v54, %v2079_v61  ;;  %v2103_v24 = vand.u32 65535, %v2073_v26  ;;  %vm2598_vm3 = vcmp.lt.s32.totalorder %v6630_v5, 0  ;;  %v2599_v47 = vsub.s32 0, %v6630_v5 }
 0x316   : > { %v2067_v23 = vsel %vm2065_vm9, %v2055_v38, 2102212464  ;;  %v2086_v60 = vmul.u32 %v2082_v32, %v2080_v45  ;;  %v2482_v20 = vmul.f32 %v2481_v12, %v6566_v29  ;;  %v2491_v53 = vxor.u32 2147483648, %v2474_v40 }
 0x317   : > { %vm2091_vm7 = vc.u32 %v2083_v7, %v2087_v15  ;;  %v2093_v51 = vadd.s32 %v2087_v15, %v2083_v7  ;;  %v2600_v17 = vsel %vm2598_vm3, %v2599_v47, %v6630_v5  ;;  %v2089_v35 = vshll.u32 %v2085_v19, 16 }
 0x318   : > { %v2092_v50 = vsel %vm2091_vm7, 1, %v8457_v34  ;;  %v2106_v13 = vmul.u32 %v2104_v11, %v2079_v61  ;;  %v2488_v22 = vxor.u32 2147483648, %v2482_v20  ;;  %v2601_v52 = vclz %v2600_v17 }
 0x319   : > { %v2094_v58 = vadd.s32 %v2092_v50, %v2086_v60  ;;  %v2107_v55 = vmul.u32 %v2103_v24, %v2080_v45  ;;  %v2066_v38 = vsel %vm2062_vm11, %v2046_v63, %v6580_v9  ;;  %v2068_v29 = vsel %vm2064_vm12, %v6570_v39, %v2067_v23 }
 0x31a   : > { %vm2095_vm9 = vc.u32 %v2093_v51, %v2089_v35  ;;  %v2105_v3 = vmul.u32 %v2103_v24, %v2079_v61  ;;  %v2489_v21 = vsel %vm2487_vm5, %v2474_v40, %v2488_v22  ;;  %v2492_v27 = vsel %vm2490_vm14, %v2491_v53, %v2482_v20 }
 0x31b   : > { %vm2497_vm10 = vcmp.lt.s32.totalorder %v6020_v8, 0  ;;  %v4496_v28 = vadd.s32 4294967294, %v2601_v52  ;;  %v2096_v54 = vsel %vm2095_vm9, 1, %v8457_v34  ;;  %v2493_v9 = vsel %vm2486_vm15, %v2489_v21, %v2492_v27 }
 0x31c   : > { %v2088_v32 = vshrl.u32 %v2084_v16, 16  ;;  %v2098_v18 = vadd.s32 %v2096_v54, %v2094_v58  ;;  %v2109_v10 = vshll.u32 %v2106_v13, 16  ;;  %v2494_v39 = vsel %vm2483_vm2, nan, %v2493_v9 }
 0x31d   : > { %vm4497_vm8 = vcmp.lt.s32.totalorder %v4496_v28, 0  ;;  %v2108_v61 = vmul.u32 %v2104_v11, %v2080_v45  ;;  %v2111_v26 = vshll.u32 %v2107_v55, 16  ;;  %3015 = vmatpush.msrb.mxu0 %v2494_v39  ;;  %v2090_v40 = vshrl.u32 %v2085_v19, 16 }
 0x31e   : > { %v2604_v46 = vsel %vm4497_vm8, 0, %v4496_v28  ;;  %v2099_v56 = vadd.s32 %v2098_v18, %v2088_v32  ;;  %vm2113_vm1 = vc.u32 %v2105_v3, %v2109_v10  ;;  %v2115_v36 = vadd.s32 %v2109_v10, %v2105_v3 }
 0x31f   : > { %v2605_v63 = vsub.s32 32, %v2604_v46  ;;  %v2609_v15 = vsub.s32 4294967266, %v2604_v46  ;;  %v2114_v30 = vsel %vm2113_vm1, 1, %v8457_v34  ;;  %v2606_v16 = vshll.u32 %v6630_v5, %v2604_v46 }
 0x320   : > { %v2619_v12 = vsub.s32 4, %v6612_v48  ;;  %v2116_v7 = vadd.s32 %v2114_v30, %v2108_v61  ;;  %vm2117_vm11 = vc.u32 %v2115_v36, %v2111_v26  ;;  %v6658_v45 = vadd.s32 %v2099_v56, %v2090_v40  ;;  %v8551_v61 = vld [vmem:[#allocation20_spill] sm:$0xff] }
 0x321   : > { %v2607_v4 = vshrl.u32 %v2589_v6, %v2605_v63  ;;  %v2610_v24 = vadd.s32 127, %v2609_v15  ;;  %v2118_v11 = vsel %vm2117_vm11, 1, %v8457_v34  ;;  %vm6663_vm12 = vcmp.le.f32.partialorder %v2495_v59, 0.7853982  ;;  %v8549_v6 = vld [vmem:[#allocation22_spill] sm:$0xff] }
 0x322   : > { %v2069_v19 = vsel %vm2063_vm4, %v2066_v38, %v2068_v29  ;;  %v2110_v5 = vshrl.u32 %v2106_v13, 16  ;;  %v2120_v23 = vadd.s32 %v2118_v11, %v2116_v7  ;;  %v6669_v53 = vadd.s32 %v2115_v36, %v2111_v26  ;;  %v8550_v13 = vld [vmem:[#allocation12_spill] sm:$0xff] }
 0x323   : > { %v2608_v60 = vor.u32 %v2607_v4, %v2606_v16  ;;  %v2611_v20 = vshll.u32 %v2610_v24, 23  ;;  %v2185_v51 = vand.u32 2147483647, %v8549_v6  ;;  %v2620_v17 = vsel %vm2497_vm10, %v2619_v12, %v6612_v48 }
 0x324   : > { %v2112_v35 = vshrl.u32 %v2107_v55, 16  ;;  %v2121_v59 = vadd.s32 %v2120_v23, %v2110_v5  ;;  %v2203_v50 = vshrl.u32 %v8459_v62, %v6138_v43  ;;  %vm2125_vm4 = vc.u32 %v6658_v45, %v6669_v53 }
 0x325   : > { %v2612_v22 = vor.u32 4788187, %v2611_v20  ;;  %v2192_v37 = vand.u32 8388607, %v2185_v51  ;;  %v2202_v52 = vshll.u32 %v8458_v49, %v8550_v13  ;;  %v2615_v58 = vcvt.s32.f32 %v2608_v60 }
 0x326   : > { %v2122_v38 = vadd.s32 %v2121_v59, %v2112_v35  ;;  %v2205_v48 = vshll.u32 %v8459_v62, %v8550_v13  ;;  %v2206_v55 = vshrl.u32 %v8460_v41, %v6138_v43  ;;  %v2208_v21 = vshll.u32 %v8460_v41, %v8550_v13 }
 0x327   : > { %v2613_v29 = vand.u32 2147483647, %v2612_v22  ;;  %v2193_v3 = vor.u32 8388608, %v2192_v37  ;;  %v2209_v27 = vshrl.u32 %v8461_v31, %v6138_v43  ;;  %v2622_v28 = vsel %vm6663_vm12, 0, %v2620_v17 }
 0x328   : > { %v2126_v54 = vadd.s32 1, %v2122_v38  ;;  %v6693_v9 = vor.u32 %v2203_v50, %v2202_v52  ;;  %v6695_v32 = vor.u32 %v2206_v55, %v2205_v48  ;;  %v2123_v10 = vmul.u32 %v6590_v0, %v2069_v19  ;;  %v8552_v19 = vld [vmem:[#allocation10_spill] sm:$0xff] }
 0x329   : > { %v2616_v18 = vmul.f32 %v2615_v58, %v2613_v29  ;;  %v2210_v39 = vor.u32 %v2209_v27, %v2208_v21  ;;  %vm2219_vm5 = vcmp.lt.s32.totalorder %v8540_v1, 3  ;;  %v1902_v26 = vshrl.u32 %v8489_v2, %v8551_v61 }
 0x32a   : > { %v2127_v46 = vsel %vm2125_vm4, %v2126_v54, %v2122_v38  ;;  %v2231_v56 = vsel %vm2219_vm5, %v6576_v25, %v6617_v57  ;;  %v6708_v36 = vshll.u32 %v2193_v3, 8  ;;  %v2639_v15 = vadd.s32 3, %v2622_v28 }
 0x32b   : > { %v2617_v63 = vxor.u32 2147483648, %v2616_v18  ;;  %v2128_v0 = vadd.s32 %v2127_v46, %v2123_v10  ;;  %vm2217_vm14 = vcmp.lt.s32.totalorder %v8540_v1, 1  ;;  %vm2218_vm15 = vcmp.lt.s32.totalorder %v8540_v1, 2 }
 0x32c   : > { %v2225_v40 = vsel %vm2217_vm14, %v6693_v9, %v6695_v32  ;;  %v2227_v30 = vsel %vm2219_vm5, %v2210_v39, %v6608_v33  ;;  %v2229_v25 = vsel %vm2217_vm14, %v6695_v32, %v2210_v39  ;;  %v6727_v7 = vand.u32 65535, %v6708_v36 }
 0x32d   : > { %v2618_v57 = vsel %vm2497_vm10, %v2617_v63, %v2616_v18  ;;  %v2129_v16 = vadd.s32 536870912, %v2128_v0  ;;  %v2232_v12 = vsel %vm2218_vm15, %v2229_v25, %v2231_v56  ;;  %v6735_v33 = vshrl.u32 %v6708_v36, 16 }
 0x32e   : > { %v6732_v4 = vsel %vm6663_vm12, %v6020_v8, %v2618_v57  ;;  %v2236_v24 = vand.u32 65535, %v2232_v12  ;;  %v2237_v11 = vshrl.u32 %v2232_v12, 16  ;;  %v1901_v5 = vshll.u32 %v8461_v31, %v8552_v19 }
 0x32f   : > { %v2623_v23 = vmul.f32 %v6732_v4, %v6732_v4  ;;  %v6741_v60 = vshrl.u32 %v2129_v16, 30  ;;  %v6745_v20 = vsel %vm2218_vm15, %v2225_v40, %v2227_v30  ;;  %v6749_v47 = vshll.u32 %v8489_v2, %v8552_v19 }
 0x330   : > { %v6753_v17 = vshrl.u32 %v8466_v44, %v8551_v61  ;;  %v2239_v35 = vmul.u32 %v2237_v11, %v6727_v7  ;;  %v6757_v59 = vmul.u32 %v2236_v24, %v6735_v33  ;;  %v6759_v50 = vor.u32 %v1902_v26, %v1901_v5 }
 0x331   : > { %v2624_v22 = vmul.f32 -0.001358992, %v2623_v23  ;;  %v2631_v37 = vmul.f32 -0.00019511016, %v2623_v23  ;;  %v2131_v13 = vshll.u32 %v6741_v60, 30  ;;  %v6762_v52 = vand.u32 3, %v2639_v15 }
 0x332   : > { %v2238_v58 = vmul.u32 %v2236_v24, %v6727_v7  ;;  %v2242_v38 = vshll.u32 %v2239_v35, 16  ;;  %v2259_v48 = vshrl.u32 %v6745_v20, 16  ;;  %v2222_v21 = vsel %vm2220_vm6, %v2210_v39, 2102212464 }
 0x333   : > { %v2625_v55 = vadd.f32 0.041655596, %v2624_v22  ;;  %v2632_v29 = vadd.f32 0.008332121, %v2631_v37  ;;  %v6766_v3 = vsub.s32 %v2128_v0, %v2131_v13  ;;  %v2241_v27 = vmul.u32 %v2237_v11, %v6735_v33 }
 0x334   : > { %v2244_v28 = vshll.u32 %v6757_v59, 16  ;;  %vm2246_vm2 = vc.u32 %v2238_v58, %v2242_v38  ;;  %v2248_v54 = vadd.s32 %v2242_v38, %v2238_v58  ;;  %v2258_v56 = vand.u32 65535, %v6745_v20 }
 0x335   : > { %v2626_v18 = vmul.f32 %v2625_v55, %v2623_v23  ;;  %v2633_v10 = vmul.f32 %v2632_v29, %v2623_v23  ;;  %vm2133_vm3 = vcmp.lt.s32.totalorder %v6766_v3, 0  ;;  %v2134_v26 = vsub.s32 0, %v6766_v3 }
 0x336   : > { %v2247_v46 = vsel %vm2246_vm2, 1, %v8457_v34  ;;  %vm2250_vm7 = vc.u32 %v2248_v54, %v2244_v28  ;;  %v6777_v63 = vmul.u32 %v2259_v48, %v6727_v7  ;;  %vm2642_vm6 = vcmp.eq.s32.totalorder %v6762_v52, 0 }
 0x337   : > { %v2627_v39 = vadd.f32 -0.4999988, %v2626_v18  ;;  %v2634_v15 = vadd.f32 -0.16666654, %v2633_v10  ;;  %v2135_v0 = vsel %vm2133_vm3, %v2134_v26, %v6766_v3  ;;  %v2249_v40 = vadd.s32 %v2247_v46, %v2241_v27 }
 0x338   : > { %vm2645_vm9 = vcmp.eq.s32.totalorder %v6762_v52, 2  ;;  %v2136_v30 = vclz %v2135_v0  ;;  %v2201_v25 = vshrl.u32 %v8458_v49, %v6138_v43  ;;  %v2251_v57 = vsel %vm2250_vm7, 1, %v8457_v34 }
 0x339   : > { %v2628_v16 = vmul.f32 %v2627_v39, %v2623_v23  ;;  %v2635_v12 = vmul.f32 %v2634_v15, %v2623_v23  ;;  %vm2641_vm10 = vcmp.lt.s32.totalorder %v6762_v52, 2  ;;  %v2124_v24 = vadd.s32 %v6669_v53, %v6658_v45 }
 0x33a   : > { %v2253_v11 = vadd.s32 %v2251_v57, %v2249_v40  ;;  %vm2638_vm8 = vweird.f32 %v6020_v8  ;;  %v4487_v5 = vadd.s32 4294967294, %v2136_v30  ;;  %v2221_v20 = vsel %vm2217_vm14, %v2201_v25, %v6693_v9 }
 0x33b   : > { %v2223_v43 = vsel %vm2219_vm5, %v6695_v32, %v2222_v21  ;;  %v2243_v22 = vshrl.u32 %v2239_v35, 16  ;;  %v2629_v37 = vadd.f32 1.0, %v2628_v16  ;;  %v2636_v23 = vadd.f32 1.0, %v2635_v12  ;;  %v8555_v12 = vld [vmem:[#allocation23_spill] sm:$0xff] }
 0x33c   : > { %v2262_v13 = vmul.u32 %v2258_v56, %v6735_v33  ;;  %v2264_v58 = vshll.u32 %v6777_v63, 16  ;;  %vm2032_vm1 = vcmp.lt.s32.totalorder %v5984_v14, 0  ;;  %vm4488_vm11 = vcmp.lt.s32.totalorder %v4487_v5, 0 }
 0x33d   : > { %v2154_v45 = vsub.s32 4, %v6741_v60  ;;  %v2245_v53 = vshrl.u32 %v6757_v59, 16  ;;  %v2260_v9 = vmul.u32 %v2258_v56, %v6727_v7  ;;  %v2637_v38 = vmul.f32 %v2636_v23, %v6732_v4 }
 0x33e   : > { %v2646_v55 = vxor.u32 2147483648, %v2629_v37  ;;  %v2139_v32 = vsel %vm4488_vm11, 0, %v4487_v5  ;;  %v2254_v35 = vadd.s32 %v2253_v11, %v2243_v22  ;;  %v2263_v27 = vmul.u32 %v2259_v48, %v6735_v33  ;;  %v8556_v5 = vld [vmem:[#allocation24_spill] sm:$0xff] }
 0x33f   : > { %v2140_v29 = vsub.s32 32, %v2139_v32  ;;  %v2144_v21 = vsub.s32 4294967266, %v2139_v32  ;;  %vm2268_vm12 = vc.u32 %v2260_v9, %v2264_v58  ;;  %v2643_v28 = vxor.u32 2147483648, %v2637_v38 }
 0x340   : > { %v2266_v54 = vshll.u32 %v2262_v13, 16  ;;  %v2269_v18 = vsel %vm2268_vm12, 1, %v8457_v34  ;;  %v2270_v10 = vadd.s32 %v2264_v58, %v2260_v9  ;;  %v2141_v26 = vshll.u32 %v6766_v3, %v2139_v32 }
 0x341   : > { %v2142_v59 = vshrl.u32 %v2124_v24, %v2140_v29  ;;  %v2145_v46 = vadd.s32 127, %v2144_v21  ;;  %v2271_v7 = vadd.s32 %v2269_v18, %v2263_v27  ;;  %v2644_v4 = vsel %vm2642_vm6, %v2629_v37, %v2643_v28  ;;  %v8558_v28 = vld [vmem:[#allocation21_spill] sm:$0xff] }
 0x342   : > { %v2647_v56 = vsel %vm2645_vm9, %v2646_v55, %v2637_v38  ;;  %v6809_v39 = vadd.s32 %v2254_v35, %v2245_v53  ;;  %vm2272_vm4 = vc.u32 %v2270_v10, %v2266_v54  ;;  %vm6818_vm5 = vcmp.le.f32.partialorder %v2030_v42, 0.7853982 }
 0x343   : > { %v2648_v33 = vsel %vm2641_vm10, %v2644_v4, %v2647_v56  ;;  %v2143_v48 = vor.u32 %v2142_v59, %v2141_v26  ;;  %v2146_v15 = vshll.u32 %v2145_v46, 23  ;;  %v2273_v0 = vsel %vm2272_vm4, 1, %v8457_v34  ;;  %v8560_v26 = vld [vmem:[#allocation11_spill] sm:$0xff] }
 0x344   : > { %v2649_v3 = vsel %vm2638_vm8, nan, %v2648_v33  ;;  %v2265_v30 = vshrl.u32 %v6777_v63, 16  ;;  %v2275_v25 = vadd.s32 %v2273_v0, %v2271_v7  ;;  %v2224_v52 = vsel %vm2218_vm15, %v2221_v20, %v2223_v43  ;;  %v8557_v43 = vld [vmem:[#allocation14_spill] sm:$0xff] }
 0x345   : > { %3044 = vmatpush.msrb.mxu1 %v2649_v3  ;;  %v2147_v57 = vor.u32 4788187, %v2146_v15  ;;  %v6825_v16 = vadd.s32 %v2270_v10, %v2266_v54  ;;  %v1720_v24 = vand.u32 2147483647, %v8555_v12  ;;  %v2155_v8 = vsel %vm2032_vm1, %v2154_v45, %v6741_v60  ;;  %v8559_v10 = vld [vmem:[#allocation13_spill] sm:$0xff]  ;;  %v8561_v15 = vld [vmem:[#allocation19_spill] sm:$0xff] }
 0x346   : > { %v2267_v42 = vshrl.u32 %v2262_v13, 16  ;;  %v2276_v11 = vadd.s32 %v2275_v25, %v2265_v30  ;;  %v1738_v22 = vshrl.u32 %v8459_v62, %v8556_v5  ;;  %v2150_v37 = vcvt.s32.f32 %v2143_v48 }
 0x347   : > { %v2148_v63 = vand.u32 2147483647, %v2147_v57  ;;  %vm2280_vm14 = vc.u32 %v6809_v39, %v6825_v16  ;;  %v1727_v1 = vand.u32 8388607, %v1720_v24  ;;  %v1737_v23 = vshll.u32 %v8458_v49, %v8557_v43 }
 0x348   : > { %v2277_v20 = vadd.s32 %v2276_v11, %v2267_v42  ;;  %v1740_v60 = vshll.u32 %v8459_v62, %v8557_v43  ;;  %v1741_v13 = vshrl.u32 %v8460_v41, %v8556_v5  ;;  %v1743_v53 = vshll.u32 %v8460_v41, %v8557_v43 }
 0x349   : > { %v2151_v58 = vmul.f32 %v2150_v37, %v2148_v63  ;;  %v1728_v45 = vor.u32 8388608, %v1727_v1  ;;  %v1744_v9 = vshrl.u32 %v8461_v31, %v8556_v5  ;;  %v2157_v38 = vsel %vm6818_vm5, 0, %v2155_v8 }
 0x34a   : > { %v2281_v55 = vadd.s32 1, %v2277_v20  ;;  %v6849_v32 = vor.u32 %v1738_v22, %v1737_v23  ;;  %v6851_v35 = vor.u32 %v1741_v13, %v1740_v60  ;;  %v2278_v21 = vmul.u32 %v6708_v36, %v2224_v52  ;;  %v8562_v52 = vld [vmem:[#allocation9_spill] sm:$0xff] }
 0x34b   : > { %v2152_v29 = vxor.u32 2147483648, %v2151_v58  ;;  %v6854_v27 = vor.u32 %v1744_v9, %v1743_v53  ;;  %vm1754_vm15 = vcmp.lt.s32.totalorder %v8558_v28, 3  ;;  %v1906_v54 = vor.u32 %v6753_v17, %v6749_v47 }
 0x34c   : > { %v2282_v18 = vsel %vm2280_vm14, %v2281_v55, %v2277_v20  ;;  %v1766_v59 = vsel %vm1754_vm15, %v8560_v26, %v8559_v10  ;;  %v6866_v46 = vshll.u32 %v1728_v45, 8  ;;  %v2174_v7 = vadd.s32 3, %v2157_v38 }
 0x34d   : > { %v2153_v36 = vsel %vm2032_vm1, %v2152_v29, %v2151_v58  ;;  %v2283_v4 = vadd.s32 %v2282_v18, %v2278_v21  ;;  %vm1752_vm2 = vcmp.lt.s32.totalorder %v8558_v28, 1  ;;  %vm1753_vm3 = vcmp.lt.s32.totalorder %v8558_v28, 2 }
 0x34e   : > { %v2156_v47 = vsel %vm6818_vm5, %v5984_v14, %v2153_v36  ;;  %v1760_v17 = vsel %vm1752_vm2, %v6849_v32, %v6851_v35  ;;  %v1764_v56 = vsel %vm1752_vm2, %v6851_v35, %v6854_v27  ;;  %v1762_v0 = vsel %vm1754_vm15, %v6854_v27, %v8561_v15 }
 0x34f   : > { %v2158_v33 = vmul.f32 %v2156_v47, %v2156_v47  ;;  %v2284_v48 = vadd.s32 536870912, %v2283_v4  ;;  %v1767_v3 = vsel %vm1753_vm3, %v1764_v56, %v1766_v59  ;;  %v1769_v40 = vand.u32 65535, %v6866_v46 }
 0x350   : > { %v6891_v30 = vshrl.u32 %v6866_v46, 16  ;;  %v1771_v25 = vand.u32 65535, %v1767_v3  ;;  %v1772_v57 = vshrl.u32 %v1767_v3, 16  ;;  %vm1910_vm7 = vcmp.lt.s32.totalorder %v8562_v52, 4 }
 0x351   : > { %v2159_v8 = vmul.f32 -0.001358992, %v2158_v33  ;;  %v2166_v42 = vmul.f32 -0.00019511016, %v2158_v33  ;;  %v6894_v11 = vshrl.u32 %v2284_v48, 30  ;;  %v1763_v23 = vsel %vm1753_vm3, %v1760_v17, %v1762_v0 }
 0x352   : > { %v6899_v22 = vsel %vm1910_vm7, %v6759_v50, 920167782  ;;  %v1774_v63 = vmul.u32 %v1772_v57, %v1769_v40  ;;  %v6902_v37 = vmul.u32 %v1771_v25, %v6891_v30  ;;  %v6909_v60 = vsel %vm1910_vm7, %v1906_v54, 1326507024 }
 0x353   : > { %v2160_v1 = vadd.f32 0.041655596, %v2159_v8  ;;  %v2167_v20 = vadd.f32 0.008332121, %v2166_v42  ;;  %v2286_v43 = vshll.u32 %v6894_v11, 30  ;;  %v2175_v13 = vand.u32 3, %v2174_v7 }
 0x354   : > { %v1773_v58 = vmul.u32 %v1771_v25, %v1769_v40  ;;  %v1777_v45 = vshll.u32 %v1774_v63, 16  ;;  %v1776_v55 = vmul.u32 %v1772_v57, %v6891_v30  ;;  %v1779_v29 = vshll.u32 %v6902_v37, 16 }
 0x355   : > { %v2161_v53 = vmul.f32 %v2160_v1, %v2158_v33  ;;  %v2168_v9 = vmul.f32 %v2167_v20, %v2158_v33  ;;  %v2287_v38 = vsub.s32 %v2283_v4, %v2286_v43  ;;  %v1794_v18 = vshrl.u32 %v1763_v23, 16 }
 0x356   : > { %vm1781_vm6 = vc.u32 %v1773_v58, %v1777_v45  ;;  %v1783_v21 = vadd.s32 %v1777_v45, %v1773_v58  ;;  %vm2177_vm10 = vcmp.eq.s32.totalorder %v2175_v13, 0  ;;  %v1793_v36 = vand.u32 65535, %v1763_v23 }
 0x357   : > { %v2162_v10 = vadd.f32 -0.4999988, %v2161_v53  ;;  %v2169_v26 = vadd.f32 -0.16666654, %v2168_v9  ;;  %vm2288_vm9 = vcmp.lt.s32.totalorder %v2287_v38, 0  ;;  %v2289_v59 = vsub.s32 0, %v2287_v38 }
 0x358   : > { %v1782_v54 = vsel %vm1781_vm6, 1, %v8457_v34  ;;  %vm1785_vm8 = vc.u32 %v1783_v21, %v1779_v29  ;;  %vm2176_vm1 = vcmp.lt.s32.totalorder %v2175_v13, 2  ;;  %vm2173_vm11 = vweird.f32 %v5984_v14 }
 0x359   : > { %v2163_v7 = vmul.f32 %v2162_v10, %v2158_v33  ;;  %v2170_v17 = vmul.f32 %v2169_v26, %v2158_v33  ;;  %v2290_v4 = vsel %vm2288_vm9, %v2289_v59, %v2287_v38  ;;  %v1784_v56 = vadd.s32 %v1782_v54, %v1776_v55 }
 0x35a   : > { %v2291_v48 = vclz %v2290_v4  ;;  %v1736_v15 = vshrl.u32 %v8458_v49, %v8556_v5  ;;  %v1786_v0 = vsel %vm1785_vm8, 1, %v8457_v34  ;;  %v1796_v3 = vmul.u32 %v1794_v18, %v1769_v40  ;;  %v8563_v4 = vld [vmem:[#allocation7_spill] sm:$0xff] }
 0x35b   : > { %v2164_v25 = vadd.f32 1.0, %v2163_v7  ;;  %v2171_v57 = vadd.f32 1.0, %v2170_v17  ;;  %v1757_v8 = vsel %vm1755_vm13, %v6854_v27, 2102212464  ;;  %v1788_v42 = vadd.s32 %v1786_v0, %v1784_v56 }
 0x35c   : > { %vm2180_vm12 = vcmp.eq.s32.totalorder %v2175_v13, 2  ;;  %v2279_v33 = vadd.s32 %v6825_v16, %v6809_v39  ;;  %v4490_v1 = vadd.s32 4294967294, %v2291_v48  ;;  %v1797_v20 = vmul.u32 %v1793_v36, %v6891_v30 }
 0x35d   : > { %v2172_v43 = vmul.f32 %v2171_v57, %v2156_v47  ;;  %v2181_v23 = vxor.u32 2147483648, %v2164_v25  ;;  %v1756_v5 = vsel %vm1752_vm2, %v1736_v15, %v6849_v32  ;;  %v1778_v58 = vshrl.u32 %v1774_v63, 16 }
 0x35e   : > { %vm4491_vm4 = vcmp.lt.s32.totalorder %v4490_v1, 0  ;;  %v1758_v27 = vsel %vm1754_vm15, %v6851_v35, %v1757_v8  ;;  %v1795_v45 = vmul.u32 %v1793_v36, %v1769_v40  ;;  %v1799_v53 = vshll.u32 %v1796_v3, 16 }
 0x35f   : > { %v2178_v9 = vxor.u32 2147483648, %v2172_v43  ;;  %v2294_v55 = vsel %vm4491_vm4, 0, %v4490_v1  ;;  %v1789_v39 = vadd.s32 %v1788_v42, %v1778_v58  ;;  %v1798_v16 = vmul.u32 %v1794_v18, %v6891_v30 }
 0x360   : > { %v2182_v47 = vsel %vm2180_vm12, %v2181_v23, %v2172_v43  ;;  %v2295_v29 = vsub.s32 32, %v2294_v55  ;;  %v2299_v21 = vsub.s32 4294967266, %v2294_v55  ;;  %v1801_v10 = vshll.u32 %v1797_v20, 16 }
 0x361   : > { %v2179_v32 = vsel %vm2177_vm10, %v2164_v25, %v2178_v9  ;;  %v2296_v63 = vshll.u32 %v2287_v38, %v2294_v55  ;;  %vm1803_vm13 = vc.u32 %v1795_v45, %v1799_v53  ;;  %v1805_v26 = vadd.s32 %v1799_v53, %v1795_v45 }
 0x362   : > { %v2183_v59 = vsel %vm2176_vm1, %v2179_v32, %v2182_v47  ;;  %v2297_v35 = vshrl.u32 %v2279_v33, %v2295_v29  ;;  %v2300_v40 = vadd.s32 127, %v2299_v21  ;;  %v1804_v54 = vsel %vm1803_vm13, 1, %v8457_v34 }
 0x363   : > { %v2184_v36 = vsel %vm2173_vm11, nan, %v2183_v59  ;;  %v1780_v30 = vshrl.u32 %v6902_v37, 16  ;;  %v1806_v18 = vadd.s32 %v1804_v54, %v1798_v16  ;;  %vm1807_vm5 = vc.u32 %v1805_v26, %v1801_v10 }
 0x364   : > { %3016 = vmatpush.msrb.mxu0 %v2184_v36  ;;  %v2298_v7 = vor.u32 %v2297_v35, %v2296_v63  ;;  %v2301_v17 = vshll.u32 %v2300_v40, 23  ;;  %v1808_v38 = vsel %vm1807_vm5, 1, %v8457_v34  ;;  %v1875_v56 = vand.u32 2147483647, %v8563_v4 }
 0x365   : > { %vm2187_vm14 = vcmp.lt.s32.totalorder %v8549_v6, 0  ;;  %v1759_v13 = vsel %vm1753_vm3, %v1756_v5, %v1758_v27  ;;  %v6943_v48 = vadd.s32 %v1789_v39, %v1780_v30  ;;  %v1800_v14 = vshrl.u32 %v1796_v3, 16 }
 0x366   : > { %v1810_v15 = vadd.s32 %v1808_v38, %v1806_v18  ;;  %v2302_v0 = vor.u32 4788187, %v2301_v17  ;;  %v1802_v37 = vshrl.u32 %v1797_v20, 16  ;;  %v6945_v25 = vadd.s32 %v1805_v26, %v1801_v10 }
 0x367   : > { %v1882_v57 = vand.u32 8388607, %v1875_v56  ;;  %v2305_v8 = vcvt.s32.f32 %v2298_v7  ;;  %v1892_v33 = vshll.u32 %v8458_v49, %v8552_v19  ;;  %v1893_v28 = vshrl.u32 %v8459_v62, %v8551_v61 }
 0x368   : > { %v1811_v42 = vadd.s32 %v1810_v15, %v1800_v14  ;;  %v2303_v1 = vand.u32 2147483647, %v2302_v0  ;;  %v1895_v3 = vshll.u32 %v8459_v62, %v8552_v19  ;;  %v1896_v20 = vshrl.u32 %v8460_v41, %v8551_v61 }
 0x369   : > { %v1883_v43 = vor.u32 8388608, %v1882_v57  ;;  %v6957_v5 = vor.u32 %v1893_v28, %v1892_v33  ;;  %v1898_v58 = vshll.u32 %v8460_v41, %v8552_v19  ;;  %v1899_v27 = vshrl.u32 %v8461_v31, %v8551_v61 }
 0x36a   : > { %v1812_v23 = vadd.s32 %v1811_v42, %v1802_v37  ;;  %v2306_v45 = vmul.f32 %v2305_v8, %v2303_v1  ;;  %v2309_v53 = vsub.s32 4, %v6894_v11  ;;  %vm1815_vm15 = vc.u32 %v6943_v48, %v6945_v25 }
 0x36b   : > { %v6966_v9 = vor.u32 %v1896_v20, %v1895_v3  ;;  %v6968_v39 = vor.u32 %v1899_v27, %v1898_v58  ;;  %vm1907_vm2 = vcmp.lt.s32.totalorder %v8562_v52, 1  ;;  %vm1909_vm3 = vcmp.lt.s32.totalorder %v8562_v52, 3 }
 0x36c   : > { %v1816_v55 = vadd.s32 1, %v1812_v23  ;;  %v2307_v16 = vxor.u32 2147483648, %v2306_v45  ;;  %v1813_v19 = vmul.u32 %v6866_v46, %v1759_v13  ;;  %v1921_v29 = vsel %vm1909_vm3, %v6759_v50, %v6909_v60 }
 0x36d   : > { %v1915_v47 = vsel %vm1907_vm2, %v6957_v5, %v6966_v9  ;;  %v1917_v10 = vsel %vm1909_vm3, %v6968_v39, %v6899_v22  ;;  %v1919_v46 = vsel %vm1907_vm2, %v6966_v9, %v6968_v39  ;;  %v6989_v32 = vshll.u32 %v1883_v43, 8 }
 0x36e   : > { %v1817_v21 = vsel %vm1815_vm15, %v1816_v55, %v1812_v23  ;;  %vm6993_vm6 = vcmp.le.f32.partialorder %v2185_v51, 0.7853982  ;;  %v2308_v50 = vsel %vm2187_vm14, %v2307_v16, %v2306_v45  ;;  %vm1908_vm9 = vcmp.lt.s32.totalorder %v8562_v52, 2 }
 0x36f   : > { %v1818_v60 = vadd.s32 %v1817_v21, %v1813_v19  ;;  %v2310_v22 = vsel %vm2187_vm14, %v2309_v53, %v6894_v11  ;;  %v2311_v26 = vsel %vm6993_vm6, %v8549_v6, %v2308_v50  ;;  %v1922_v51 = vsel %vm1908_vm9, %v1919_v46, %v1921_v29 }
 0x370   : > { %v2313_v59 = vmul.f32 %v2311_v26, %v2311_v26  ;;  %v1918_v40 = vsel %vm1908_vm9, %v1915_v47, %v1917_v10  ;;  %v1926_v54 = vand.u32 65535, %v1922_v51  ;;  %v1924_v36 = vand.u32 65535, %v6989_v32 }
 0x371   : > { %v1819_v35 = vadd.s32 536870912, %v1818_v60  ;;  %v1925_v30 = vshrl.u32 %v6989_v32, 16  ;;  %v1927_v18 = vshrl.u32 %v1922_v51, 16  ;;  %v2312_v11 = vsel %vm6993_vm6, 0, %v2310_v22 }
 0x372   : > { %v2314_v7 = vmul.f32 -0.001358992, %v2313_v59  ;;  %v2321_v17 = vmul.f32 -0.00019511016, %v2313_v59  ;;  %v1949_v15 = vshrl.u32 %v1918_v40, 16  ;;  %v2329_v8 = vadd.s32 3, %v2312_v11 }
 0x373   : > { %v7014_v38 = vshrl.u32 %v1819_v35, 30  ;;  %v1929_v13 = vmul.u32 %v1927_v18, %v1924_v36  ;;  %v7016_v14 = vmul.u32 %v1926_v54, %v1925_v30  ;;  %v1928_v42 = vmul.u32 %v1926_v54, %v1924_v36 }
 0x374   : > { %v2315_v0 = vadd.f32 0.041655596, %v2314_v7  ;;  %v2322_v37 = vadd.f32 0.008332121, %v2321_v17  ;;  %v1931_v3 = vmul.u32 %v1927_v18, %v1925_v30  ;;  %v7020_v58 = vmul.u32 %v1949_v15, %v1924_v36 }
 0x375   : > { %v1821_v57 = vshll.u32 %v7014_v38, 30  ;;  %v1932_v33 = vshll.u32 %v1929_v13, 16  ;;  %v1934_v20 = vshll.u32 %v7016_v14, 16  ;;  %v2330_v55 = vand.u32 3, %v2329_v8 }
 0x376   : > { %v2316_v28 = vmul.f32 %v2315_v0, %v2313_v59  ;;  %v2323_v1 = vmul.f32 %v2322_v37, %v2313_v59  ;;  %v1948_v19 = vand.u32 65535, %v1918_v40  ;;  %vm2328_vm11 = vweird.f32 %v8549_v6 }
 0x377   : > { %v1822_v43 = vsub.s32 %v1818_v60, %v1821_v57  ;;  %vm1936_vm10 = vc.u32 %v1928_v42, %v1932_v33  ;;  %v1938_v23 = vadd.s32 %v1932_v33, %v1928_v42  ;;  %v1954_v51 = vshll.u32 %v7020_v58, 16 }
 0x378   : > { %v2317_v27 = vadd.f32 -0.4999988, %v2316_v28  ;;  %v2324_v45 = vadd.f32 -0.16666654, %v2323_v1  ;;  %v1937_v16 = vsel %vm1936_vm10, 1, %v8457_v34  ;;  %vm2331_vm12 = vcmp.lt.s32.totalorder %v2330_v55, 2 }
 0x379   : > { %vm1823_vm8 = vcmp.lt.s32.totalorder %v1822_v43, 0  ;;  %v1824_v53 = vsub.s32 0, %v1822_v43  ;;  %vm1940_vm1 = vc.u32 %v1938_v23, %v1934_v20  ;;  %v1939_v10 = vadd.s32 %v1937_v16, %v1931_v3 }
 0x37a   : > { %v2318_v47 = vmul.f32 %v2317_v27, %v2313_v59  ;;  %v2325_v29 = vmul.f32 %v2324_v45, %v2313_v59  ;;  %v1941_v63 = vsel %vm1940_vm1, 1, %v8457_v34  ;;  %v1950_v54 = vmul.u32 %v1948_v19, %v1924_v36 }
 0x37b   : > { %v1825_v21 = vsel %vm1823_vm8, %v1824_v53, %v1822_v43  ;;  %v1943_v22 = vadd.s32 %v1941_v63, %v1939_v10  ;;  %v1952_v18 = vmul.u32 %v1948_v19, %v1925_v30  ;;  %vm2332_vm4 = vcmp.eq.s32.totalorder %v2330_v55, 0 }
 0x37c   : > { %v1826_v46 = vclz %v1825_v21  ;;  %v2319_v50 = vadd.f32 1.0, %v2318_v47  ;;  %v2326_v60 = vadd.f32 1.0, %v2325_v29  ;;  %v1933_v59 = vshrl.u32 %v1929_v13, 16 }
 0x37d   : > { %vm2335_vm13 = vcmp.eq.s32.totalorder %v2330_v55, 2  ;;  %v1814_v7 = vadd.s32 %v6945_v25, %v6943_v48  ;;  %vm1958_vm14 = vc.u32 %v1950_v54, %v1954_v51  ;;  %v1953_v57 = vmul.u32 %v1949_v15, %v1925_v30 }
 0x37e   : > { %v4481_v35 = vadd.s32 4294967294, %v1826_v46  ;;  %v2327_v11 = vmul.f32 %v2326_v60, %v2311_v26  ;;  %v2336_v40 = vxor.u32 2147483648, %v2319_v50  ;;  %v1944_v37 = vadd.s32 %v1943_v22, %v1933_v59 }
 0x37f   : > { %v1956_v33 = vshll.u32 %v1952_v18, 16  ;;  %v1959_v36 = vsel %vm1958_vm14, 1, %v8457_v34  ;;  %v1960_v1 = vadd.s32 %v1954_v51, %v1950_v54  ;;  %v1891_v30 = vshrl.u32 %v8458_v49, %v8551_v61 }
 0x380   : > { %vm4482_vm5 = vcmp.lt.s32.totalorder %v4481_v35, 0  ;;  %v2333_v17 = vxor.u32 2147483648, %v2327_v11  ;;  %v2337_v26 = vsel %vm2335_vm13, %v2336_v40, %v2327_v11  ;;  %v1961_v3 = vadd.s32 %v1959_v36, %v1953_v57 }
 0x381   : > { %v1829_v0 = vsel %vm4482_vm5, 0, %v4481_v35  ;;  %v1912_v15 = vsel %vm1910_vm7, %v6968_v39, 2102212464  ;;  %vm1962_vm15 = vc.u32 %v1960_v1, %v1956_v33  ;;  %v1935_v53 = vshrl.u32 %v7016_v14, 16 }
 0x382   : > { %v1830_v8 = vsub.s32 32, %v1829_v0  ;;  %v1834_v42 = vsub.s32 4294967266, %v1829_v0  ;;  %v2334_v28 = vsel %vm2332_vm4, %v2319_v50, %v2333_v17  ;;  %v1831_v20 = vshll.u32 %v1822_v43, %v1829_v0 }
 0x383   : > { %v2338_v13 = vsel %vm2331_vm12, %v2334_v28, %v2337_v26  ;;  %v1963_v43 = vsel %vm1962_vm15, 1, %v8457_v34  ;;  %v1955_v55 = vshrl.u32 %v7020_v58, 16  ;;  %v1911_v61 = vsel %vm1907_vm2, %v1891_v30, %v6957_v5 }
 0x384   : > { %v1832_v23 = vshrl.u32 %v1814_v7, %v1830_v8  ;;  %v1835_v48 = vadd.s32 127, %v1834_v42  ;;  %v2339_v25 = vsel %vm2328_vm11, nan, %v2338_v13  ;;  %v1965_v16 = vadd.s32 %v1963_v43, %v1961_v3 }
 0x385   : > { %3045 = vmatpush.msrb.mxu1 %v2339_v25  ;;  %v1913_v39 = vsel %vm1909_vm3, %v6966_v9, %v1912_v15  ;;  %v1945_v19 = vadd.s32 %v1944_v37, %v1935_v53  ;;  %v1957_v47 = vshrl.u32 %v1952_v18, 16  ;;  %v1964_v14 = vadd.s32 %v1960_v1, %v1956_v33 }
 0x386   : > { %v1833_v27 = vor.u32 %v1832_v23, %v1831_v20  ;;  %v1836_v45 = vshll.u32 %v1835_v48, 23  ;;  %v1966_v29 = vadd.s32 %v1965_v16, %v1955_v55  ;;  %v1914_v46 = vsel %vm1908_vm9, %v1911_v61, %v1913_v39 }
 0x387   : > { %vm1970_vm7 = vc.u32 %v1945_v19, %v1964_v14  ;;  %v1968_v5 = vmul.u32 %v6989_v32, %v1914_v46  ;;  %vm1722_vm2 = vcmp.lt.s32.totalorder %v8555_v12, 0  ;;  %v1844_v9 = vsub.s32 4, %v7014_v38 }
 0x388   : > { %v1837_v6 = vor.u32 4788187, %v1836_v45  ;;  %v1840_v10 = vcvt.s32.f32 %v1833_v27  ;;  %v1967_v58 = vadd.s32 %v1966_v29, %v1957_v47  ;;  %vm7053_vm3 = vcmp.le.f32.partialorder %v1720_v24, 0.7853982 }
 0x389   : > { %v1845_v32 = vsel %vm1722_vm2, %v1844_v9, %v7014_v38  ;;  %v1969_v53 = vadd.s32 %v1964_v14, %v1945_v19  ;;  %vm1863_vm1 = vweird.f32 %v8555_v12  ;;  %vm1877_vm12 = vcmp.lt.s32.totalorder %v8563_v4, 0 }
 0x38a   : > { %v1838_v21 = vand.u32 2147483647, %v1837_v6  ;;  %v1971_v50 = vadd.s32 1, %v1967_v58  ;;  %v1847_v17 = vsel %vm7053_vm3, 0, %v1845_v32  ;;  %vm7074_vm4 = vcmp.le.f32.partialorder %v1875_v56, 0.7853982 }
 0x38b   : > { %v1864_v33 = vadd.s32 3, %v1847_v17  ;;  %vm2018_vm15 = vweird.f32 %v8563_v4 }
 0x38c   : > { %v1841_v63 = vmul.f32 %v1840_v10, %v1838_v21  ;;  %v1972_v22 = vsel %vm1970_vm7, %v1971_v50, %v1967_v58  ;;  %v4504_v58 = vld [vmem:[%s8282_s3 + $0x20] sm:$0xff]  ;;  %v4505_v50 = vld [vmem:[%s8282_s3 + $0x28] sm:$0xff] }
 0x38d   : > { %v1973_v35 = vadd.s32 %v1972_v22, %v1968_v5  ;;  %v1865_v48 = vand.u32 3, %v1864_v33 }
 0x38e   : > { %v1842_v60 = vxor.u32 2147483648, %v1841_v63 }
 0x38f   : > { %v1974_v11 = vadd.s32 536870912, %v1973_v35  ;;  %vm1867_vm10 = vcmp.eq.s32.totalorder %v1865_v48, 0  ;;  %vm1870_vm8 = vcmp.eq.s32.totalorder %v1865_v48, 2  ;;  %vm1866_vm11 = vcmp.lt.s32.totalorder %v1865_v48, 2 }
 0x390   : > { %v1843_v52 = vsel %vm1722_vm2, %v1842_v60, %v1841_v63 }
 0x391   : > { %v1846_v54 = vsel %vm7053_vm3, %v8555_v12, %v1843_v52  ;;  %v1975_v7 = vshrl.u32 %v1974_v11, 30  ;;  %v4506_v11 = vld [vmem:[%s8282_s3 + $0x30] sm:$0xff] }
 0x392   : > { %v1848_v18 = vmul.f32 %v1846_v54, %v1846_v54 }
 0x393   : > { %v1976_v37 = vshll.u32 %v1975_v7, 30  ;;  %v1999_v22 = vsub.s32 4, %v1975_v7 }
 0x394   : > { %v1849_v40 = vmul.f32 -0.001358992, %v1848_v18  ;;  %v1856_v59 = vmul.f32 -0.00019511016, %v1848_v18 }
 0x395   : > { %v1977_v42 = vsub.s32 %v1973_v35, %v1976_v37 }
 0x396   : > { %v1850_v24 = vadd.f32 0.041655596, %v1849_v40  ;;  %v1857_v0 = vadd.f32 0.008332121, %v1856_v59 }
 0x397   : > { %vm1978_vm6 = vcmp.lt.s32.totalorder %v1977_v42, 0  ;;  %v1979_v26 = vsub.s32 0, %v1977_v42 }
 0x398   : > { %v1851_v57 = vmul.f32 %v1850_v24, %v1848_v18  ;;  %v1858_v8 = vmul.f32 %v1857_v0, %v1848_v18 }
 0x399   : > { %v1980_v38 = vsel %vm1978_vm6, %v1979_v26, %v1977_v42 }
 0x39a   : > { %v1852_v36 = vadd.f32 -0.4999988, %v1851_v57  ;;  %v1859_v28 = vadd.f32 -0.16666654, %v1858_v8  ;;  %v1981_v13 = vclz %v1980_v38 }
 0x39c   : > { %v1853_v1 = vmul.f32 %v1852_v36, %v1848_v18  ;;  %v1860_v3 = vmul.f32 %v1859_v28, %v1848_v18  ;;  %v4484_v25 = vadd.s32 4294967294, %v1981_v13  ;;  %v2000_v18 = vsel %vm1877_vm12, %v1999_v22, %v1975_v7  ;;  %v4507_v7 = vld [vmem:[%s8282_s3 + $0x38] sm:$0xff] }
 0x39d   : > { %v2002_v40 = vsel %vm7074_vm4, 0, %v2000_v18 }
 0x39e   : > { %v1854_v20 = vadd.f32 1.0, %v1853_v1  ;;  %v1861_v23 = vadd.f32 1.0, %v1860_v3  ;;  %vm4485_vm9 = vcmp.lt.s32.totalorder %v4484_v25, 0  ;;  %v2019_v37 = vadd.s32 3, %v2002_v40 }
 0x39f   : > { %v1984_v45 = vsel %vm4485_vm9, 0, %v4484_v25 }
 0x3a0   : > { %v1862_v30 = vmul.f32 %v1861_v23, %v1846_v54  ;;  %v1871_v15 = vxor.u32 2147483648, %v1854_v20  ;;  %v1985_v43 = vsub.s32 32, %v1984_v45  ;;  %v1989_v55 = vsub.s32 4294967266, %v1984_v45  ;;  %v7097_v23 = vpop.permute.xlu2 %2987 }
 0x3a1   : > { %v1986_v39 = vshll.u32 %v1977_v42, %v1984_v45  ;;  %v2020_v36 = vand.u32 3, %v2019_v37 }
 0x3a2   : > { %v1868_v27 = vxor.u32 2147483648, %v1862_v30  ;;  %v1872_v6 = vsel %vm1870_vm8, %v1871_v15, %v1862_v30  ;;  %v1987_v47 = vshrl.u32 %v1969_v53, %v1985_v43  ;;  %v1990_v29 = vadd.s32 127, %v1989_v55  ;;  %v2978_v53 = vpop.permute.xlu1 %2977 }
 0x3a3   : > { %vm2022_vm13 = vcmp.eq.s32.totalorder %v2020_v36, 0  ;;  %vm2025_vm5 = vcmp.eq.s32.totalorder %v2020_v36, 2  ;;  %vm2021_vm14 = vcmp.lt.s32.totalorder %v2020_v36, 2 }
 0x3a4   : > { %v1869_v16 = vsel %vm1867_vm10, %v1854_v20, %v1868_v27  ;;  %v1988_v10 = vor.u32 %v1987_v47, %v1986_v39  ;;  %v1991_v46 = vshll.u32 %v1990_v29, 23 }
 0x3a5   : > { %v1873_v61 = vsel %vm1866_vm11, %v1869_v16, %v1872_v6 }
 0x3a6   : > { %v1874_v21 = vsel %vm1863_vm1, nan, %v1873_v61  ;;  %v1992_v19 = vor.u32 4788187, %v1991_v46  ;;  %v1995_v12 = vcvt.s32.f32 %v1988_v10 }
 0x3a7   : > { %3017 = vmatpush.msrb.mxu0 %v1874_v21 }
 0x3a8   : > { %4512 = vmatmul.msk.f32.vlgmr.msrb.gmra.mxu0 %vm8414_vm0, %v4504_v58  ;;  %v1993_v14 = vand.u32 2147483647, %v1992_v19  ;;  %v2973_v25 = vpop.permute.xlu2 %2972 }
 0x3aa   : > { %v1996_v63 = vmul.f32 %v1995_v12, %v1993_v14 }
 0x3ac   : > { %v1997_v60 = vxor.u32 2147483648, %v1996_v63 }
 0x3ae   : > { %v1998_v9 = vsel %vm1877_vm12, %v1997_v60, %v1996_v63 }
 0x3af   : > { %v2001_v51 = vsel %vm7074_vm4, %v8563_v4, %v1998_v9 }
 0x3b0   : > { %4513 = vmatmul.msk.f32.gmra.mxu0 %vm8414_vm0, %v4505_v50  ;;  %v2003_v52 = vmul.f32 %v2001_v51, %v2001_v51 }
 0x3b2   : > { %v2004_v35 = vmul.f32 -0.001358992, %v2003_v52  ;;  %v2011_v54 = vmul.f32 -0.00019511016, %v2003_v52 }
 0x3b4   : > { %v2005_v56 = vadd.f32 0.041655596, %v2004_v35  ;;  %v2012_v32 = vadd.f32 0.008332121, %v2011_v54 }
 0x3b6   : > { %v2006_v59 = vmul.f32 %v2005_v56, %v2003_v52  ;;  %v2013_v17 = vmul.f32 %v2012_v32, %v2003_v52 }
 0x3b8   : > { %4514 = vmatmul.msk.f32.gmra.mxu0 %vm8414_vm0, %v4506_v11  ;;  %v2007_v24 = vadd.f32 -0.4999988, %v2006_v59  ;;  %v2014_v0 = vadd.f32 -0.16666654, %v2013_v17 }
 0x3ba   : > { %v2008_v57 = vmul.f32 %v2007_v24, %v2003_v52  ;;  %v2015_v8 = vmul.f32 %v2014_v0, %v2003_v52 }
 0x3bc   : > { %v2009_v42 = vadd.f32 1.0, %v2008_v57  ;;  %v2016_v33 = vadd.f32 1.0, %v2015_v8 }
 0x3be   : > { %v2017_v28 = vmul.f32 %v2016_v33, %v2001_v51  ;;  %v2026_v26 = vxor.u32 2147483648, %v2009_v42 }
 0x3c0   : > { %4515 = vmatmul.msk.f32.gmra.mxu0 %vm8414_vm0, %v4507_v7  ;;  %v2023_v1 = vxor.u32 2147483648, %v2017_v28  ;;  %v2027_v38 = vsel %vm2025_vm5, %v2026_v26, %v2017_v28 }
 0x3c2   : > { %v2024_v3 = vsel %vm2022_vm13, %v2009_v42, %v2023_v1 }
 0x3c3   : > { %v2028_v13 = vsel %vm2021_vm14, %v2024_v3, %v2027_v38 }
 0x3c4   : > { %v2029_v20 = vsel %vm2018_vm15, nan, %v2028_v13 }
 0x3c5   : > { %3046 = vmatpush.msrb.mxu1 %v2029_v20 }
 0x3c6   : > { %4516 = vmatmul.msk.f32.vlgmr.msrb.gmra.mxu1 %vm8414_vm0, %v4504_v58 }
 0x3ce   : > { %4517 = vmatmul.msk.f32.gmra.mxu1 %vm8414_vm0, %v4505_v50 }
 0x3d6   : > { %4518 = vmatmul.msk.f32.gmra.mxu1 %vm8414_vm0, %v4506_v11 }
 0x3de   : > { %4519 = vmatmul.msk.f32.gmra.mxu1 %vm8414_vm0, %v4507_v7 }
 0x425   : > { %v3019_v48 = vpop.f32.mrf.mxu0 }
 0x426   : > { %v7099_v30 = vadd.f32 %v3019_v48, %v2973_v25 }
 0x428   : > { %8570 = vst [vmem:[#allocation8_spill] sm:$0xff] %v7099_v30  ;;  %v3063_v15 = vand.u32 2139095040, %v7099_v30  ;;  %v8362_v29 = vand.u32 2147483647, %v7099_v30 }
 0x42a   : > { %v3064_v4 = vshrl.u32 %v3063_v15, 23  ;;  %v3067_v14 = vand.u32 8388607, %v8362_v29 }
 0x42c   : > { %v4520_v27 = vadd.s32 4294967169, %v3064_v4  ;;  %v3068_v9 = vor.u32 8388608, %v3067_v14 }
 0x42d   : > { %v3022_v43 = vpop.f32.mrf.mxu0 }
 0x42e   : > { %v3070_v45 = vadd.s32 1, %v4520_v27  ;;  %v7102_v55 = vadd.f32 %v3022_v43, %v2978_v53  ;;  %v7134_v8 = vshll.u32 %v3068_v9, 8 }
 0x430   : > { %vm3071_vm7 = vcmp.gt.s32.totalorder %v3070_v45, 0  ;;  %8571 = vst [vmem:[#allocation16_spill] sm:$0xff] %v7102_v55  ;;  %v3373_v16 = vand.u32 2139095040, %v7102_v55  ;;  %v8364_v58 = vand.u32 2147483647, %v7102_v55  ;;  %v7156_v20 = vand.u32 65535, %v7134_v8 }
 0x431   : > { %v3072_v6 = vsel %vm3071_vm7, %v3070_v45, 0  ;;  %8575 = vst [vmem:[#allocation15_spill] sm:$0xff] %v7134_v8  ;;  %v7159_v48 = vshrl.u32 %v7134_v8, 16 }
 0x432   : > { %v3374_v61 = vshrl.u32 %v3373_v16, 23  ;;  %v3074_v39 = vand.u32 31, %v3072_v6  ;;  %v3377_v50 = vand.u32 8388607, %v8364_v58  ;;  %v7127_v56 = vshrl.u32 %v3072_v6, 5  ;;  %8581 = vst [vmem:[#allocation20_spill] sm:$0xff] %v7156_v20 }
 0x433   : > { %8582 = vst [vmem:[#allocation10_spill] sm:$0xff] %v7159_v48 }
 0x434   : > { %v4526_v47 = vadd.s32 4294967169, %v3374_v61  ;;  %v7109_v19 = vsub.s32 32, %v3074_v39  ;;  %v3086_v22 = vshll.u32 %v8461_v31, %v3074_v39  ;;  %v3089_v51 = vshll.u32 %v8489_v2, %v3074_v39  ;;  %8574 = vst [vmem:[#allocation26_spill] sm:$0xff] %v7127_v56 }
 0x435   : > { %v3077_v32 = vshll.u32 %v8458_v49, %v3074_v39  ;;  %v3378_v59 = vor.u32 8388608, %v3377_v50  ;;  %v3080_v17 = vshll.u32 %v8459_v62, %v3074_v39  ;;  %v3083_v57 = vshll.u32 %v8460_v41, %v3074_v39  ;;  %v3025_v27 = vpop.f32.mrf.mxu0 }
 0x436   : > { %v3380_v10 = vadd.s32 1, %v4526_v47  ;;  %8573 = vst [vmem:[#allocation25_spill] sm:$0xff] %v7109_v19  ;;  %v3087_v60 = vshrl.u32 %v8489_v2, %v7109_v19  ;;  %v3090_v5 = vshrl.u32 %v8466_v44, %v7109_v19  ;;  %v3078_v35 = vshrl.u32 %v8459_v62, %v7109_v19 }
 0x437   : > { %v3081_v54 = vshrl.u32 %v8460_v41, %v7109_v19  ;;  %v3084_v40 = vshrl.u32 %v8461_v31, %v7109_v19  ;;  %vm8430_vm3 = vcmp.lt.s32.totalorder %v7127_v56, 4  ;;  %v7145_v1 = vshll.u32 %v3378_v59, 8 }
 0x438   : > { %vm3381_vm2 = vcmp.gt.s32.totalorder %v3380_v10, 0  ;;  %v3088_v24 = vor.u32 %v3087_v60, %v3086_v22  ;;  %v3091_v0 = vor.u32 %v3090_v5, %v3089_v51  ;;  %v7136_v7 = vor.u32 %v3078_v35, %v3077_v32 }
 0x439   : > { %v3382_v52 = vsel %vm3381_vm2, %v3380_v10, 0  ;;  %v7138_v42 = vor.u32 %v3081_v54, %v3080_v17  ;;  %v7142_v26 = vor.u32 %v3084_v40, %v3083_v57  ;;  %8579 = vst [vmem:[#allocation22_spill] sm:$0xff] %v7145_v1  ;;  %vm8429_vm6 = vcmp.lt.s32.totalorder %v7127_v56, 1 }
 0x43a   : > { %v3384_v37 = vand.u32 31, %v3382_v52  ;;  %8576 = vst [vmem:[#allocation17_spill] sm:$0xff] %v7136_v7  ;;  %v3101_v3 = vsel %vm8430_vm3, %v3088_v24, 920167782  ;;  %v3105_v38 = vsel %vm8430_vm3, %v3091_v0, 1326507024 }
 0x43b   : > { %8577 = vst [vmem:[#allocation5_spill] sm:$0xff] %v7138_v42  ;;  %vm8421_vm9 = vcmp.lt.s32.totalorder %v7127_v56, 3  ;;  %v7178_v43 = vsel %vm8429_vm6, %v7138_v42, %v7142_v26  ;;  %v7185_v6 = vand.u32 65535, %v7145_v1  ;;  %v7187_v61 = vshrl.u32 %v3382_v52, 5 }
 0x43c   : > { %8578 = vst [vmem:[#allocation18_spill] sm:$0xff] %v7142_v26  ;;  %v7151_v13 = vsub.s32 32, %v3384_v37  ;;  %v7172_v45 = vsel %vm8421_vm9, %v7142_v26, %v3101_v3  ;;  %v7182_v16 = vsel %vm8421_vm9, %v3088_v24, %v3105_v38  ;;  %v3387_v39 = vshll.u32 %v8458_v49, %v3384_v37 }
 0x43d   : > { %8585 = vst [vmem:[#allocation14_spill] sm:$0xff] %v7172_v45  ;;  %v3390_v22 = vshll.u32 %v8459_v62, %v3384_v37  ;;  %v3393_v51 = vshll.u32 %v8460_v41, %v3384_v37  ;;  %v3399_v52 = vshll.u32 %v8489_v2, %v3384_v37  ;;  %vm3402_vm8 = vcmp.lt.s32.totalorder %v7187_v61, 1 }
 0x43e   : > { %8580 = vst [vmem:[#allocation12_spill] sm:$0xff] %v7151_v13  ;;  %v3397_v47 = vshrl.u32 %v8489_v2, %v7151_v13  ;;  %v3388_v14 = vshrl.u32 %v8459_v62, %v7151_v13  ;;  %v3391_v60 = vshrl.u32 %v8460_v41, %v7151_v13  ;;  %v3394_v5 = vshrl.u32 %v8461_v31, %v7151_v13 }
 0x43f   : > { %8586 = vst [vmem:[#allocation21_spill] sm:$0xff] %v7178_v43  ;;  %v3400_v35 = vshrl.u32 %v8466_v44, %v7151_v13  ;;  %vm3405_vm1 = vcmp.lt.s32.totalorder %v7187_v61, 4  ;;  %vm8434_vm11 = vcmp.lt.s32.totalorder %v7187_v61, 3 }
 0x440   : > { %8587 = vst [vmem:[#allocation13_spill] sm:$0xff] %v7182_v16  ;;  %v7213_v59 = vor.u32 %v3388_v14, %v3387_v39 }
 0x441   : > { %8588 = vst [vmem:[#allocation11_spill] sm:$0xff] %v7185_v6 }
 0x442   : > { %8589 = vst [vmem:[#allocation19_spill] sm:$0xff] %v7187_v61 }
 0x443   : > { %v3048_v21 = vpop.f32.mrf.mxu1  ;;  %8593 = vst [vmem:[#allocation28_spill] sm:$0xff] %v7213_v59 }
 0x444   : > { %v7106_v46 = vadd.f32 %v3048_v21, %v2973_v25  ;;  %v7165_v25 = vsel %vm8429_vm6, %v7136_v7, %v7138_v42  ;;  %v7193_v21 = vshrl.u32 %v7145_v1, 16 }
 0x445   : > { %8583 = vst [vmem:[#allocation23_spill] sm:$0xff] %v7165_v25 }
 0x446   : > { %8572 = vst [vmem:[#allocation6_spill] sm:$0xff] %v7106_v46  ;;  %v3218_v12 = vand.u32 2139095040, %v7106_v46  ;;  %v8361_v18 = vand.u32 2147483647, %v7106_v46 }
 0x447   : > { %8590 = vst [vmem:[#allocation9_spill] sm:$0xff] %v7193_v21 }
 0x448   : > { %v3219_v63 = vshrl.u32 %v3218_v12, 23  ;;  %v3222_v33 = vand.u32 8388607, %v8361_v18  ;;  %v3396_v12 = vshll.u32 %v8461_v31, %v3384_v37  ;;  %v7221_v37 = vor.u32 %v3391_v60, %v3390_v22 }
 0x44a   : > { %v4523_v11 = vadd.s32 4294967169, %v3219_v63  ;;  %v3223_v15 = vor.u32 8388608, %v3222_v33  ;;  %8595 = vst [vmem:[#allocation30_spill] sm:$0xff] %v7221_v37  ;;  %v7223_v33 = vor.u32 %v3394_v5, %v3393_v51 }
 0x44b   : > { %v3051_v28 = vpop.f32.mrf.mxu1 }
 0x44c   : > { %v3225_v36 = vadd.s32 1, %v4523_v11  ;;  %v7167_v4 = vadd.f32 %v3051_v28, %v2978_v53  ;;  %v2983_v53 = vpop.permute.xlu0 %2982  ;;  %v7200_v50 = vshll.u32 %v3223_v15, 8  ;;  %v3398_v11 = vor.u32 %v3397_v47, %v3396_v12  ;;  %8596 = vst [vmem:[#allocation31_spill] sm:$0xff] %v7223_v33 }
 0x44d   : > { %v7198_v63 = vadd.f32 %v3025_v27, %v2983_v53  ;;  %v3401_v27 = vor.u32 %v3400_v35, %v3399_v52 }
 0x44e   : > { %vm3226_vm10 = vcmp.gt.s32.totalorder %v3225_v36, 0  ;;  %8584 = vst [vmem:[#allocation24_spill] sm:$0xff] %v7167_v4  ;;  %v3528_v9 = vand.u32 2139095040, %v7167_v4  ;;  %v8363_v17 = vand.u32 2147483647, %v7167_v4  ;;  %v7219_v57 = vand.u32 65535, %v7200_v50 }
 0x44f   : > { %v3227_v10 = vsel %vm3226_vm10, %v3225_v36, 0  ;;  %8591 = vst [vmem:[#allocation7_spill] sm:$0xff] %v7198_v63  ;;  %v8365_v24 = vand.u32 2147483647, %v7198_v63  ;;  %v3683_v0 = vand.u32 2139095040, %v7198_v63  ;;  %v7226_v28 = vshrl.u32 %v7200_v50, 16 }
 0x450   : > { %8592 = vst [vmem:[#allocation27_spill] sm:$0xff] %v7200_v50  ;;  %v3229_v54 = vand.u32 31, %v3227_v10  ;;  %v3529_v32 = vshrl.u32 %v3528_v9, 23  ;;  %v3411_v39 = vsel %vm3405_vm1, %v3398_v11, 920167782  ;;  %v7240_v5 = vshrl.u32 %v3227_v10, 5 }
 0x451   : > { %8594 = vst [vmem:[#allocation29_spill] sm:$0xff] %v7219_v57  ;;  %v3684_v3 = vshrl.u32 %v3683_v0, 23  ;;  %v3532_v14 = vand.u32 8388607, %v8363_v17  ;;  %v3687_v60 = vand.u32 8388607, %v8365_v24  ;;  %v7252_v9 = vsel %vm3402_vm8, %v7221_v37, %v7223_v33 }
 0x452   : > { %v4529_v36 = vadd.s32 4294967169, %v3529_v32  ;;  %8597 = vst [vmem:[#allocation32_spill] sm:$0xff] %v7226_v28  ;;  %v7231_v15 = vsub.s32 32, %v3229_v54  ;;  %v7257_v22 = vsel %vm8434_vm11, %v7223_v33, %v3411_v39  ;;  %v3415_v0 = vsel %vm3405_vm1, %v3401_v27, 1326507024 }
 0x453   : > { %v3054_v40 = vpop.f32.mrf.mxu1  ;;  %v4532_v12 = vadd.s32 4294967169, %v3684_v3  ;;  %8600 = vst [vmem:[#allocation35_spill] sm:$0xff] %v7240_v5  ;;  %v3533_v39 = vor.u32 8388608, %v3532_v14  ;;  %v3235_v18 = vshll.u32 %v8459_v62, %v3229_v54  ;;  %v3241_v29 = vshll.u32 %v8461_v31, %v3229_v54 }
 0x454   : > { %v7229_v38 = vadd.f32 %v3054_v40, %v2983_v53  ;;  %8599 = vst [vmem:[#allocation34_spill] sm:$0xff] %v7231_v15  ;;  %v3535_v47 = vadd.s32 1, %v4529_v36  ;;  %v7246_v53 = vsel %vm3402_vm8, %v7213_v59, %v7221_v37  ;;  %v3233_v35 = vshrl.u32 %v8459_v62, %v7231_v15 }
 0x455   : > { %8601 = vst [vmem:[#allocation36_spill] sm:$0xff] %v7246_v53  ;;  %v3690_v51 = vadd.s32 1, %v4532_v12  ;;  %v3236_v32 = vshrl.u32 %v8460_v41, %v7231_v15  ;;  %v3242_v40 = vshrl.u32 %v8489_v2, %v7231_v15  ;;  %v3232_v36 = vshll.u32 %v8458_v49, %v3229_v54  ;;  %v3028_v12 = vpop.f32.mrf.mxu0 }
 0x456   : > { %8598 = vst [vmem:[#allocation33_spill] sm:$0xff] %v7229_v38  ;;  %vm3536_vm12 = vcmp.gt.s32.totalorder %v3535_v47, 0  ;;  %v3838_v52 = vand.u32 2139095040, %v7229_v38  ;;  %v3239_v3 = vshrl.u32 %v8461_v31, %v7231_v15  ;;  %v3238_v58 = vshll.u32 %v8460_v41, %v3229_v54 }
 0x457   : > { %8602 = vst [vmem:[#allocation37_spill] sm:$0xff] %v7252_v9  ;;  %v3537_v10 = vsel %vm3536_vm12, %v3535_v47, 0  ;;  %v3688_v47 = vor.u32 8388608, %v3687_v60  ;;  %vm3691_vm4 = vcmp.gt.s32.totalorder %v3690_v51, 0  ;;  %v7276_v24 = vshrl.u32 %v8466_v44, %v7231_v15 }
 0x458   : > { %8603 = vst [vmem:[#allocation38_spill] sm:$0xff] %v7257_v22  ;;  %v3539_v17 = vand.u32 31, %v3537_v10  ;;  %v8377_v27 = vand.u32 2147483647, %v7229_v38  ;;  %v3839_v46 = vshrl.u32 %v3838_v52, 23  ;;  %v7279_v30 = vor.u32 %v3233_v35, %v3232_v36 }
 0x459   : > { %8604 = vst [vmem:[#allocation39_spill] sm:$0xff] %v7276_v24  ;;  %v7281_v14 = vor.u32 %v3236_v32, %v3235_v18  ;;  %v7283_v60 = vor.u32 %v3242_v40, %v3241_v29  ;;  %v7286_v50 = vadd.f32 %v3028_v12, %v7097_v23  ;;  %v7288_v28 = vor.u32 %v3239_v3, %v3238_v58 }
 0x45a   : > { %8605 = vst [vmem:[#allocation40_spill] sm:$0xff] %v7279_v30  ;;  %v7290_v57 = vshll.u32 %v3533_v39, 8  ;;  %v3692_v8 = vsel %vm3691_vm4, %v3690_v51, 0  ;;  %v7292_v4 = vshll.u32 %v3688_v47, 8  ;;  %v7295_v15 = vshll.u32 %v8489_v2, %v3229_v54 }
 0x45b   : > { %8606 = vst [vmem:[#allocation41_spill] sm:$0xff] %v7281_v14  ;;  %vm8415_vm13 = vcmp.lt.s32.totalorder %v7240_v5, 1  ;;  %vm8432_vm5 = vcmp.lt.s32.totalorder %v7240_v5, 4  ;;  %v7299_v18 = vsub.s32 32, %v3539_v17  ;;  %v7303_v29 = vsel %vm8434_vm11, %v3398_v11, %v3415_v0 }
 0x45c   : > { %8607 = vst [vmem:[#allocation42_spill] sm:$0xff] %v7283_v60  ;;  %v3694_v58 = vand.u32 31, %v3692_v8  ;;  %v4535_v52 = vadd.s32 4294967169, %v3839_v46  ;;  %v3842_v51 = vand.u32 8388607, %v8377_v27  ;;  %v7313_v54 = vsel %vm8415_vm13, %v7279_v30, %v7281_v14 }
 0x45d   : > { %8608 = vst [vmem:[#allocation43_spill] sm:$0xff] %v7288_v28  ;;  %v7318_v32 = vsel %vm8432_vm5, %v7283_v60, 920167782  ;;  %v7325_v46 = vsel %vm8415_vm13, %v7281_v14, %v7288_v28  ;;  %v7328_v40 = vand.u32 65535, %v7290_v57  ;;  %v7331_v0 = vand.u32 65535, %v7292_v4 }
 0x45e   : > { %8609 = vst [vmem:[#allocation44_spill] sm:$0xff] %v7290_v57  ;;  %v7334_v36 = vshrl.u32 %v7292_v4, 16  ;;  %v7336_v3 = vshrl.u32 %v3537_v10, 5  ;;  %v3543_v39 = vshrl.u32 %v8459_v62, %v7299_v18  ;;  %v3546_v47 = vshrl.u32 %v8460_v41, %v7299_v18 }
 0x45f   : > { %8610 = vst [vmem:[#allocation45_spill] sm:$0xff] %v7295_v15  ;;  %v7342_v12 = vsub.s32 32, %v3694_v58  ;;  %v3549_v35 = vshrl.u32 %v8461_v31, %v7299_v18  ;;  %v3552_v27 = vshrl.u32 %v8489_v2, %v7299_v18  ;;  %v3843_v11 = vor.u32 8388608, %v3842_v51 }
 0x460   : > { %8611 = vst [vmem:[#allocation46_spill] sm:$0xff] %v7299_v18  ;;  %v3845_v14 = vadd.s32 1, %v4535_v52  ;;  %v3542_v30 = vshll.u32 %v8458_v49, %v3539_v17  ;;  %v3545_v10 = vshll.u32 %v8459_v62, %v3539_v17  ;;  %v3548_v7 = vshll.u32 %v8460_v41, %v3539_v17 }
 0x461   : > { %8612 = vst [vmem:[#allocation47_spill] sm:$0xff] %v7303_v29  ;;  %v3551_v26 = vshll.u32 %v8461_v31, %v3539_v17  ;;  %v7358_v19 = vshll.u32 %v8489_v2, %v3539_v17  ;;  %v7362_v52 = vshrl.u32 %v8466_v44, %v7299_v18  ;;  %vm3560_vm14 = vcmp.lt.s32.totalorder %v7336_v3, 4 }
 0x462   : > { %8613 = vst [vmem:[#allocation48_spill] sm:$0xff] %v7313_v54  ;;  %v8618_v54 = vand.u32 2147483647, %v7286_v50  ;;  %v7364_v51 = vor.u32 %v3543_v39, %v3542_v30  ;;  %v7366_v60 = vor.u32 %v3546_v47, %v3545_v10  ;;  %v7371_v25 = vor.u32 %v3549_v35, %v3548_v7 }
 0x463   : > { %8614 = vst [vmem:[#allocation49_spill] sm:$0xff] %v7318_v32  ;;  %v7373_v45 = vor.u32 %v3552_v27, %v3551_v26  ;;  %v3710_v17 = vshrl.u32 %v8466_v44, %v7342_v12  ;;  %vm3846_vm15 = vcmp.gt.s32.totalorder %v3845_v14, 0  ;;  %v3698_v48 = vshrl.u32 %v8459_v62, %v7342_v12 }
 0x464   : > { %8615 = vst [vmem:[#allocation50_spill] sm:$0xff] %v7325_v46  ;;  %v3993_v46 = vand.u32 2139095040, %v7286_v50  ;;  %v7353_v42 = vand.u32 8388607, %v8618_v54  ;;  %v3707_v54 = vshrl.u32 %v8489_v2, %v7342_v12  ;;  %v3701_v30 = vshrl.u32 %v8460_v41, %v7342_v12 }
 0x465   : > { %8616 = vst [vmem:[#allocation51_spill] sm:$0xff] %v7328_v40  ;;  %v3704_v39 = vshrl.u32 %v8461_v31, %v7342_v12  ;;  %v3706_v47 = vshll.u32 %v8461_v31, %v3694_v58  ;;  %v7384_v10 = vshrl.u32 %v3692_v8, 5  ;;  %v3697_v7 = vshll.u32 %v8458_v49, %v3694_v58 }
 0x466   : > { %8617 = vst [vmem:[#allocation52_spill] sm:$0xff] %v7336_v3  ;;  %v3709_v26 = vshll.u32 %v8489_v2, %v3694_v58  ;;  %v3994_v27 = vshrl.u32 %v3993_v46, 23  ;;  %v3700_v35 = vshll.u32 %v8459_v62, %v3694_v58  ;;  %v3703_v20 = vshll.u32 %v8460_v41, %v3694_v58 }
 0x467   : > { %8619 = vst [vmem:[#allocation53_spill] sm:$0xff] %v7358_v19  ;;  %v3708_v43 = vor.u32 %v3707_v54, %v3706_v47  ;;  %v3847_v16 = vsel %vm3846_vm15, %v3845_v14, 0  ;;  %vm8433_vm7 = vcmp.lt.s32.totalorder %v7336_v3, 1  ;;  %vm3559_vm2 = vcmp.lt.s32.totalorder %v7336_v3, 3  ;;  %v3057_v47 = vpop.f32.mrf.mxu1 }
 0x468   : > { %8620 = vst [vmem:[#allocation54_spill] sm:$0xff] %v7362_v52  ;;  %v3566_v8 = vsel %vm3560_vm14, %v7373_v45, 920167782  ;;  %v3711_v56 = vor.u32 %v3710_v17, %v3709_v26  ;;  %v7395_v15 = vor.u32 %v3698_v48, %v3697_v7  ;;  %v7397_v24 = vor.u32 %v3701_v30, %v3700_v35 }
 0x469   : > { %8621 = vst [vmem:[#allocation55_spill] sm:$0xff] %v7364_v51  ;;  %v7399_v46 = vor.u32 %v3704_v39, %v3703_v20  ;;  %v7401_v55 = vshll.u32 %v3843_v11, 8  ;;  %vm3715_vm10 = vcmp.lt.s32.totalorder %v7384_v10, 4  ;;  %v3849_v58 = vand.u32 31, %v3847_v16 }
 0x46a   : > { %8622 = vst [vmem:[#allocation56_spill] sm:$0xff] %v7366_v60  ;;  %v4538_v54 = vadd.s32 4294967169, %v3994_v27  ;;  %v7410_v48 = vsel %vm8433_vm7, %v7364_v51, %v7366_v60  ;;  %v7415_v20 = vsel %vm3559_vm2, %v7371_v25, %v3566_v8  ;;  %v7421_v11 = vsel %vm8433_vm7, %v7366_v60, %v7371_v25 }
 0x46b   : > { %8623 = vst [vmem:[#allocation57_spill] sm:$0xff] %v7371_v25  ;;  %v3721_v17 = vsel %vm3715_vm10, %v3708_v43, 920167782  ;;  %vm3712_vm12 = vcmp.lt.s32.totalorder %v7384_v10, 1  ;;  %vm3714_vm4 = vcmp.lt.s32.totalorder %v7384_v10, 3  ;;  %v7442_v27 = vand.u32 65535, %v7401_v55 }
 0x46c   : > { %8624 = vst [vmem:[#allocation58_spill] sm:$0xff] %v7373_v45  ;;  %v3725_v30 = vsel %vm3715_vm10, %v3711_v56, 1326507024  ;;  %v4000_v39 = vadd.s32 1, %v4538_v54  ;;  %v7433_v7 = vsel %vm3712_vm12, %v7395_v15, %v7397_v24  ;;  %v7439_v26 = vsel %vm3712_vm12, %v7397_v24, %v7399_v46 }
 0x46d   : > { %8625 = vst [vmem:[#allocation59_spill] sm:$0xff] %v7401_v55  ;;  %v7445_v35 = vadd.f32 %v3057_v47, %v7097_v23  ;;  %v7450_v56 = vsel %vm3714_vm4, %v7399_v46, %v3721_v17  ;;  %v7452_v8 = vsub.s32 32, %v3849_v58  ;;  %v3998_v54 = vor.u32 8388608, %v7353_v42 }
 0x46e   : > { %8626 = vst [vmem:[#allocation60_spill] sm:$0xff] %v7410_v48  ;;  %vm4001_vm15 = vcmp.gt.s32.totalorder %v4000_v39, 0  ;;  %v7457_v14 = vsel %vm3714_vm4, %v3708_v43, %v3725_v30  ;;  %v7459_v60 = vshrl.u32 %v3847_v16, 5  ;;  %v3852_v47 = vshll.u32 %v8458_v49, %v3849_v58 }
 0x46f   : > { %8627 = vst [vmem:[#allocation61_spill] sm:$0xff] %v7415_v20  ;;  %v4002_v51 = vsel %vm4001_vm15, %v4000_v39, 0  ;;  %v7464_v25 = vshll.u32 %v8459_v62, %v3849_v58  ;;  %v7467_v17 = vshrl.u32 %v7401_v55, 16  ;;  %v7470_v42 = vshll.u32 %v8460_v41, %v3849_v58 }
 0x470   : > { %8628 = vst [vmem:[#allocation62_spill] sm:$0xff] %v7421_v11  ;;  %v4004_v18 = vand.u32 31, %v4002_v51  ;;  %v7473_v43 = vshll.u32 %v8461_v31, %v3849_v58  ;;  %v7476_v16 = vshll.u32 %v8489_v2, %v3849_v58  ;;  %v4003_v30 = vshrl.u32 %v4002_v51, 5 }
 0x471   : > { %8629 = vst [vmem:[#allocation63_spill] sm:$0xff] %v7442_v27  ;;  %v3853_v39 = vshrl.u32 %v8459_v62, %v7452_v8  ;;  %v7480_v40 = vshll.u32 %v3998_v54, 8  ;;  %v4148_v28 = vand.u32 2139095040, %v7445_v35  ;;  %v8632_v1 = vand.u32 2147483647, %v7445_v35 }
 0x472   : > { %8630 = vst [vmem:[#allocation64_spill] sm:$0xff] %v7452_v8  ;;  %v4005_v23 = vsub.s32 32, %v4004_v18  ;;  %v4007_v32 = vshll.u32 %v8458_v49, %v4004_v18  ;;  %v4010_v57 = vshll.u32 %v8459_v62, %v4004_v18  ;;  %v4013_v11 = vshll.u32 %v8460_v41, %v4004_v18 }
 0x473   : > { %8631 = vst [vmem:[#allocation65_spill] sm:$0xff] %v7467_v17  ;;  %v4152_v48 = vand.u32 8388607, %v8632_v1  ;;  %v4016_v54 = vshll.u32 %v8461_v31, %v4004_v18  ;;  %v4019_v37 = vshll.u32 %v8489_v2, %v4004_v18  ;;  %vm4022_vm15 = vcmp.lt.s32.totalorder %v4003_v30, 1 }
 0x474   : > { %v4008_v58 = vshrl.u32 %v8459_v62, %v4005_v23  ;;  %v4011_v51 = vshrl.u32 %v8460_v41, %v4005_v23  ;;  %v4014_v20 = vshrl.u32 %v8461_v31, %v4005_v23  ;;  %v4017_v5 = vshrl.u32 %v8489_v2, %v4005_v23 }
 0x475   : > { %v4020_v38 = vshrl.u32 %v8466_v44, %v4005_v23  ;;  %v4149_v45 = vshrl.u32 %v4148_v28, 23  ;;  %v4006_v1 = vshrl.u32 %v8458_v49, %v4005_v23  ;;  %vm4025_vm0 = vcmp.lt.s32.totalorder %v4003_v30, 4 }
 0x476   : > { %v4009_v59 = vor.u32 %v4008_v58, %v4007_v32  ;;  %v4012_v33 = vor.u32 %v4011_v51, %v4010_v57  ;;  %v4015_v13 = vor.u32 %v4014_v20, %v4013_v11  ;;  %v4018_v21 = vor.u32 %v4017_v5, %v4016_v54 }
 0x477   : > { %v4021_v6 = vor.u32 %v4020_v38, %v4019_v37  ;;  %vm4024_vm13 = vcmp.lt.s32.totalorder %v4003_v30, 3  ;;  %v4541_v9 = vadd.s32 4294967169, %v4149_v45  ;;  %v4153_v29 = vor.u32 8388608, %v4152_v48 }
 0x478   : > { %v4027_v55 = vsel %vm4025_vm0, %v4015_v13, 2102212464  ;;  %v4030_v3 = vsel %vm4022_vm15, %v4009_v59, %v4012_v33  ;;  %v4034_v19 = vsel %vm4022_vm15, %v4012_v33, %v4015_v13  ;;  %v4031_v52 = vsel %vm4025_vm0, %v4018_v21, 920167782 }
 0x479   : > { %v4035_v18 = vsel %vm4025_vm0, %v4021_v6, 1326507024  ;;  %vm4023_vm9 = vcmp.lt.s32.totalorder %v4003_v30, 2  ;;  %v4026_v57 = vsel %vm4022_vm15, %v4006_v1, %v4009_v59  ;;  %v4032_v32 = vsel %vm4024_vm13, %v4015_v13, %v4031_v52 }
 0x47a   : > { %v4036_v28 = vsel %vm4024_vm13, %v4018_v21, %v4035_v18  ;;  %v4028_v20 = vsel %vm4024_vm13, %v4012_v33, %v4027_v55  ;;  %v7500_v5 = vsel %vm4023_vm9, %v4030_v3, %v4032_v32  ;;  %v4155_v38 = vadd.s32 1, %v4541_v9 }
 0x47b   : > { %v4037_v37 = vsel %vm4023_vm9, %v4034_v19, %v4036_v28  ;;  %v3856_v11 = vshrl.u32 %v8460_v41, %v7452_v8  ;;  %v4039_v23 = vand.u32 65535, %v7480_v40  ;;  %v7508_v48 = vshrl.u32 %v8461_v31, %v7452_v8 }
 0x47c   : > { %v4041_v6 = vand.u32 65535, %v4037_v37  ;;  %v4042_v45 = vshrl.u32 %v4037_v37, 16  ;;  %v4040_v13 = vshrl.u32 %v7480_v40, 16  ;;  %vm4156_vm0 = vcmp.gt.s32.totalorder %v4155_v38, 0 }
 0x47d   : > { %v7511_v55 = vshll.u32 %v4153_v29, 8  ;;  %v7514_v21 = vsel %vm4023_vm9, %v4026_v57, %v4028_v20  ;;  %v4063_v59 = vand.u32 65535, %v7500_v5  ;;  %v4064_v33 = vshrl.u32 %v7500_v5, 16 }
 0x47e   : > { %v7516_v19 = vmul.u32 %v4042_v45, %v4039_v23  ;;  %v7520_v9 = vor.u32 %v3853_v39, %v3852_v47  ;;  %v7524_v3 = vshrl.u32 %v8489_v2, %v7452_v8  ;;  %v7528_v52 = vshrl.u32 %v8466_v44, %v7452_v8 }
 0x47f   : > { %v7530_v29 = vmul.u32 %v4041_v6, %v4040_v13  ;;  %v7533_v30 = vor.u32 %v3856_v11, %v7464_v25  ;;  %v4043_v58 = vmul.u32 %v4041_v6, %v4039_v23  ;;  %v4157_v54 = vsel %vm4156_vm0, %v4155_v38, 0 }
 0x480   : > { %8633 = vst [vmem:[#allocation66_spill] sm:$0xff] %v7520_v9  ;;  %v4047_v51 = vshll.u32 %v7516_v19, 16  ;;  %v4159_v39 = vand.u32 31, %v4157_v54  ;;  %v7539_v1 = vand.u32 65535, %v7511_v55  ;;  %v7542_v18 = vshrl.u32 %v7511_v55, 16 }
 0x481   : > { %v4046_v57 = vmul.u32 %v4042_v45, %v4040_v13  ;;  %v4065_v32 = vmul.u32 %v4063_v59, %v4039_v23  ;;  %v7544_v28 = vmul.u32 %v4064_v33, %v4039_v23  ;;  %v4049_v25 = vshll.u32 %v7530_v29, 16 }
 0x482   : > { %vm4051_vm9 = vc.u32 %v4043_v58, %v4047_v51  ;;  %v7547_v20 = vmul.u32 %v4063_v59, %v4040_v13  ;;  %v7549_v5 = vshrl.u32 %v4157_v54, 5  ;;  %v4160_v37 = vsub.s32 32, %v4159_v39 }
 0x483   : > { %v4052_v38 = vsel %vm4051_vm9, 1, %v8457_v34  ;;  %v4053_v11 = vadd.s32 %v4047_v51, %v4043_v58  ;;  %v4162_v6 = vshll.u32 %v8458_v49, %v4159_v39  ;;  %v4165_v47 = vshll.u32 %v8459_v62, %v4159_v39 }
 0x484   : > { %v4163_v45 = vshrl.u32 %v8459_v62, %v4160_v37  ;;  %v4166_v53 = vshrl.u32 %v8460_v41, %v4160_v37  ;;  %v4168_v23 = vshll.u32 %v8460_v41, %v4159_v39  ;;  %v4169_v22 = vshrl.u32 %v8461_v31, %v4160_v37 }
 0x485   : > { %v4171_v59 = vshll.u32 %v8461_v31, %v4159_v39  ;;  %v4172_v54 = vshrl.u32 %v8489_v2, %v4160_v37  ;;  %v4174_v61 = vshll.u32 %v8489_v2, %v4159_v39  ;;  %v4175_v58 = vshrl.u32 %v8466_v44, %v4160_v37 }
 0x486   : > { %v4054_v51 = vadd.s32 %v4052_v38, %v4046_v57  ;;  %v4164_v63 = vor.u32 %v4163_v45, %v4162_v6  ;;  %v7562_v8 = vor.u32 %v4166_v53, %v4165_v47  ;;  %v4170_v17 = vor.u32 %v4169_v22, %v4168_v23 }
 0x487   : > { %v4173_v62 = vor.u32 %v4172_v54, %v4171_v59  ;;  %v4176_v27 = vor.u32 %v4175_v58, %v4174_v61  ;;  %vm4177_vm13 = vcmp.lt.s32.totalorder %v7549_v5, 1  ;;  %vm4055_vm15 = vc.u32 %v4053_v11, %v4049_v25 }
 0x488   : > { %vm4180_vm0 = vcmp.lt.s32.totalorder %v7549_v5, 4  ;;  %v4185_v41 = vsel %vm4177_vm13, %v4164_v63, %v7562_v8  ;;  %v4189_v31 = vsel %vm4177_vm13, %v7562_v8, %v4170_v17  ;;  %v4069_v44 = vshll.u32 %v7544_v28, 16 }
 0x489   : > { %vm4179_vm9 = vcmp.lt.s32.totalorder %v7549_v5, 3  ;;  %v4186_v2 = vsel %vm4180_vm0, %v4173_v62, 920167782  ;;  %v4190_v61 = vsel %vm4180_vm0, %v4176_v27, 1326507024  ;;  %v4056_v53 = vsel %vm4055_vm15, 1, %v8457_v34 }
 0x48a   : > { %v4068_v22 = vmul.u32 %v4064_v33, %v4040_v13  ;;  %vm4178_vm6 = vcmp.lt.s32.totalorder %v7549_v5, 2  ;;  %v4187_v47 = vsel %vm4179_vm9, %v4170_v17, %v4186_v2  ;;  %v4191_v39 = vsel %vm4179_vm9, %v4173_v62, %v4190_v61 }
 0x48b   : > { %v4188_v57 = vsel %vm4178_vm6, %v4185_v41, %v4187_v47  ;;  %v4192_v25 = vsel %vm4178_vm6, %v4189_v31, %v4191_v39  ;;  %v4048_v38 = vshrl.u32 %v7516_v19, 16  ;;  %v4058_v27 = vadd.s32 %v4056_v53, %v4054_v51 }
 0x48c   : > { %v4196_v11 = vand.u32 65535, %v4192_v25  ;;  %v4197_v6 = vshrl.u32 %v4192_v25, 16  ;;  %v4219_v13 = vshrl.u32 %v4188_v57, 16  ;;  %v4050_v33 = vshrl.u32 %v7530_v29, 16 }
 0x48d   : > { %v4161_v45 = vshrl.u32 %v8458_v49, %v4160_v37  ;;  %v4218_v23 = vand.u32 65535, %v4188_v57  ;;  %vm4073_vm15 = vc.u32 %v4065_v32, %v4069_v44  ;;  %v4075_v59 = vadd.s32 %v4069_v44, %v4065_v32 }
 0x48e   : > { %v4199_v54 = vmul.u32 %v4197_v6, %v7539_v1  ;;  %v4200_v58 = vmul.u32 %v4196_v11, %v7542_v18  ;;  %v4070_v62 = vshrl.u32 %v7544_v28, 16  ;;  %v4071_v41 = vshll.u32 %v7547_v20, 16 }
 0x48f   : > { %v4181_v19 = vsel %vm4177_vm13, %v4161_v45, %v4164_v63  ;;  %v4182_v51 = vsel %vm4180_vm0, %v4170_v17, 2102212464  ;;  %v4059_v29 = vadd.s32 %v4058_v27, %v4048_v38  ;;  %v4072_v37 = vshrl.u32 %v7547_v20, 16 }
 0x490   : > { %vm3713_vm3 = vcmp.lt.s32.totalorder %v7384_v10, 2  ;;  %v4198_v32 = vmul.u32 %v4196_v11, %v7539_v1  ;;  %v4202_v31 = vshll.u32 %v4199_v54, 16  ;;  %v4221_v44 = vmul.u32 %v4219_v13, %v7539_v1 }
 0x491   : > { %v4074_v28 = vsel %vm4073_vm15, 1, %v8457_v34  ;;  %v4201_v2 = vmul.u32 %v4197_v6, %v7542_v18  ;;  %v4222_v61 = vmul.u32 %v4218_v23, %v7542_v18  ;;  %vm4077_vm13 = vc.u32 %v4075_v59, %v4071_v41 }
 0x492   : > { %v4076_v63 = vadd.s32 %v4074_v28, %v4068_v22  ;;  %v4204_v53 = vshll.u32 %v4200_v58, 16  ;;  %vm4206_vm0 = vc.u32 %v4198_v32, %v4202_v31  ;;  %v4208_v17 = vadd.s32 %v4202_v31, %v4198_v32 }
 0x493   : > { %v4078_v20 = vsel %vm4077_vm13, 1, %v8457_v34  ;;  %v4207_v47 = vsel %vm4206_vm0, 1, %v8457_v34  ;;  %v4220_v39 = vmul.u32 %v4218_v23, %v7539_v1  ;;  %v7609_v57 = vadd.s32 %v4059_v29, %v4050_v33 }
 0x494   : > { %v4080_v25 = vadd.s32 %v4078_v20, %v4076_v63  ;;  %v4209_v38 = vadd.s32 %v4207_v47, %v4201_v2  ;;  %v4223_v27 = vmul.u32 %v4219_v13, %v7542_v18  ;;  %vm4210_vm15 = vc.u32 %v4208_v17, %v4204_v53 }
 0x495   : > { %v4224_v11 = vshll.u32 %v4221_v44, 16  ;;  %v7612_v6 = vadd.s32 %v4075_v59, %v4071_v41  ;;  %v4203_v45 = vshrl.u32 %v4199_v54, 16  ;;  %v4211_v32 = vsel %vm4210_vm15, 1, %v8457_v34 }
 0x496   : > { %v4081_v22 = vadd.s32 %v4080_v25, %v4070_v62  ;;  %v4213_v31 = vadd.s32 %v4211_v32, %v4209_v38  ;;  %v4226_v28 = vshll.u32 %v4222_v61, 16  ;;  %v4183_v1 = vsel %vm4179_vm9, %v7562_v8, %v4182_v51 }
 0x497   : > { %vm4228_vm13 = vc.u32 %v4220_v39, %v4224_v11  ;;  %v4230_v9 = vadd.s32 %v4224_v11, %v4220_v39  ;;  %vm4085_vm0 = vc.u32 %v7609_v57, %v7612_v6  ;;  %v3723_v59 = vsel %vm3713_vm3, %v7433_v7, %v7450_v56 }
 0x498   : > { %v4082_v33 = vadd.s32 %v4081_v22, %v4072_v37  ;;  %v4229_v18 = vsel %vm4228_vm13, 1, %v8457_v34  ;;  %v4214_v13 = vadd.s32 %v4213_v31, %v4203_v45  ;;  %vm3870_vm15 = vcmp.lt.s32.totalorder %v7459_v60, 4 }
 0x499   : > { %v4231_v23 = vadd.s32 %v4229_v18, %v4223_v27  ;;  %vm4232_vm5 = vc.u32 %v4230_v9, %v4226_v28  ;;  %v4205_v62 = vshrl.u32 %v4200_v58, 16  ;;  %v3727_v41 = vsel %vm3713_vm3, %v7439_v26, %v7457_v14 }
 0x49a   : > { %v4086_v54 = vadd.s32 1, %v4082_v33  ;;  %v4233_v8 = vsel %vm4232_vm5, 1, %v8457_v34  ;;  %v4225_v51 = vshrl.u32 %v4221_v44, 16  ;;  %v3731_v37 = vand.u32 65535, %v3727_v41 }
 0x49b   : > { %v4235_v29 = vadd.s32 %v4233_v8, %v4231_v23  ;;  %v3732_v2 = vshrl.u32 %v3727_v41, 16  ;;  %v7633_v63 = vor.u32 %v7508_v48, %v7470_v42  ;;  %v7638_v56 = vadd.s32 %v4214_v13, %v4205_v62 }
 0x49c   : > { %v4087_v7 = vsel %vm4085_vm0, %v4086_v54, %v4082_v33  ;;  %v3754_v58 = vshrl.u32 %v3723_v59, 16  ;;  %v3863_v53 = vor.u32 %v7524_v3, %v7473_v43  ;;  %vm3867_vm5 = vcmp.lt.s32.totalorder %v7459_v60, 1 }
 0x49d   : > { %v8634_v14 = vmul.u32 %v7480_v40, %v7514_v21  ;;  %v4227_v44 = vshrl.u32 %v4222_v61, 16  ;;  %v4236_v17 = vadd.s32 %v4235_v29, %v4225_v51  ;;  %v4184_v42 = vsel %vm4178_vm6, %v4181_v19, %v4183_v1 }
 0x49e   : > { %v7648_v48 = vadd.s32 %v4230_v9, %v4226_v28  ;;  %v3734_v20 = vmul.u32 %v3732_v2, %v7331_v0  ;;  %v7652_v47 = vmul.u32 %v3731_v37, %v7334_v36  ;;  %v3866_v43 = vor.u32 %v7528_v52, %v7476_v16 }
 0x49f   : > { %v4088_v26 = vadd.s32 %v4087_v7, %v8634_v14  ;;  %vm3869_vm9 = vcmp.lt.s32.totalorder %v7459_v60, 3  ;;  %v4237_v40 = vadd.s32 %v4236_v17, %v4227_v44  ;;  %v7658_v21 = vmul.u32 %v3754_v58, %v7331_v0 }
 0x4a0   : > { %vm4240_vm6 = vc.u32 %v7638_v56, %v7648_v48  ;;  %v3733_v9 = vmul.u32 %v3731_v37, %v7331_v0  ;;  %v3737_v5 = vshll.u32 %v3734_v20, 16  ;;  %v3753_v19 = vand.u32 65535, %v3723_v59 }
 0x4a1   : > { %v4089_v3 = vadd.s32 536870912, %v4088_v26  ;;  %v4238_v61 = vmul.u32 %v7511_v55, %v4184_v42  ;;  %v4241_v25 = vadd.s32 1, %v4237_v40  ;;  %v3736_v16 = vmul.u32 %v3732_v2, %v7334_v36 }
 0x4a2   : > { %v3739_v52 = vshll.u32 %v7652_v47, 16  ;;  %vm3741_vm13 = vc.u32 %v3733_v9, %v3737_v5  ;;  %v3743_v38 = vadd.s32 %v3737_v5, %v3733_v9  ;;  %v3759_v27 = vshll.u32 %v7658_v21, 16 }
 0x4a3   : > { %v7664_v39 = vshrl.u32 %v4089_v3, 30  ;;  %v7671_v11 = vsel %vm3870_vm15, %v3863_v53, 920167782  ;;  %v4242_v45 = vsel %vm4240_vm6, %v4241_v25, %v4237_v40  ;;  %v3742_v55 = vsel %vm3741_vm13, 1, %v8457_v34 }
 0x4a4   : > { %v4243_v32 = vadd.s32 %v4242_v45, %v4238_v61  ;;  %v3744_v31 = vadd.s32 %v3742_v55, %v3736_v16  ;;  %vm3745_vm0 = vc.u32 %v3743_v38, %v3739_v52  ;;  %v3755_v28 = vmul.u32 %v3753_v19, %v7331_v0 }
 0x4a5   : > { %v4091_v22 = vshll.u32 %v7664_v39, 30  ;;  %v3880_v1 = vsel %vm3870_vm15, %v3866_v43, 1326507024  ;;  %v3746_v18 = vsel %vm3745_vm0, 1, %v8457_v34  ;;  %v3757_v13 = vmul.u32 %v3753_v19, %v7334_v36 }
 0x4a6   : > { %v7684_v23 = vsel %vm3867_vm5, %v7533_v30, %v7633_v63  ;;  %v4244_v59 = vadd.s32 536870912, %v4243_v32  ;;  %v3758_v54 = vmul.u32 %v3754_v58, %v7334_v36  ;;  %vm3763_vm6 = vc.u32 %v3755_v28, %v3759_v27 }
 0x4a7   : > { %v4092_v33 = vsub.s32 %v4088_v26, %v4091_v22  ;;  %vm3992_vm13 = vcmp.lt.s32.totalorder %v7286_v50, 0  ;;  %v3748_v62 = vadd.s32 %v3746_v18, %v3744_v31  ;;  %v3764_v8 = vsel %vm3763_vm6, 1, %v8457_v34 }
 0x4a8   : > { %v3881_v41 = vsel %vm3869_vm9, %v3863_v53, %v3880_v1  ;;  %v4245_v51 = vshrl.u32 %v4244_v59, 30  ;;  %v3696_v29 = vshrl.u32 %v8458_v49, %v7342_v12  ;;  %v3765_v37 = vadd.s32 %v3759_v27, %v3755_v28 }
 0x4a9   : > { %vm4093_vm7 = vcmp.lt.s32.totalorder %v4092_v33, 0  ;;  %v4094_v0 = vsub.s32 0, %v4092_v33  ;;  %v3738_v7 = vshrl.u32 %v3734_v20, 16  ;;  %v3761_v14 = vshll.u32 %v3757_v13, 16 }
 0x4aa   : > { %v3766_v36 = vadd.s32 %v3764_v8, %v3758_v54  ;;  %vm4147_vm0 = vcmp.lt.s32.totalorder %v7445_v35, 0  ;;  %v8635_v58 = vand.u32 2147483647, %v7286_v50  ;;  %v4246_v17 = vshll.u32 %v4245_v51, 30 }
 0x4ab   : > { %v4095_v2 = vsel %vm4093_vm7, %v4094_v0, %v4092_v33  ;;  %v3717_v53 = vsel %vm3715_vm10, %v7399_v46, 2102212464  ;;  %v4084_v12 = vadd.s32 %v7612_v6, %v7609_v57  ;;  %v3716_v42 = vsel %vm3712_vm12, %v3696_v29, %v7395_v15 }
 0x4ac   : > { %vm7696_vm11 = vcmp.le.f32.partialorder %v8635_v58, 0.7853982  ;;  %v4096_v44 = vclz %v4095_v2  ;;  %v3749_v20 = vadd.s32 %v3748_v62, %v3738_v7  ;;  %vm3767_vm7 = vc.u32 %v3765_v37, %v3761_v14 }
 0x4ad   : > { %v4114_v3 = vsub.s32 4, %v7664_v39  ;;  %v4247_v40 = vsub.s32 %v4243_v32, %v4246_v17  ;;  %v3768_v9 = vsel %vm3767_vm7, 1, %v8457_v34  ;;  %v3718_v5 = vsel %vm3714_vm4, %v7397_v24, %v3717_v53 }
 0x4ae   : > { %v4539_v43 = vadd.s32 4294967294, %v4096_v44  ;;  %v3740_v46 = vshrl.u32 %v7652_v47, 16  ;;  %v3760_v57 = vshrl.u32 %v7658_v21, 16  ;;  %v3770_v6 = vadd.s32 %v3768_v9, %v3766_v36 }
 0x4af   : > { %vm4248_vm6 = vcmp.lt.s32.totalorder %v4247_v40, 0  ;;  %v4249_v15 = vsub.s32 0, %v4247_v40  ;;  %v3762_v19 = vshrl.u32 %v3757_v13, 16  ;;  %v4269_v25 = vsub.s32 4, %v4245_v51 }
 0x4b0   : > { %vm4540_vm10 = vcmp.lt.s32.totalorder %v4539_v43, 0  ;;  %v3750_v16 = vadd.s32 %v3749_v20, %v3740_v46  ;;  %v3771_v52 = vadd.s32 %v3770_v6, %v3760_v57  ;;  %v4115_v22 = vsel %vm3992_vm13, %v4114_v3, %v7664_v39  ;;  %v8642_v3 = vld [vmem:[#allocation63_spill] sm:$0xff] }
 0x4b1   : > { %v4099_v61 = vsel %vm4540_vm10, 0, %v4539_v43  ;;  %v4250_v24 = vsel %vm4248_vm6, %v4249_v15, %v4247_v40  ;;  %v8638_v47 = vand.u32 2147483647, %v7445_v35  ;;  %v3769_v55 = vadd.s32 %v3765_v37, %v3761_v14 }
 0x4b2   : > { %v4100_v38 = vsub.s32 32, %v4099_v61  ;;  %v4104_v27 = vsub.s32 4294967266, %v4099_v61  ;;  %v4251_v45 = vclz %v4250_v24  ;;  %v3772_v32 = vadd.s32 %v3771_v52, %v3762_v19  ;;  %v8643_v19 = vld [vmem:[#allocation65_spill] sm:$0xff] }
 0x4b3   : > { %vm7720_vm12 = vcmp.le.f32.partialorder %v8638_v47, 0.7853982  ;;  %v4101_v31 = vshll.u32 %v4092_v33, %v4099_v61  ;;  %v3719_v18 = vsel %vm3713_vm3, %v3716_v42, %v3718_v5  ;;  %v4117_v13 = vsel %vm7696_vm11, 0, %v4115_v22 }
 0x4b4   : > { %v4102_v28 = vshrl.u32 %v4084_v12, %v4100_v38  ;;  %v4105_v1 = vadd.s32 127, %v4104_v27  ;;  %v4542_v39 = vadd.s32 4294967294, %v4251_v45  ;;  %v4270_v59 = vsel %vm4147_vm0, %v4269_v25, %v4245_v51  ;;  %v8644_v27 = vld [vmem:[#allocation64_spill] sm:$0xff] }
 0x4b5   : > { %vm3775_vm4 = vc.u32 %v3750_v16, %v3769_v55  ;;  %v3776_v62 = vadd.s32 1, %v3772_v32  ;;  %vm3868_vm7 = vcmp.lt.s32.totalorder %v7459_v60, 2  ;;  %v4239_v33 = vadd.s32 %v7648_v48, %v7638_v56  ;;  %v8649_v60 = vld [vmem:[#allocation19_spill] sm:$0xff] }
 0x4b6   : > { %v4103_v54 = vor.u32 %v4102_v28, %v4101_v31  ;;  %v4106_v0 = vshll.u32 %v4105_v1, 23  ;;  %vm4543_vm10 = vcmp.lt.s32.totalorder %v4542_v39, 0  ;;  %v3773_v10 = vmul.u32 %v7292_v4, %v3719_v18 }
 0x4b7   : > { %v3882_v8 = vsel %vm3868_vm7, %v7684_v23, %v3881_v41  ;;  %v4134_v37 = vadd.s32 3, %v4117_v13  ;;  %v4254_v2 = vsel %vm4543_vm10, 0, %v4542_v39  ;;  %v3777_v51 = vsel %vm3775_vm4, %v3776_v62, %v3772_v32  ;;  %v8641_v23 = vld [vmem:[#allocation66_spill] sm:$0xff] }
 0x4b8   : > { %v4107_v29 = vor.u32 4788187, %v4106_v0  ;;  %v4255_v7 = vsub.s32 32, %v4254_v2  ;;  %v4259_v14 = vsub.s32 4294967266, %v4254_v2  ;;  %v4272_v36 = vsel %vm7720_vm12, 0, %v4270_v59 }
 0x4b9   : > { %v3778_v58 = vadd.s32 %v3777_v51, %v3773_v10  ;;  %v4110_v17 = vcvt.s32.f32 %v4103_v54  ;;  %v3886_v56 = vand.u32 65535, %v3882_v8  ;;  %v3887_v48 = vshrl.u32 %v3882_v8, 16 }
 0x4ba   : > { %v4108_v44 = vand.u32 2147483647, %v4107_v29  ;;  %v4256_v53 = vshll.u32 %v4247_v40, %v4254_v2  ;;  %v4257_v4 = vshrl.u32 %v4239_v33, %v4255_v7  ;;  %v4260_v12 = vadd.s32 127, %v4259_v14 }
 0x4bb   : > { %v3779_v42 = vadd.s32 536870912, %v3778_v58  ;;  %v3875_v41 = vsel %vm3867_vm5, %v8641_v23, %v7533_v30  ;;  %v3877_v20 = vsel %vm3869_vm9, %v7633_v63, %v7671_v11  ;;  %v7748_v9 = vmul.u32 %v3887_v48, %v8642_v3 }
 0x4bc   : > { %v4111_v43 = vmul.f32 %v4110_v17, %v4108_v44  ;;  %v4258_v5 = vor.u32 %v4257_v4, %v4256_v53  ;;  %v4261_v46 = vshll.u32 %v4260_v12, 23  ;;  %v4289_v40 = vadd.s32 3, %v4272_v36 }
 0x4bd   : > { %v7750_v57 = vshrl.u32 %v3779_v42, 30  ;;  %v3888_v15 = vmul.u32 %v3886_v56, %v8642_v3  ;;  %v7754_v61 = vmul.u32 %v3886_v56, %v8643_v19  ;;  %v3892_v25 = vshll.u32 %v7748_v9, 16 }
 0x4be   : > { %v4112_v6 = vxor.u32 2147483648, %v4111_v43  ;;  %v7757_v52 = vand.u32 3, %v4134_v37  ;;  %v4262_v11 = vor.u32 4788187, %v4261_v46  ;;  %v3851_v22 = vshrl.u32 %v8458_v49, %v8644_v27 }
 0x4bf   : > { %v3781_v38 = vshll.u32 %v7750_v57, 30  ;;  %v4265_v47 = vcvt.s32.f32 %v4258_v5  ;;  %v3774_v45 = vadd.s32 %v3769_v55, %v3750_v16  ;;  %v3898_v32 = vadd.s32 %v3892_v25, %v3888_v15 }
 0x4c0   : > { %v4113_v24 = vsel %vm3992_vm13, %v4112_v6, %v4111_v43  ;;  %v4263_v28 = vand.u32 2147483647, %v4262_v11  ;;  %vm3896_vm3 = vc.u32 %v3888_v15, %v3892_v25  ;;  %v7773_v13 = vand.u32 3, %v4289_v40  ;;  %v8645_v15 = vld [vmem:[#allocation7_spill] sm:$0xff] }
 0x4c1   : > { %v7767_v31 = vsel %vm7696_vm11, %v7286_v50, %v4113_v24  ;;  %v7769_v1 = vsub.s32 %v3778_v58, %v3781_v38  ;;  %v7777_v39 = vsel %vm3868_vm7, %v3875_v41, %v3877_v20  ;;  %v3894_v16 = vshll.u32 %v7754_v61, 16 }
 0x4c2   : > { %v4118_v18 = vmul.f32 %v7767_v31, %v7767_v31  ;;  %v4266_v55 = vmul.f32 %v4265_v47, %v4263_v28  ;;  %v7785_v59 = vsel %vm3867_vm5, %v3851_v22, %v8641_v23  ;;  %v3897_v62 = vsel %vm3896_vm3, 1, %v8457_v34 }
 0x4c3   : > { %vm3783_vm13 = vcmp.lt.s32.totalorder %v7769_v1, 0  ;;  %v3784_v26 = vsub.s32 0, %v7769_v1  ;;  %vm3900_vm11 = vc.u32 %v3898_v32, %v3894_v16  ;;  %v3891_v8 = vmul.u32 %v3887_v48, %v8643_v19 }
 0x4c4   : > { %v4119_v54 = vmul.f32 -0.001358992, %v4118_v18  ;;  %v4126_v0 = vmul.f32 -0.00019511016, %v4118_v18  ;;  %v4267_v33 = vxor.u32 2147483648, %v4266_v55  ;;  %v3909_v29 = vshrl.u32 %v7777_v39, 16 }
 0x4c5   : > { %v3785_v10 = vsel %vm3783_vm13, %v3784_v26, %v7769_v1  ;;  %v3872_v7 = vsel %vm3870_vm15, %v7633_v63, 2102212464  ;;  %v3899_v36 = vadd.s32 %v3897_v62, %v3891_v8  ;;  %v3901_v58 = vsel %vm3900_vm11, 1, %v8457_v34 }
 0x4c6   : > { %v4120_v37 = vadd.f32 0.041655596, %v4119_v54  ;;  %v4127_v2 = vadd.f32 0.008332121, %v4126_v0  ;;  %v3786_v51 = vclz %v3785_v10  ;;  %v4268_v14 = vsel %vm4147_vm0, %v4267_v33, %v4266_v55 }
 0x4c7   : > { %v3908_v44 = vand.u32 65535, %v7777_v39  ;;  %v7801_v48 = vsel %vm7720_vm12, %v7445_v35, %v4268_v14  ;;  %v7808_v63 = vsel %vm3869_vm9, %v7533_v30, %v3872_v7  ;;  %v3893_v12 = vshrl.u32 %v7748_v9, 16 }
 0x4c8   : > { %v4121_v17 = vmul.f32 %v4120_v37, %v4118_v18  ;;  %v4128_v56 = vmul.f32 %v4127_v2, %v4118_v18  ;;  %v4533_v53 = vadd.s32 4294967294, %v3786_v51  ;;  %v4273_v4 = vmul.f32 %v7801_v48, %v7801_v48 }
 0x4c9   : > { %v7812_v42 = vmul.u32 %v3909_v29, %v8642_v3  ;;  %v3804_v21 = vsub.s32 4, %v7750_v57  ;;  %vm4137_vm5 = vcmp.eq.s32.totalorder %v7757_v52, 0  ;;  %vm4140_vm0 = vcmp.eq.s32.totalorder %v7757_v52, 2 }
 0x4ca   : > { %v4122_v23 = vadd.f32 -0.4999988, %v4121_v17  ;;  %v4129_v41 = vadd.f32 -0.16666654, %v4128_v56  ;;  %vm4534_vm15 = vcmp.lt.s32.totalorder %v4533_v53, 0  ;;  %v3903_v46 = vadd.s32 %v3901_v58, %v3899_v36 }
 0x4cb   : > { %v4274_v20 = vmul.f32 -0.001358992, %v4273_v4  ;;  %v4281_v43 = vmul.f32 -0.00019511016, %v4273_v4  ;;  %v3789_v5 = vsel %vm4534_vm15, 0, %v4533_v53  ;;  %vm4136_vm9 = vcmp.lt.s32.totalorder %v7757_v52, 2 }
 0x4cc   : > { %v4123_v30 = vmul.f32 %v4122_v23, %v4118_v18  ;;  %v4130_v40 = vmul.f32 %v4129_v41, %v4118_v18  ;;  %v3790_v9 = vsub.s32 32, %v3789_v5  ;;  %v7819_v6 = vmul.u32 %v3908_v44, %v8643_v19 }
 0x4cd   : > { %vm3682_vm6 = vcmp.lt.s32.totalorder %v8645_v15, 0  ;;  %vm4133_vm12 = vweird.f32 %v7286_v50  ;;  %v4275_v25 = vadd.f32 0.041655596, %v4274_v20  ;;  %v4282_v11 = vadd.f32 0.008332121, %v4281_v43 }
 0x4ce   : > { %v3794_v38 = vsub.s32 4294967266, %v3789_v5  ;;  %v3914_v27 = vshll.u32 %v7812_v42, 16  ;;  %v4124_v22 = vadd.f32 1.0, %v4123_v30  ;;  %v4131_v24 = vadd.f32 1.0, %v4130_v40 }
 0x4cf   : > { %v3791_v47 = vshll.u32 %v7769_v1, %v3789_v5  ;;  %v3792_v32 = vshrl.u32 %v3774_v45, %v3790_v9  ;;  %v4276_v28 = vmul.f32 %v4275_v25, %v4273_v4  ;;  %v4283_v18 = vmul.f32 %v4282_v11, %v4273_v4  ;;  %v8651_v11 = vld [vmem:[#allocation36_spill] sm:$0xff] }
 0x4d0   : > { %v3795_v39 = vadd.s32 127, %v3794_v38  ;;  %v3910_v16 = vmul.u32 %v3908_v44, %v8642_v3  ;;  %v4132_v55 = vmul.f32 %v4131_v24, %v7767_v31  ;;  %v4141_v26 = vxor.u32 2147483648, %v4124_v22 }
 0x4d1   : > { %v8646_v54 = vand.u32 2147483647, %v8645_v15  ;;  %v3793_v62 = vor.u32 %v3792_v32, %v3791_v47  ;;  %v3904_v33 = vadd.s32 %v3903_v46, %v3893_v12  ;;  %v4277_v10 = vadd.f32 -0.4999988, %v4276_v28 }
 0x4d2   : > { %v4284_v8 = vadd.f32 -0.16666654, %v4283_v18  ;;  %vm4295_vm10 = vcmp.eq.s32.totalorder %v7773_v13, 2  ;;  %v3796_v45 = vshll.u32 %v3795_v39, 23  ;;  %vm3918_vm3 = vc.u32 %v3910_v16, %v3914_v27 }
 0x4d3   : > { %vm7829_vm4 = vcmp.le.f32.partialorder %v8646_v54, 0.7853982  ;;  %v4138_v1 = vxor.u32 2147483648, %v4132_v55  ;;  %vm4292_vm13 = vcmp.eq.s32.totalorder %v7773_v13, 0  ;;  %v3913_v3 = vmul.u32 %v3909_v29, %v8643_v19 }
 0x4d4   : > { %v3916_v31 = vshll.u32 %v7819_v6, 16  ;;  %v3919_v37 = vsel %vm3918_vm3, 1, %v8457_v34  ;;  %v4278_v2 = vmul.f32 %v4277_v10, %v4273_v4  ;;  %v4285_v51 = vmul.f32 %v4284_v8, %v4273_v4 }
 0x4d5   : > { %vm4291_vm11 = vcmp.lt.s32.totalorder %v7773_v13, 2  ;;  %v3797_v7 = vor.u32 4788187, %v3796_v45  ;;  %v3920_v14 = vadd.s32 %v3914_v27, %v3910_v16  ;;  %v4139_v36 = vsel %vm4137_vm5, %v4124_v22, %v4138_v1  ;;  %v8653_v27 = vld [vmem:[#allocation37_spill] sm:$0xff]  ;;  %v8658_v1 = vld [vmem:[#allocation59_spill] sm:$0xff] }
 0x4d6   : > { %v4142_v58 = vsel %vm4140_vm0, %v4141_v26, %v4132_v55  ;;  %vm4288_vm15 = vweird.f32 %v7445_v35  ;;  %v3800_v44 = vcvt.s32.f32 %v3793_v62  ;;  %v3921_v19 = vadd.s32 %v3919_v37, %v3913_v3  ;;  %v8654_v55 = vld [vmem:[#allocation54_spill] sm:$0xff]  ;;  %v8655_v26 = vld [vmem:[#allocation53_spill] sm:$0xff]  ;;  %v8657_v62 = vld [vmem:[#allocation52_spill] sm:$0xff] }
 0x4d7   : > { %v4143_v29 = vsel %vm4136_vm9, %v4139_v36, %v4142_v58  ;;  %v4279_v17 = vadd.f32 1.0, %v4278_v2  ;;  %v4286_v56 = vadd.f32 1.0, %v4285_v51  ;;  %v3798_v53 = vand.u32 2147483647, %v3797_v7  ;;  %v8660_v51 = vld [vmem:[#allocation9_spill] sm:$0xff] }
 0x4d8   : > { %v4144_v4 = vsel %vm4133_vm12, nan, %v4143_v29  ;;  %v3805_v12 = vsel %vm3682_vm6, %v3804_v21, %v7750_v57  ;;  %v3895_v23 = vshrl.u32 %v7754_v61, 16  ;;  %vm3922_vm5 = vc.u32 %v3920_v14, %v3916_v31  ;;  %v8661_v29 = vld [vmem:[#allocation58_spill] sm:$0xff] }
 0x4d9   : > { %4322 = vmatpush.msra.mxu2 %v4144_v4  ;;  %v4287_v41 = vmul.f32 %v4286_v56, %v7801_v48  ;;  %v4296_v20 = vxor.u32 2147483648, %v4279_v17  ;;  %v3801_v43 = vmul.f32 %v3800_v44, %v3798_v53  ;;  %v3923_v52 = vsel %vm3922_vm5, 1, %v8457_v34 }
 0x4da   : > { %v3874_v50 = vsel %vm3868_vm7, %v7785_v59, %v7808_v63  ;;  %v7858_v5 = vadd.s32 %v3904_v33, %v3895_v23  ;;  %v3915_v46 = vshrl.u32 %v7812_v42, 16  ;;  %v3925_v57 = vadd.s32 %v3923_v52, %v3921_v19  ;;  %v8650_v42 = vld [vmem:[#allocation38_spill] sm:$0xff] }
 0x4db   : > { %v4293_v21 = vxor.u32 2147483648, %v4287_v41  ;;  %v3802_v61 = vxor.u32 2147483648, %v3801_v43  ;;  %v3807_v30 = vsel %vm7829_vm4, 0, %v3805_v12  ;;  %v3917_v48 = vshrl.u32 %v7819_v6, 16  ;;  %v8652_v6 = vld [vmem:[#allocation47_spill] sm:$0xff] }
 0x4dc   : > { %v4297_v40 = vsel %vm4295_vm10, %v4296_v20, %v4287_v41  ;;  %v7866_v9 = vadd.s32 %v3920_v14, %v3916_v31  ;;  %v3926_v25 = vadd.s32 %v3925_v57, %v3915_v46  ;;  %vm3403_vm7 = vcmp.lt.s32.totalorder %v8649_v60, 2  ;;  %v8659_v31 = vld [vmem:[#allocation11_spill] sm:$0xff] }
 0x4dd   : > { %v4294_v59 = vsel %vm4292_vm13, %v4279_v17, %v4293_v21  ;;  %v3803_v63 = vsel %vm3682_vm6, %v3802_v61, %v3801_v43  ;;  %v3413_v38 = vsel %vm3403_vm7, %v8651_v11, %v8650_v42  ;;  %v3417_v22 = vsel %vm3403_vm7, %v8653_v27, %v8652_v6  ;;  %v8662_v61 = vld [vmem:[#allocation12_spill] sm:$0xff]  ;;  %v8663_v11 = vld [vmem:[#allocation31_spill] sm:$0xff] }
 0x4de   : > { %v4298_v24 = vsel %vm4291_vm11, %v4294_v59, %v4297_v40  ;;  %v3806_v47 = vsel %vm7829_vm4, %v8645_v15, %v3803_v63  ;;  %v3927_v32 = vadd.s32 %v3926_v25, %v3917_v48  ;;  %vm3930_vm0 = vc.u32 %v7858_v5, %v7866_v9 }
 0x4df   : > { %v4299_v28 = vsel %vm4288_vm15, nan, %v4298_v24  ;;  %v3808_v18 = vmul.f32 %v3806_v47, %v3806_v47  ;;  %v3421_v39 = vand.u32 65535, %v3417_v22  ;;  %v3422_v16 = vshrl.u32 %v3417_v22, 16 }
 0x4e0   : > { %v8656_v54 = vor.u32 %v8654_v55, %v8655_v26  ;;  %4342 = vmatpush.msra.mxu3 %v4299_v28  ;;  %v3824_v33 = vadd.s32 3, %v3807_v30  ;;  %v3931_v0 = vadd.s32 1, %v3927_v32  ;;  %v3444_v10 = vshrl.u32 %v3413_v38, 16 }
 0x4e1   : > { %v3809_v8 = vmul.f32 -0.001358992, %v3808_v18  ;;  %v3816_v45 = vmul.f32 -0.00019511016, %v3808_v18  ;;  %v3928_v3 = vmul.u32 %v8658_v1, %v3874_v50  ;;  %v3424_v35 = vmul.u32 %v3422_v16, %v8659_v31 }
 0x4e2   : > { %v3570_v13 = vsel %vm3560_vm14, %v8656_v54, 1326507024  ;;  %v3932_v37 = vsel %vm3930_vm0, %v3931_v0, %v3927_v32  ;;  %v3423_v2 = vmul.u32 %v3421_v39, %v8659_v31  ;;  %v7899_v7 = vmul.u32 %v3421_v39, %v8660_v51 }
 0x4e3   : > { %v3443_v14 = vand.u32 65535, %v3413_v38  ;;  %v3810_v36 = vadd.f32 0.041655596, %v3809_v8  ;;  %v3817_v58 = vadd.f32 0.008332121, %v3816_v45  ;;  %v3933_v44 = vadd.s32 %v3932_v37, %v3928_v3  ;;  %v8664_v3 = vld [vmem:[#allocation28_spill] sm:$0xff] }
 0x4e4   : > { %v3427_v19 = vshll.u32 %v3424_v35, 16  ;;  %v7904_v17 = vsel %vm3559_vm2, %v8661_v29, %v3570_v13  ;;  %v3825_v56 = vand.u32 3, %v3824_v33  ;;  %v3426_v53 = vmul.u32 %v3422_v16, %v8660_v51 }
 0x4e5   : > { %v7908_v4 = vmul.u32 %v3444_v10, %v8659_v31  ;;  %v3811_v12 = vmul.f32 %v3810_v36, %v3808_v18  ;;  %v3818_v23 = vmul.f32 %v3817_v58, %v3808_v18  ;;  %v3934_v41 = vadd.s32 536870912, %v3933_v44 }
 0x4e6   : > { %vm3431_vm9 = vc.u32 %v3423_v2, %v3427_v19  ;;  %v3429_v20 = vshll.u32 %v7899_v7, 16  ;;  %v3433_v52 = vadd.s32 %v3427_v19, %v3423_v2  ;;  %v7913_v50 = vmul.u32 %v3443_v14, %v8660_v51 }
 0x4e7   : > { %v3432_v43 = vsel %vm3431_vm9, 1, %v8457_v34  ;;  %v3812_v46 = vadd.f32 -0.4999988, %v3811_v12  ;;  %v3819_v57 = vadd.f32 -0.16666654, %v3818_v23  ;;  %v7915_v21 = vshrl.u32 %v3934_v41, 30 }
 0x4e8   : > { %v3386_v30 = vshrl.u32 %v8458_v49, %v8662_v61  ;;  %v3434_v48 = vadd.s32 %v3432_v43, %v3426_v53  ;;  %vm3435_vm6 = vc.u32 %v3433_v52, %v3429_v20  ;;  %v3445_v40 = vmul.u32 %v3443_v14, %v8659_v31  ;;  %v8665_v31 = vld [vmem:[#allocation33_spill] sm:$0xff]  ;;  %v8668_v14 = vld [vmem:[#allocation35_spill] sm:$0xff]  ;;  %v8671_v61 = vld [vmem:[#allocation22_spill] sm:$0xff] }
 0x4e9   : > { %v3449_v25 = vshll.u32 %v7908_v4, 16  ;;  %v3813_v59 = vmul.f32 %v3812_v46, %v3808_v18  ;;  %v3820_v63 = vmul.f32 %v3819_v57, %v3808_v18  ;;  %v3936_v42 = vshll.u32 %v7915_v21, 30  ;;  %v8669_v52 = vld [vmem:[#allocation61_spill] sm:$0xff]  ;;  %v8670_v46 = vld [vmem:[#allocation60_spill] sm:$0xff] }
 0x4ea   : > { %v3407_v38 = vsel %vm3405_vm1, %v8663_v11, 2102212464  ;;  %v3436_v6 = vsel %vm3435_vm6, 1, %v8457_v34  ;;  %v3451_v27 = vshll.u32 %v7913_v50, 16  ;;  %v3428_v39 = vshrl.u32 %v3424_v35, 16  ;;  %v8666_v35 = vld [vmem:[#allocation30_spill] sm:$0xff] }
 0x4eb   : > { %vm3453_vm12 = vc.u32 %v3445_v40, %v3449_v25  ;;  %v3455_v22 = vadd.s32 %v3449_v25, %v3445_v40  ;;  %v3814_v24 = vadd.f32 1.0, %v3813_v59  ;;  %v3821_v32 = vadd.f32 1.0, %v3820_v63 }
 0x4ec   : > { %v7927_v28 = vsub.s32 %v3933_v44, %v3936_v42  ;;  %v3438_v16 = vadd.s32 %v3436_v6, %v3434_v48  ;;  %v3448_v18 = vmul.u32 %v3444_v10, %v8660_v51  ;;  %v3454_v55 = vsel %vm3453_vm12, 1, %v8457_v34  ;;  %v8672_v48 = vld [vmem:[#allocation62_spill] sm:$0xff] }
 0x4ed   : > { %vm3457_vm4 = vc.u32 %v3455_v22, %v3451_v27  ;;  %v3822_v26 = vmul.f32 %v3821_v32, %v3806_v47  ;;  %v3831_v54 = vxor.u32 2147483648, %v3814_v24  ;;  %vm3827_vm10 = vcmp.eq.s32.totalorder %v3825_v56, 0  ;;  %v8674_v32 = vld [vmem:[#allocation49_spill] sm:$0xff] }
 0x4ee   : > { %vm3938_vm1 = vcmp.lt.s32.totalorder %v7927_v28, 0  ;;  %v3939_v13 = vsub.s32 0, %v7927_v28  ;;  %v3439_v33 = vadd.s32 %v3438_v16, %v3428_v39  ;;  %v3456_v0 = vadd.s32 %v3454_v55, %v3448_v18 }
 0x4ef   : > { %v3458_v8 = vsel %vm3457_vm4, 1, %v8457_v34  ;;  %v3828_v45 = vxor.u32 2147483648, %v3822_v26  ;;  %vm3830_vm3 = vcmp.eq.s32.totalorder %v3825_v56, 2  ;;  %v3406_v10 = vsel %vm3402_vm8, %v3386_v30, %v8664_v3  ;;  %v8680_v3 = vld [vmem:[#allocation46_spill] sm:$0xff] }
 0x4f0   : > { %v3940_v1 = vsel %vm3938_vm1, %v3939_v13, %v7927_v28  ;;  %vm3837_vm13 = vcmp.lt.s32.totalorder %v8665_v31, 0  ;;  %vm8667_vm11 = vcmp.lt.s32.totalorder %v8649_v60, 3  ;;  %v3430_v2 = vshrl.u32 %v7899_v7, 16 }
 0x4f1   : > { %v3941_v47 = vclz %v3940_v1  ;;  %v3408_v37 = vsel %vm8667_vm11, %v8666_v35, %v3407_v38  ;;  %v3460_v51 = vadd.s32 %v3458_v8, %v3456_v0  ;;  %vm3249_vm15 = vcmp.lt.s32.totalorder %v8668_v14, 3  ;;  %v8673_v38 = vld [vmem:[#allocation44_spill] sm:$0xff] }
 0x4f2   : > { %vm3826_vm5 = vcmp.lt.s32.totalorder %v3825_v56, 2  ;;  %v3829_v36 = vsel %vm3827_vm10, %v3814_v24, %v3828_v45  ;;  %v3832_v58 = vsel %vm3830_vm3, %v3831_v54, %v3822_v26  ;;  %v3450_v44 = vshrl.u32 %v7908_v4, 16  ;;  %v8679_v54 = vld [vmem:[#allocation51_spill] sm:$0xff]  ;;  %v8685_v26 = vld [vmem:[#allocation56_spill] sm:$0xff] }
 0x4f3   : > { %vm3823_vm0 = vweird.f32 %v8645_v15  ;;  %v3833_v19 = vsel %vm3826_vm5, %v3829_v36, %v3832_v58  ;;  %v4536_v29 = vadd.s32 4294967294, %v3941_v47  ;;  %v7946_v53 = vadd.s32 %v3439_v33, %v3430_v2 }
 0x4f4   : > { %v3834_v12 = vsel %vm3823_vm0, nan, %v3833_v19  ;;  %v3409_v23 = vsel %vm3403_vm7, %v3406_v10, %v3408_v37  ;;  %v3452_v7 = vshrl.u32 %v7913_v50, 16  ;;  %v3461_v41 = vadd.s32 %v3460_v51, %v3450_v44 }
 0x4f5   : > { %4323 = vmatpush.msra.mxu2 %v3834_v12  ;;  %v3929_v56 = vadd.s32 %v7866_v9, %v7858_v5  ;;  %vm4537_vm8 = vcmp.lt.s32.totalorder %v4536_v29, 0  ;;  %v7953_v20 = vadd.s32 %v3455_v22, %v3451_v27  ;;  %vm3558_vm9 = vcmp.lt.s32.totalorder %v8657_v62, 2 }
 0x4f6   : > { %v3944_v15 = vsel %vm4537_vm8, 0, %v4536_v29  ;;  %v3959_v4 = vsub.s32 4, %v7915_v21  ;;  %v3462_v43 = vadd.s32 %v3461_v41, %v3452_v7  ;;  %v3568_v60 = vsel %vm3558_vm9, %v8670_v46, %v8669_v52 }
 0x4f7   : > { %v3945_v50 = vsub.s32 32, %v3944_v15  ;;  %v3949_v57 = vsub.s32 4294967266, %v3944_v15  ;;  %v3463_v30 = vmul.u32 %v8671_v61, %v3409_v23  ;;  %vm3465_vm7 = vc.u32 %v7946_v53, %v7953_v20 }
 0x4f8   : > { %v3946_v5 = vshll.u32 %v7927_v28, %v3944_v15  ;;  %v3466_v9 = vadd.s32 1, %v3462_v43  ;;  %v3572_v40 = vsel %vm3558_vm9, %v8672_v48, %v7904_v17  ;;  %v3598_v25 = vand.u32 65535, %v3568_v60  ;;  %v8675_v28 = vld [vmem:[#allocation43_spill] sm:$0xff]  ;;  %v8682_v48 = vld [vmem:[#allocation16_spill] sm:$0xff] }
 0x4f9   : > { %v3947_v59 = vshrl.u32 %v3929_v56, %v3945_v50  ;;  %v3950_v63 = vadd.s32 127, %v3949_v57  ;;  %v3576_v42 = vand.u32 65535, %v3572_v40  ;;  %v3577_v11 = vshrl.u32 %v3572_v40, 16 }
 0x4fa   : > { %v3575_v6 = vshrl.u32 %v8673_v38, 16  ;;  %v3960_v27 = vsel %vm3837_vm13, %v3959_v4, %v7915_v21  ;;  %v3467_v22 = vsel %vm3465_vm7, %v3466_v9, %v3462_v43  ;;  %v3599_v24 = vshrl.u32 %v3568_v60, 16 }
 0x4fb   : > { %v7977_v39 = vsel %vm3249_vm15, %v8675_v28, %v8674_v32  ;;  %v3948_v17 = vor.u32 %v3947_v59, %v3946_v5  ;;  %v3951_v16 = vshll.u32 %v3950_v63, 23  ;;  %v3468_v18 = vadd.s32 %v3467_v22, %v3463_v30  ;;  %v8681_v5 = vld [vmem:[#allocation57_spill] sm:$0xff] }
 0x4fc   : > { %v8676_v55 = vand.u32 2147483647, %v8665_v31  ;;  %v3579_v13 = vmul.u32 %v3577_v11, %v8679_v54  ;;  %v3580_v21 = vmul.u32 %v3576_v42, %v3575_v6  ;;  %v3601_v33 = vmul.u32 %v3599_v24, %v8679_v54 }
 0x4fd   : > { %v3952_v0 = vor.u32 4788187, %v3951_v16  ;;  %v3469_v45 = vadd.s32 536870912, %v3468_v18  ;;  %v3602_v1 = vmul.u32 %v3598_v25, %v3575_v6  ;;  %v3541_v10 = vshrl.u32 %v8458_v49, %v8680_v3 }
 0x4fe   : > { %vm7981_vm6 = vcmp.le.f32.partialorder %v8676_v55, 0.7853982  ;;  %v3578_v47 = vmul.u32 %v3576_v42, %v8679_v54  ;;  %v3582_v35 = vshll.u32 %v3579_v13, 16  ;;  %v3600_v37 = vmul.u32 %v3598_v25, %v8679_v54 }
 0x4ff   : > { %v3962_v8 = vsel %vm7981_vm6, 0, %v3960_v27  ;;  %v3953_v2 = vand.u32 2147483647, %v3952_v0  ;;  %v3955_v51 = vcvt.s32.f32 %v3948_v17  ;;  %v7993_v36 = vshrl.u32 %v3469_v45, 30  ;;  %v8686_v0 = vld [vmem:[#allocation39_spill] sm:$0xff] }
 0x500   : > { %v3604_v58 = vshll.u32 %v3601_v33, 16  ;;  %v3581_v44 = vmul.u32 %v3577_v11, %v3575_v6  ;;  %v3584_v19 = vshll.u32 %v3580_v21, 16  ;;  %vm3586_vm12 = vc.u32 %v3578_v47, %v3582_v35 }
 0x501   : > { %v3588_v29 = vadd.s32 %v3582_v35, %v3578_v47  ;;  %v3956_v12 = vmul.f32 %v3955_v51, %v3953_v2  ;;  %v3471_v23 = vshll.u32 %v7993_v36, 30  ;;  %v3587_v7 = vsel %vm3586_vm12, 1, %v8457_v34 }
 0x502   : > { %v3606_v41 = vshll.u32 %v3602_v1, 16  ;;  %v3589_v56 = vadd.s32 %v3587_v7, %v3581_v44  ;;  %vm3608_vm1 = vc.u32 %v3600_v37, %v3604_v58  ;;  %v3610_v15 = vadd.s32 %v3604_v58, %v3600_v37 }
 0x503   : > { %vm3590_vm4 = vc.u32 %v3588_v29, %v3584_v19  ;;  %v3957_v4 = vxor.u32 2147483648, %v3956_v12  ;;  %v7997_v43 = vsub.s32 %v3468_v18, %v3471_v23  ;;  %v3603_v46 = vmul.u32 %v3599_v24, %v3575_v6  ;;  %v8683_v24 = vld [vmem:[#allocation55_spill] sm:$0xff] }
 0x504   : > { %v3591_v52 = vsel %vm3590_vm4, 1, %v8457_v34  ;;  %v3583_v60 = vshrl.u32 %v3579_v13, 16  ;;  %v3609_v57 = vsel %vm3608_vm1, 1, %v8457_v34  ;;  %vm3612_vm10 = vc.u32 %v3610_v15, %v3606_v41 }
 0x505   : > { %v3593_v50 = vadd.s32 %v3591_v52, %v3589_v56  ;;  %v3958_v61 = vsel %vm3837_vm13, %v3957_v4, %v3956_v12  ;;  %vm3473_vm3 = vcmp.lt.s32.totalorder %v7997_v43, 0  ;;  %v3474_v30 = vsub.s32 0, %v7997_v43 }
 0x506   : > { %v3562_v9 = vsel %vm3560_vm14, %v8681_v5, 2102212464  ;;  %vm3372_vm11 = vcmp.lt.s32.totalorder %v8682_v48, 0  ;;  %v3961_v40 = vsel %vm7981_vm6, %v8665_v31, %v3958_v61  ;;  %v3611_v59 = vadd.s32 %v3609_v57, %v3603_v46 }
 0x507   : > { %v3594_v25 = vadd.s32 %v3593_v50, %v3583_v60  ;;  %v3613_v63 = vsel %vm3612_vm10, 1, %v8457_v34  ;;  %v3963_v42 = vmul.f32 %v3961_v40, %v3961_v40  ;;  %v3979_v11 = vadd.s32 3, %v3962_v8  ;;  %v8687_v8 = vld [vmem:[#allocation45_spill] sm:$0xff] }
 0x508   : > { %v3475_v6 = vsel %vm3473_vm3, %v3474_v30, %v7997_v43  ;;  %v3585_v27 = vshrl.u32 %v3580_v21, 16  ;;  %vm8684_vm13 = vcmp.lt.s32.totalorder %v8657_v62, 1  ;;  %v3605_v17 = vshrl.u32 %v3601_v33, 16 }
 0x509   : > { %v3476_v22 = vclz %v3475_v6  ;;  %v3561_v32 = vsel %vm8684_vm13, %v3541_v10, %v8683_v24  ;;  %v3615_v16 = vadd.s32 %v3613_v63, %v3611_v59  ;;  %v3964_v18 = vmul.f32 -0.001358992, %v3963_v42 }
 0x50a   : > { %v3971_v55 = vmul.f32 -0.00019511016, %v3963_v42  ;;  %v3563_v54 = vsel %vm3559_vm2, %v8685_v26, %v3562_v9  ;;  %v8020_v13 = vadd.s32 %v3594_v25, %v3585_v27  ;;  %v8688_v45 = vor.u32 %v8686_v0, %v8687_v8  ;;  %v8694_v9 = vld [vmem:[#allocation13_spill] sm:$0xff] }
 0x50b   : > { %vm8689_vm14 = vcmp.lt.s32.totalorder %v8668_v14, 4  ;;  %v4527_v3 = vadd.s32 4294967294, %v3476_v22  ;;  %v3607_v47 = vshrl.u32 %v3602_v1, 16  ;;  %v3616_v10 = vadd.s32 %v3615_v16, %v3605_v17 }
 0x50c   : > { %v8027_v21 = vsel %vm8689_vm14, %v8688_v45, 1326507024  ;;  %v3965_v33 = vadd.f32 0.041655596, %v3964_v18  ;;  %v3972_v35 = vadd.f32 0.008332121, %v3971_v55  ;;  %v8030_v2 = vadd.s32 %v3610_v15, %v3606_v41 }
 0x50d   : > { %v3494_v37 = vsub.s32 4, %v7993_v36  ;;  %v3980_v51 = vand.u32 3, %v3979_v11  ;;  %vm4528_vm2 = vcmp.lt.s32.totalorder %v4527_v3, 0  ;;  %v3564_v58 = vsel %vm3558_vm9, %v3561_v32, %v3563_v54  ;;  %v8696_v55 = vld [vmem:[#allocation20_spill] sm:$0xff]  ;;  %v8697_v54 = vld [vmem:[#allocation10_spill] sm:$0xff] }
 0x50e   : > { %v3617_v44 = vadd.s32 %v3616_v10, %v3607_v47  ;;  %v3966_v19 = vmul.f32 %v3965_v33, %v3963_v42  ;;  %v3973_v29 = vmul.f32 %v3972_v35, %v3963_v42  ;;  %v3479_v12 = vsel %vm4528_vm2, 0, %v4527_v3  ;;  %v8698_v10 = vld [vmem:[#allocation14_spill] sm:$0xff]  ;;  %v8699_v33 = vld [vmem:[#allocation23_spill] sm:$0xff] }
 0x50f   : > { %vm3620_vm5 = vc.u32 %v8020_v13, %v8030_v2  ;;  %v3464_v1 = vadd.s32 %v7953_v20, %v7946_v53  ;;  %v3480_v23 = vsub.s32 32, %v3479_v12  ;;  %v3484_v7 = vsub.s32 4294967266, %v3479_v12  ;;  %v8690_v53 = vld [vmem:[#allocation26_spill] sm:$0xff] }
 0x510   : > { %v3621_v56 = vadd.s32 1, %v3617_v44  ;;  %v3967_v41 = vadd.f32 -0.4999988, %v3966_v19  ;;  %v3974_v15 = vadd.f32 -0.16666654, %v3973_v29  ;;  %v3495_v62 = vsel %vm3372_vm11, %v3494_v37, %v7993_v36 }
 0x511   : > { %v3618_v4 = vmul.u32 %v8673_v38, %v3564_v58  ;;  %v3481_v52 = vshll.u32 %v7997_v43, %v3479_v12  ;;  %v3482_v46 = vshrl.u32 %v3464_v1, %v3480_v23  ;;  %v3485_v60 = vadd.s32 127, %v3484_v7  ;;  %v8695_v43 = vld [vmem:[#allocation21_spill] sm:$0xff] }
 0x512   : > { %v3622_v50 = vsel %vm3620_vm5, %v3621_v56, %v3617_v44  ;;  %v3968_v57 = vmul.f32 %v3967_v41, %v3963_v42  ;;  %v3975_v61 = vmul.f32 %v3974_v15, %v3963_v42  ;;  %vm3093_vm0 = vcmp.lt.s32.totalorder %v8690_v53, 2 }
 0x513   : > { %v3623_v30 = vadd.s32 %v3622_v50, %v3618_v4  ;;  %vm3978_vm8 = vweird.f32 %v8665_v31  ;;  %v8691_v20 = vand.u32 2147483647, %v8682_v48  ;;  %v3483_v36 = vor.u32 %v3482_v46, %v3481_v52  ;;  %v8700_v52 = vld [vmem:[#allocation42_spill] sm:$0xff] }
 0x514   : > { %v3486_v38 = vshll.u32 %v3485_v60, 23  ;;  %v3107_v25 = vsel %vm3093_vm0, %v8695_v43, %v8694_v9  ;;  %v3969_v59 = vadd.f32 1.0, %v3968_v57  ;;  %v3976_v63 = vadd.f32 1.0, %v3975_v61 }
 0x515   : > { %vm8047_vm9 = vcmp.le.f32.partialorder %v8691_v20, 0.7853982  ;;  %v3624_v42 = vadd.s32 536870912, %v3623_v30  ;;  %v3111_v11 = vand.u32 65535, %v3107_v25  ;;  %vm3981_vm7 = vcmp.lt.s32.totalorder %v3980_v51, 2 }
 0x516   : > { %v3487_v6 = vor.u32 4788187, %v3486_v38  ;;  %v3497_v27 = vsel %vm8047_vm9, 0, %v3495_v62  ;;  %v3112_v22 = vshrl.u32 %v3107_v25, 16  ;;  %v3977_v24 = vmul.f32 %v3976_v63, %v3961_v40  ;;  %v8702_v38 = vld [vmem:[#allocation18_spill] sm:$0xff] }
 0x517   : > { %vm3982_vm6 = vcmp.eq.s32.totalorder %v3980_v51, 0  ;;  %v3986_v32 = vxor.u32 2147483648, %v3969_v59  ;;  %v8057_v17 = vshrl.u32 %v3624_v42, 30  ;;  %v3490_v18 = vcvt.s32.f32 %v3483_v36  ;;  %v8701_v36 = vld [vmem:[#allocation25_spill] sm:$0xff] }
 0x518   : > { %v3488_v16 = vand.u32 2147483647, %v3487_v6  ;;  %v3114_v26 = vmul.u32 %v3112_v22, %v8696_v55  ;;  %v8061_v0 = vmul.u32 %v3111_v11, %v8697_v54  ;;  %v3983_v8 = vxor.u32 2147483648, %v3977_v24 }
 0x519   : > { %vm3985_vm12 = vcmp.eq.s32.totalorder %v3980_v51, 2  ;;  %v3514_v45 = vadd.s32 3, %v3497_v27  ;;  %v3626_v3 = vshll.u32 %v8057_v17, 30  ;;  %v3103_v40 = vsel %vm3093_vm0, %v8699_v33, %v8698_v10 }
 0x51a   : > { %v3491_v47 = vmul.f32 %v3490_v18, %v3488_v16  ;;  %v3113_v35 = vmul.u32 %v3111_v11, %v8696_v55  ;;  %v3117_v37 = vshll.u32 %v3114_v26, 16  ;;  %v3984_v58 = vsel %vm3982_vm6, %v3969_v59, %v3983_v8  ;;  %v8704_v11 = vld [vmem:[#allocation17_spill] sm:$0xff] }
 0x51b   : > { %v3987_v44 = vsel %vm3985_vm12, %v3986_v32, %v3977_v24  ;;  %v8069_v19 = vsub.s32 %v3623_v30, %v3626_v3  ;;  %v3116_v29 = vmul.u32 %v3112_v22, %v8697_v54  ;;  %v3119_v23 = vshll.u32 %v8061_v0, 16  ;;  %v8706_v8 = vld [vmem:[#allocation5_spill] sm:$0xff] }
 0x51c   : > { %v3988_v12 = vsel %vm3981_vm7, %v3984_v58, %v3987_v44  ;;  %v3492_v1 = vxor.u32 2147483648, %v3491_v47  ;;  %vm3121_vm4 = vc.u32 %v3113_v35, %v3117_v37  ;;  %v3123_v62 = vadd.s32 %v3117_v37, %v3113_v35 }
 0x51d   : > { %v3989_v7 = vsel %vm3978_vm8, nan, %v3988_v12  ;;  %vm3628_vm1 = vcmp.lt.s32.totalorder %v8069_v19, 0  ;;  %v3629_v56 = vsub.s32 0, %v8069_v19  ;;  %v3122_v41 = vsel %vm3121_vm4, 1, %v8457_v34 }
 0x51e   : > { %4343 = vmatpush.msra.mxu3 %v3989_v7  ;;  %v3493_v15 = vsel %vm3372_vm11, %v3492_v1, %v3491_v47  ;;  %v3124_v51 = vadd.s32 %v3122_v41, %v3116_v29  ;;  %v3134_v4 = vshrl.u32 %v3103_v40, 16  ;;  %v8085_v46 = vsel %vm3249_vm15, %v8700_v52, %v8027_v21 }
 0x51f   : > { %v8090_v31 = vsel %vm8047_vm9, %v8682_v48, %v3493_v15  ;;  %v3630_v60 = vsel %vm3628_vm1, %v3629_v56, %v8069_v19  ;;  %v3133_v50 = vand.u32 65535, %v3103_v40  ;;  %vm3125_vm10 = vc.u32 %v3123_v62, %v3119_v23  ;;  %v8708_v40 = vld [vmem:[#allocation24_spill] sm:$0xff] }
 0x520   : > { %v3498_v57 = vmul.f32 %v8090_v31, %v8090_v31  ;;  %v3631_v61 = vclz %v3630_v60  ;;  %v3136_v30 = vmul.u32 %v3134_v4, %v8696_v55  ;;  %v8096_v20 = vand.u32 3, %v3514_v45 }
 0x521   : > { %v3076_v21 = vshrl.u32 %v8458_v49, %v8701_v36  ;;  %vm8703_vm3 = vcmp.lt.s32.totalorder %v8690_v53, 4  ;;  %v3126_v9 = vsel %vm3125_vm10, 1, %v8457_v34  ;;  %v3619_v42 = vadd.s32 %v8030_v2, %v8020_v13 }
 0x522   : > { %v3097_v5 = vsel %vm8703_vm3, %v8702_v38, 2102212464  ;;  %v3499_v43 = vmul.f32 -0.001358992, %v3498_v57  ;;  %v3506_v25 = vmul.f32 -0.00019511016, %v3498_v57  ;;  %v3128_v63 = vadd.s32 %v3126_v9, %v3124_v51 }
 0x523   : > { %v4530_v59 = vadd.s32 4294967294, %v3631_v61  ;;  %vm8705_vm11 = vcmp.lt.s32.totalorder %v8690_v53, 1  ;;  %v3137_v27 = vmul.u32 %v3133_v50, %v8697_v54  ;;  %v3139_v22 = vshll.u32 %v3136_v30, 16 }
 0x524   : > { %v3096_v6 = vsel %vm8705_vm11, %v3076_v21, %v8704_v11  ;;  %v3500_v24 = vadd.f32 0.041655596, %v3499_v43  ;;  %v3507_v32 = vadd.f32 0.008332121, %v3506_v25  ;;  %v3118_v16 = vshrl.u32 %v3114_v26, 16 }
 0x525   : > { %vm4531_vm13 = vcmp.lt.s32.totalorder %v4530_v59, 0  ;;  %vm8707_vm14 = vcmp.lt.s32.totalorder %v8690_v53, 3  ;;  %v3135_v3 = vmul.u32 %v3133_v50, %v8696_v55  ;;  %v3138_v13 = vmul.u32 %v3134_v4, %v8697_v54 }
 0x526   : > { %v3634_v18 = vsel %vm4531_vm13, 0, %v4530_v59  ;;  %v3098_v45 = vsel %vm8707_vm14, %v8706_v8, %v3097_v5  ;;  %v3501_v2 = vmul.f32 %v3500_v24, %v3498_v57  ;;  %v3508_v47 = vmul.f32 %v3507_v32, %v3498_v57  ;;  %v8714_v24 = vld [vmem:[#allocation50_spill] sm:$0xff] }
 0x527   : > { %v3635_v10 = vsub.s32 32, %v3634_v18  ;;  %v3129_v33 = vadd.s32 %v3128_v63, %v3118_v16  ;;  %vm3527_vm2 = vcmp.lt.s32.totalorder %v8708_v40, 0  ;;  %v3639_v35 = vsub.s32 4294967266, %v3634_v18 }
 0x528   : > { %v3141_v37 = vshll.u32 %v3137_v27, 16  ;;  %vm3143_vm5 = vc.u32 %v3135_v3, %v3139_v22  ;;  %v3145_v58 = vadd.s32 %v3139_v22, %v3135_v3  ;;  %v3502_v26 = vadd.f32 -0.4999988, %v3501_v2 }
 0x529   : > { %v3509_v44 = vadd.f32 -0.16666654, %v3508_v47  ;;  %v3637_v29 = vshrl.u32 %v3619_v42, %v3635_v10  ;;  %v3144_v12 = vsel %vm3143_vm5, 1, %v8457_v34  ;;  %vm3517_vm8 = vcmp.eq.s32.totalorder %v8096_v20, 0  ;;  %v8715_v10 = vld [vmem:[#allocation29_spill] sm:$0xff] }
 0x52a   : > { %v3636_v55 = vshll.u32 %v8069_v19, %v3634_v18  ;;  %v3640_v54 = vadd.s32 127, %v3639_v35  ;;  %v3146_v1 = vadd.s32 %v3144_v12, %v3138_v13  ;;  %vm3147_vm9 = vc.u32 %v3145_v58, %v3141_v37 }
 0x52b   : > { %v3503_v23 = vmul.f32 %v3502_v26, %v3498_v57  ;;  %v3510_v7 = vmul.f32 %v3509_v44, %v3498_v57  ;;  %vm3516_vm7 = vcmp.lt.s32.totalorder %v8096_v20, 2  ;;  %v3120_v56 = vshrl.u32 %v8061_v0, 16 }
 0x52c   : > { %v3148_v41 = vsel %vm3147_vm9, 1, %v8457_v34  ;;  %vm3513_vm6 = vweird.f32 %v8682_v48  ;;  %v8709_v15 = vand.u32 2147483647, %v8708_v40  ;;  %v3638_v19 = vor.u32 %v3637_v29, %v3636_v55 }
 0x52d   : > { %v3641_v51 = vshll.u32 %v3640_v54, 23  ;;  %v3140_v4 = vshrl.u32 %v3136_v30, 16  ;;  %v3150_v52 = vadd.s32 %v3148_v41, %v3146_v1  ;;  %v3504_v60 = vadd.f32 1.0, %v3503_v23 }
 0x52e   : > { %vm8125_vm12 = vcmp.le.f32.partialorder %v8709_v15, 0.7853982  ;;  %v3511_v50 = vadd.f32 1.0, %v3510_v7  ;;  %v3649_v57 = vsub.s32 4, %v8057_v17  ;;  %v8130_v61 = vadd.s32 %v3129_v33, %v3120_v56 }
 0x52f   : > { %vm3520_vm4 = vcmp.eq.s32.totalorder %v8096_v20, 2  ;;  %v3642_v0 = vor.u32 4788187, %v3641_v51  ;;  %v3142_v36 = vshrl.u32 %v3137_v27, 16  ;;  %v3151_v21 = vadd.s32 %v3150_v52, %v3140_v4 }
 0x530   : > { %v3512_v38 = vmul.f32 %v3511_v50, %v8090_v31  ;;  %v3521_v5 = vxor.u32 2147483648, %v3504_v60  ;;  %v3099_v9 = vsel %vm3093_vm0, %v3096_v6, %v3098_v45  ;;  %v8136_v43 = vadd.s32 %v3145_v58, %v3141_v37  ;;  %v8712_v31 = vld [vmem:[#allocation48_spill] sm:$0xff]  ;;  %v8713_v6 = vld [vmem:[#allocation15_spill] sm:$0xff] }
 0x531   : > { %v3643_v30 = vand.u32 2147483647, %v3642_v0  ;;  %v3645_v25 = vcvt.s32.f32 %v3638_v19  ;;  %v3152_v59 = vadd.s32 %v3151_v21, %v3142_v36  ;;  %vm3248_vm1 = vcmp.lt.s32.totalorder %v8668_v14, 2  ;;  %v8716_v37 = vld [vmem:[#allocation32_spill] sm:$0xff] }
 0x532   : > { %v3518_v63 = vxor.u32 2147483648, %v3512_v38  ;;  %v3650_v42 = vsel %vm3527_vm2, %v3649_v57, %v8057_v17  ;;  %vm3155_vm10 = vc.u32 %v8130_v61, %v8136_v43  ;;  %v3258_v53 = vsel %vm3248_vm1, %v8712_v31, %v7977_v39 }
 0x533   : > { %v3646_v11 = vmul.f32 %v3645_v25, %v3643_v30  ;;  %v3153_v27 = vmul.u32 %v8713_v6, %v3099_v9  ;;  %v3156_v22 = vadd.s32 1, %v3152_v59  ;;  %v3262_v32 = vsel %vm3248_vm1, %v8714_v24, %v8085_v46 }
 0x534   : > { %v3519_v17 = vsel %vm3517_vm8, %v3504_v60, %v3518_v63  ;;  %v3522_v16 = vsel %vm3520_vm4, %v3521_v5, %v3512_v38  ;;  %v3266_v18 = vand.u32 65535, %v3262_v32  ;;  %v3267_v8 = vshrl.u32 %v3262_v32, 16 }
 0x535   : > { %v3523_v39 = vsel %vm3516_vm7, %v3519_v17, %v3522_v16  ;;  %v3647_v45 = vxor.u32 2147483648, %v3646_v11  ;;  %v3157_v3 = vsel %vm3155_vm10, %v3156_v22, %v3152_v59  ;;  %v3289_v13 = vshrl.u32 %v3258_v53, 16 }
 0x536   : > { %v3524_v2 = vsel %vm3513_vm6, nan, %v3523_v39  ;;  %v3652_v46 = vsel %vm8125_vm12, 0, %v3650_v42  ;;  %v3158_v47 = vadd.s32 %v3157_v3, %v3153_v27  ;;  %v3269_v33 = vmul.u32 %v3267_v8, %v8715_v10  ;;  %v8719_v3 = vld [vmem:[#allocation40_spill] sm:$0xff] }
 0x537   : > { %4324 = vmatpush.msra.mxu2 %v3524_v2  ;;  %v3648_v35 = vsel %vm3527_vm2, %v3647_v45, %v3646_v11  ;;  %v8167_v58 = vmul.u32 %v3266_v18, %v8716_v37  ;;  %v3268_v48 = vmul.u32 %v3266_v18, %v8715_v10  ;;  %v3669_v12 = vadd.s32 3, %v3652_v46  ;;  %v8721_v2 = vld [vmem:[#allocation41_spill] sm:$0xff] }
 0x538   : > { %v3651_v20 = vsel %vm8125_vm12, %v8708_v40, %v3648_v35  ;;  %v3159_v26 = vadd.s32 536870912, %v3158_v47  ;;  %v3272_v44 = vshll.u32 %v3269_v33, 16  ;;  %v3288_v55 = vand.u32 65535, %v3258_v53 }
 0x539   : > { %v3653_v29 = vmul.f32 %v3651_v20, %v3651_v20  ;;  %v8174_v54 = vmul.u32 %v3289_v13, %v8715_v10  ;;  %v3274_v23 = vshll.u32 %v8167_v58, 16  ;;  %v3271_v15 = vmul.u32 %v3267_v8, %v8716_v37 }
 0x53a   : > { %v8176_v1 = vshrl.u32 %v3159_v26, 30  ;;  %vm3276_vm0 = vc.u32 %v3268_v48, %v3272_v44  ;;  %v3278_v7 = vadd.s32 %v3272_v44, %v3268_v48  ;;  %v3292_v0 = vmul.u32 %v3288_v55, %v8716_v37 }
 0x53b   : > { %v3654_v56 = vmul.f32 -0.001358992, %v3653_v29  ;;  %v3661_v41 = vmul.f32 -0.00019511016, %v3653_v29  ;;  %v3277_v62 = vsel %vm3276_vm0, 1, %v8457_v34  ;;  %v3294_v60 = vshll.u32 %v8174_v54, 16 }
 0x53c   : > { %v3161_v19 = vshll.u32 %v8176_v1, 30  ;;  %vm3280_vm3 = vc.u32 %v3278_v7, %v3274_v23  ;;  %v3279_v52 = vadd.s32 %v3277_v62, %v3271_v15  ;;  %v3670_v38 = vand.u32 3, %v3669_v12 }
 0x53d   : > { %v3655_v51 = vadd.f32 0.041655596, %v3654_v56  ;;  %v3662_v4 = vadd.f32 0.008332121, %v3661_v41  ;;  %v3281_v57 = vsel %vm3280_vm3, 1, %v8457_v34  ;;  %v3290_v5 = vmul.u32 %v3288_v55, %v8715_v10 }
 0x53e   : > { %v8183_v50 = vsub.s32 %v3158_v47, %v3161_v19  ;;  %vm8717_vm13 = vcmp.lt.s32.totalorder %v8668_v14, 4  ;;  %v3293_v25 = vmul.u32 %v3289_v13, %v8716_v37  ;;  %v3283_v42 = vadd.s32 %v3281_v57, %v3279_v52 }
 0x53f   : > { %v3656_v36 = vmul.f32 %v3655_v51, %v3653_v29  ;;  %v3663_v21 = vmul.f32 %v3662_v4, %v3653_v29  ;;  %v3252_v30 = vsel %vm8717_vm13, %v8675_v28, 2102212464  ;;  %vm3298_vm14 = vc.u32 %v3290_v5, %v3294_v60  ;;  %v8718_v28 = vld [vmem:[#allocation34_spill] sm:$0xff]  ;;  %v8722_v4 = vld [vmem:[#allocation27_spill] sm:$0xff] }
 0x540   : > { %vm3163_vm11 = vcmp.lt.s32.totalorder %v8183_v50, 0  ;;  %v3164_v9 = vsub.s32 0, %v8183_v50  ;;  %v3296_v53 = vshll.u32 %v3292_v0, 16  ;;  %v3299_v11 = vsel %vm3298_vm14, 1, %v8457_v34 }
 0x541   : > { %v3657_v59 = vadd.f32 -0.4999988, %v3656_v36  ;;  %v3664_v63 = vadd.f32 -0.16666654, %v3663_v21  ;;  %v3300_v6 = vadd.s32 %v3294_v60, %v3290_v5  ;;  %v3273_v32 = vshrl.u32 %v3269_v33, 16 }
 0x542   : > { %v3165_v31 = vsel %vm3163_vm11, %v3164_v9, %v8183_v50  ;;  %vm3668_vm2 = vweird.f32 %v8708_v40  ;;  %vm3671_vm5 = vcmp.lt.s32.totalorder %v3670_v38, 2  ;;  %v3231_v17 = vshrl.u32 %v8458_v49, %v8718_v28 }
 0x543   : > { %v3658_v27 = vmul.f32 %v3657_v59, %v3653_v29  ;;  %v3665_v22 = vmul.f32 %v3664_v63, %v3653_v29  ;;  %v3166_v24 = vclz %v3165_v31  ;;  %v3301_v16 = vadd.s32 %v3299_v11, %v3293_v25 }
 0x544   : > { %vm3302_vm8 = vc.u32 %v3300_v6, %v3296_v53  ;;  %v3284_v45 = vadd.s32 %v3283_v42, %v3273_v32  ;;  %vm8720_vm9 = vcmp.lt.s32.totalorder %v8668_v14, 1  ;;  %v3253_v46 = vsel %vm3249_vm15, %v8721_v2, %v3252_v30  ;;  %v8723_v30 = vld [vmem:[#allocation8_spill] sm:$0xff] }
 0x545   : > { %v3659_v18 = vadd.f32 1.0, %v3658_v27  ;;  %v3666_v8 = vadd.f32 1.0, %v3665_v22  ;;  %v4521_v39 = vadd.s32 4294967294, %v3166_v24  ;;  %v3251_v13 = vsel %vm8720_vm9, %v3231_v17, %v8719_v3 }
 0x546   : > { %v3275_v47 = vshrl.u32 %v8167_v58, 16  ;;  %v3303_v10 = vsel %vm3302_vm8, 1, %v8457_v34  ;;  %vm3672_vm6 = vcmp.eq.s32.totalorder %v3670_v38, 0  ;;  %vm3675_vm12 = vcmp.eq.s32.totalorder %v3670_v38, 2 }
 0x547   : > { %v3667_v33 = vmul.f32 %v3666_v8, %v3651_v20  ;;  %v3676_v49 = vxor.u32 2147483648, %v3659_v18  ;;  %vm4522_vm7 = vcmp.lt.s32.totalorder %v4521_v39, 0  ;;  %v3305_v35 = vadd.s32 %v3303_v10, %v3301_v16 }
 0x548   : > { %v3169_v37 = vsel %vm4522_vm7, 0, %v4521_v39  ;;  %v3295_v26 = vshrl.u32 %v8174_v54, 16  ;;  %v3154_v44 = vadd.s32 %v8136_v43, %v8130_v61  ;;  %v3285_v12 = vadd.s32 %v3284_v45, %v3275_v47 }
 0x549   : > { %v3673_v48 = vxor.u32 2147483648, %v3667_v33  ;;  %v3170_v29 = vsub.s32 32, %v3169_v37  ;;  %v3174_v55 = vsub.s32 4294967266, %v3169_v37  ;;  %v3254_v58 = vsel %vm3248_vm1, %v3251_v13, %v3253_v46 }
 0x54a   : > { %v3297_v34 = vshrl.u32 %v3292_v0, 16  ;;  %v3306_v20 = vadd.s32 %v3305_v35, %v3295_v26  ;;  %v3677_v7 = vsel %vm3675_vm12, %v3676_v49, %v3667_v33  ;;  %v3304_v41 = vadd.s32 %v3300_v6, %v3296_v53 }
 0x54b   : > { %v3674_v23 = vsel %vm3672_vm6, %v3659_v18, %v3673_v48  ;;  %v3172_v56 = vshrl.u32 %v3154_v44, %v3170_v29  ;;  %v3171_v54 = vshll.u32 %v8183_v50, %v3169_v37  ;;  %v3175_v62 = vadd.s32 127, %v3174_v55 }
 0x54c   : > { %v3678_v15 = vsel %vm3671_vm5, %v3674_v23, %v3677_v7  ;;  %v3307_v19 = vadd.s32 %v3306_v20, %v3297_v34  ;;  %vm3310_vm15 = vc.u32 %v3285_v12, %v3304_v41  ;;  %v3308_v52 = vmul.u32 %v8722_v4, %v3254_v58 }
 0x54d   : > { %v3679_v61 = vsel %vm3668_vm2, nan, %v3678_v15  ;;  %v3173_v43 = vor.u32 %v3172_v56, %v3171_v54  ;;  %v3176_v14 = vshll.u32 %v3175_v62, 23  ;;  %vm3062_vm4 = vcmp.lt.s32.totalorder %v8723_v30, 0  ;;  %v4300_v62 = vld [vmem:[%s8284_s5] sm:$0x7] }
 0x54e   : > { %4344 = vmatpush.msra.mxu3 %v3679_v61  ;;  %v3311_v51 = vadd.s32 1, %v3307_v19  ;;  %v8724_v25 = vand.u32 2147483647, %v8723_v30  ;;  %v3184_v42 = vsub.s32 4, %v8176_v1  ;;  %v3309_v33 = vadd.s32 %v3304_v41, %v3285_v12 }
 0x54f   : > { %v3177_v60 = vor.u32 4788187, %v3176_v14  ;;  %v3180_v21 = vcvt.s32.f32 %v3173_v43  ;;  %vm3203_vm14 = vweird.f32 %v8723_v30  ;;  %vm8727_vm2 = vcmask 261120   ;;  %v8728_v14 = vld [vmem:[#allocation6_spill] sm:$0xff] }
 0x550   : > { %v3312_v57 = vsel %vm3310_vm15, %v3311_v51, %v3307_v19  ;;  %vm8223_vm1 = vcmp.le.f32.partialorder %v8724_v25, 0.7853982  ;;  %v3185_v24 = vsel %vm3062_vm4, %v3184_v42, %v8176_v1  ;;  %vm3217_vm5 = vcmp.lt.s32.totalorder %v8728_v14, 0  ;;  %vm8730_vm15 = vmmov %vm8727_vm2 }
 0x551   : > { %v3313_v0 = vadd.s32 %v3312_v57, %v3308_v52  ;;  %v3178_v36 = vand.u32 2147483647, %v3177_v60  ;;  %v3187_v18 = vsel %vm8223_vm1, 0, %v3185_v24  ;;  %v8729_v51 = vand.u32 2147483647, %v8728_v14 }
 0x552   : > { %v3204_v2 = vadd.s32 3, %v3187_v18  ;;  %vm3358_vm12 = vweird.f32 %v8728_v14 }
 0x553   : > { %v3314_v38 = vadd.s32 536870912, %v3313_v0  ;;  %v3181_v5 = vmul.f32 %v3180_v21, %v3178_v36  ;;  %vm3216_vm8 = vcmp.le.f32.partialorder %v8729_v51, 0.7853982 }
 0x554   : > { %v3205_v48 = vand.u32 3, %v3204_v2 }
 0x555   : > { %v8217_v50 = vshrl.u32 %v3314_v38, 30  ;;  %v3182_v9 = vxor.u32 2147483648, %v3181_v5 }
 0x556   : > { %vm3207_vm3 = vcmp.eq.s32.totalorder %v3205_v48, 0  ;;  %vm3210_vm11 = vcmp.eq.s32.totalorder %v3205_v48, 2  ;;  %vm3206_vm13 = vcmp.lt.s32.totalorder %v3205_v48, 2 }
 0x557   : > { %v3316_v40 = vshll.u32 %v8217_v50, 30  ;;  %v3183_v63 = vsel %vm3062_vm4, %v3182_v9, %v3181_v5  ;;  %v3339_v52 = vsub.s32 4, %v8217_v50  ;;  %vm4353_vm4 = vcmask 1043456  }
 0x558   : > { %v3186_v31 = vsel %vm8223_vm1, %v8723_v30, %v3183_v63 }
 0x559   : > { %v3317_v53 = vsub.s32 %v3313_v0, %v3316_v40  ;;  %v3188_v11 = vmul.f32 %v3186_v31, %v3186_v31  ;;  %v3340_v21 = vsel %vm3217_vm5, %v3339_v52, %v8217_v50 }
 0x55a   : > { %v3342_v9 = vsel %vm3216_vm8, 0, %v3340_v21 }
 0x55b   : > { %vm3318_vm10 = vcmp.lt.s32.totalorder %v3317_v53, 0  ;;  %v3319_v6 = vsub.s32 0, %v3317_v53  ;;  %v3189_v27 = vmul.f32 -0.001358992, %v3188_v11  ;;  %v3196_v22 = vmul.f32 -0.00019511016, %v3188_v11 }
 0x55c   : > { %v3359_v63 = vadd.s32 3, %v3342_v9 }
 0x55d   : > { %v3320_v32 = vsel %vm3318_vm10, %v3319_v6, %v3317_v53  ;;  %v3190_v28 = vadd.f32 0.041655596, %v3189_v27  ;;  %v3197_v17 = vadd.f32 0.008332121, %v3196_v22 }
 0x55e   : > { %v3321_v16 = vclz %v3320_v32  ;;  %v3360_v6 = vand.u32 3, %v3359_v63 }
 0x55f   : > { %v3191_v8 = vmul.f32 %v3190_v28, %v3188_v11  ;;  %v3198_v39 = vmul.f32 %v3197_v17, %v3188_v11 }
 0x560   : > { %v4524_v45 = vadd.s32 4294967294, %v3321_v16  ;;  %vm3362_vm9 = vcmp.eq.s32.totalorder %v3360_v6, 0  ;;  %vm3365_vm7 = vcmp.eq.s32.totalorder %v3360_v6, 2  ;;  %vm3361_vm6 = vcmp.lt.s32.totalorder %v3360_v6, 2  ;;  %v4305_v16 = vpop.permute.xlu0 %4304 }
 0x561   : > { %v3192_v3 = vadd.f32 -0.4999988, %v3191_v8  ;;  %v3199_v13 = vadd.f32 -0.16666654, %v3198_v39 }
 0x562   : > { %vm4525_vm0 = vcmp.lt.s32.totalorder %v4524_v45, 0 }
 0x563   : > { %v3324_v46 = vsel %vm4525_vm0, 0, %v4524_v45  ;;  %v3193_v47 = vmul.f32 %v3192_v3, %v3188_v11  ;;  %v3200_v10 = vmul.f32 %v3199_v13, %v3188_v11 }
 0x564   : > { %v3325_v49 = vsub.s32 32, %v3324_v46  ;;  %v3329_v1 = vsub.s32 4294967266, %v3324_v46  ;;  %v3326_v44 = vshll.u32 %v3317_v53, %v3324_v46 }
 0x565   : > { %v3194_v35 = vadd.f32 1.0, %v3193_v47  ;;  %v3201_v37 = vadd.f32 1.0, %v3200_v10 }
 0x566   : > { %v3327_v26 = vshrl.u32 %v3309_v33, %v3325_v49  ;;  %v3330_v29 = vadd.s32 127, %v3329_v1 }
 0x567   : > { %v3202_v55 = vmul.f32 %v3201_v37, %v3186_v31  ;;  %v3211_v58 = vxor.u32 2147483648, %v3194_v35 }
 0x568   : > { %v3328_v34 = vor.u32 %v3327_v26, %v3326_v44  ;;  %v3331_v20 = vshll.u32 %v3330_v29, 23 }
 0x569   : > { %v3208_v23 = vxor.u32 2147483648, %v3202_v55  ;;  %v3212_v15 = vsel %vm3210_vm11, %v3211_v58, %v3202_v55 }
 0x56a   : > { %v3332_v7 = vor.u32 4788187, %v3331_v20  ;;  %v3335_v54 = vcvt.s32.f32 %v3328_v34 }
 0x56b   : > { %v3209_v56 = vsel %vm3207_vm3, %v3194_v35, %v3208_v23 }
 0x56c   : > { %v3213_v12 = vsel %vm3206_vm13, %v3209_v56, %v3212_v15  ;;  %v3333_v41 = vand.u32 2147483647, %v3332_v7 }
 0x56d   : > { %v3214_v19 = vsel %vm3203_vm14, nan, %v3213_v12 }
 0x56e   : > { %4325 = vmatpush.msra.mxu2 %v3214_v19  ;;  %v3336_v61 = vmul.f32 %v3335_v54, %v3333_v41 }
 0x56f   : > { %4544 = vmatmul.msk.f32.vlgmr.msra.gmra.mxu2 %vm8727_vm2, %v4300_v62 }
 0x570   : > { %v3337_v43 = vxor.u32 2147483648, %v3336_v61 }
 0x572   : > { %v3338_v4 = vsel %vm3217_vm5, %v3337_v43, %v3336_v61 }
 0x573   : > { %v3341_v60 = vsel %vm3216_vm8, %v8728_v14, %v3338_v4 }
 0x574   : > { %v3343_v57 = vmul.f32 %v3341_v60, %v3341_v60 }
 0x576   : > { %v3344_v0 = vmul.f32 -0.001358992, %v3343_v57  ;;  %v3351_v36 = vmul.f32 -0.00019511016, %v3343_v57 }
 0x578   : > { %v3345_v38 = vadd.f32 0.041655596, %v3344_v0  ;;  %v3352_v5 = vadd.f32 0.008332121, %v3351_v36 }
 0x57a   : > { %v3346_v30 = vmul.f32 %v3345_v38, %v3343_v57  ;;  %v3353_v40 = vmul.f32 %v3352_v5, %v3343_v57 }
 0x57c   : > { %v3347_v25 = vadd.f32 -0.4999988, %v3346_v30  ;;  %v3354_v59 = vadd.f32 -0.16666654, %v3353_v40 }
 0x57e   : > { %v3348_v42 = vmul.f32 %v3347_v25, %v3343_v57  ;;  %v3355_v31 = vmul.f32 %v3354_v59, %v3343_v57 }
 0x580   : > { %v3349_v53 = vadd.f32 1.0, %v3348_v42  ;;  %v3356_v11 = vadd.f32 1.0, %v3355_v31 }
 0x582   : > { %v3357_v27 = vmul.f32 %v3356_v11, %v3341_v60  ;;  %v3366_v22 = vxor.u32 2147483648, %v3349_v53 }
 0x584   : > { %v3363_v24 = vxor.u32 2147483648, %v3357_v27  ;;  %v3367_v32 = vsel %vm3365_vm7, %v3366_v22, %v3357_v27 }
 0x586   : > { %v3364_v50 = vsel %vm3362_vm9, %v3349_v53, %v3363_v24 }
 0x587   : > { %v3368_v28 = vsel %vm3361_vm6, %v3364_v50, %v3367_v32 }
 0x588   : > { %v3369_v17 = vsel %vm3358_vm12, nan, %v3368_v28 }
 0x589   : > { %4345 = vmatpush.msra.mxu3 %v3369_v17 }
 0x58a   : > { %4545 = vmatmul.msk.f32.vlgmr.msra.gmra.mxu3 %vm8730_vm15, %v4300_v62 }
 0x5f2   : > { %v4327_v18 = vpop.f32.mrf.mxu2 }
 0x5f3   : > { %v4328_v45 = vadd.f32 %v4327_v18, %v4305_v16 }
 0x60d   : > { %v4347_v8 = vpop.f32.mrf.mxu3 }
 0x60e   : > { %v4348_v39 = vadd.f32 %v4347_v8, %v4305_v16 }
 0x610   : > { %v4352_v3 = vrot.slane %v4348_v39, 4 }
 0x612   : > { %v4354_v13 = vsel %vm4353_vm4, %v4328_v45, %v4352_v3 }
 0x613   : > { %4356 = vst [vmem:[%s272_s20] sm:$0x77] %v4354_v13 }
 0x614   : > { %4630 = shalt.err (!%p4627_p3)
}
 0x615   : > { %4554 = dma.vmem_to_hbm [thread:$0]  (%p4752_p5), %s4372_s21, 128, %s4374_s22, %s4358_s28  }
 0x616 PF: > { %p4560_p4 = scmp.ge.s32.totalorder %s4665_s27, 2  ;;  %s4385_s14 = sand.u32 1, %s4653_s24  }
 0x617   : > { %s4386_s17 = scalar_lea.sflag [#allocation3], %s4385_s14 }
 0x618   : > { %p4557_p7 = pnand %p4560_p4, %p4756_p6 }
 0x61a   : > { %p4558_p8 = pneg %p4557_p7 }
 0x61c   : > { %4648 = dma.done.wait (%p4558_p8), %s4386_s17, 128  }
 0x61d   : > { %4650 = vsyncadd (%p4558_p8), %s4386_s17, 4294967168  ;;  %p17_p9 = scmp.ge.s32.totalorder %s4739_s30, 4   ;;  %s8731_s24 = smov %s4657_s25 }
 0x61e   : > { %s8732_s25 = smov %s4661_s26  ;;  %s8733_s26 = smov %s4750_s10 }
 0x61f   : > { %s8734_s27 = smov %s4739_s30  ;;  %19 = sbr.rel (!%p17_p9) target bundleno = 3 (0x3), region = 85 }
 0x624   :  { %4392 = vsyncpa [#allocation3], 1 }
 0x625   :  { %4394 = vsyncpa [#allocation3 + $0x1], 1 }

</bundles_post_ra>
